<compile_context>
chip_gen: v5e
topology: v5e:2x2
jax: 0.10.0
libtpu: 0.0.40
codegen_flags: <defaults>
</compile_context>

<pallas_src>
import jax
import jax.numpy as jnp
from jax.experimental import pallas as pl
from jax.experimental.pallas import tpu as pltpu

INPUT_SIZE = 32
HIDDEN = [512, 256, 128, 64]
OUT = 5
BN_EPS = 1e-5

H4_PAD = 128      # hidden layer 4 padded 64 -> 128 lanes
OUT_PAD = 128     # output padded 5 -> 128 lanes (lane-dense stores)
TB = 256          # batch tile: fills the 256-row MXU on v6e/v7x (2 x 128 passes on v5e)


def esi_mlp_kernel(
    x_ref,
    w1_ref, b1_ref,
    w2_ref, b2_ref,
    w3_ref, b3_ref,
    w4_ref, b4_ref,
    w5_ref, b5_ref,
    o_ref,
):
    """Fused 5-layer MLP. BN is pre-folded into bf16 weights / f32 biases, so each
    hidden layer is relu(h @ W' + b'). Matmuls run bf16 on the MXU with f32 acc."""

    def layer(h_bf16, w_ref, b_ref, relu):
        z = jnp.dot(h_bf16, w_ref[...], preferred_element_type=jnp.float32)
        z = z + b_ref[...]                      # (1, C) f32 broadcasts over batch rows
        if relu:
            z = jnp.maximum(z, 0.0)
        return z

    h = x_ref[...].astype(jnp.bfloat16)
    h = layer(h, w1_ref, b1_ref, relu=True).astype(jnp.bfloat16)
    h = layer(h, w2_ref, b2_ref, relu=True).astype(jnp.bfloat16)
    h = layer(h, w3_ref, b3_ref, relu=True).astype(jnp.bfloat16)
    h = layer(h, w4_ref, b4_ref, relu=True).astype(jnp.bfloat16)
    out = layer(h, w5_ref, b5_ref, relu=False)
    o_ref[...] = out.astype(o_ref.dtype)


def make_params(key, input_size=INPUT_SIZE):
    dims = [input_size] + HIDDEN + [OUT]
    params = {}
    keys = jax.random.split(key, 32)
    ki = 0
    for li in range(5):
        fan_in, fan_out = dims[li], dims[li + 1]
        w = jax.random.normal(keys[ki], (fan_in, fan_out), jnp.float32) * (1.0 / jnp.sqrt(fan_in))
        ki += 1
        b = jax.random.normal(keys[ki], (fan_out,), jnp.float32) * 0.01
        ki += 1
        params[f"w{li+1}"] = w
        params[f"b{li+1}"] = b
    for li in range(4):
        c = dims[li + 1]
        params[f"gamma{li+1}"] = 1.0 + 0.1 * jax.random.normal(keys[ki], (c,), jnp.float32); ki += 1
        params[f"beta{li+1}"]  = 0.1 * jax.random.normal(keys[ki], (c,), jnp.float32); ki += 1
        params[f"mean{li+1}"]  = 0.1 * jax.random.normal(keys[ki], (c,), jnp.float32); ki += 1
        params[f"var{li+1}"]   = jax.random.uniform(keys[ki], (c,), jnp.float32, 0.5, 1.5); ki += 1
    return params


def fold_bn(params, li):
    gamma = params[f"gamma{li}"]
    beta = params[f"beta{li}"]
    mean = params[f"mean{li}"]
    var = params[f"var{li}"]
    scale = gamma * jax.lax.rsqrt(var + BN_EPS)
    shift = beta - mean * scale
    return scale, shift


def _prepare_operands(params):
    """Fold BN into W/b, zero-pad narrow trailing dims to 128 lanes, cast W to bf16."""
    ws, bs = [], []
    for li in range(1, 5):
        scale, shift = fold_bn(params, li)
        ws.append(params[f"w{li}"] * scale[None, :])
        bs.append(params[f"b{li}"] * scale + shift)
    ws.append(params["w5"])
    bs.append(params["b5"])

    # Pad hidden-4 (64 -> 128) and output (5 -> 128) with zeros. ReLU(0 + 0) = 0 and the
    # padded w5 rows/columns are zero, so padding never leaks into the real outputs.
    ws[3] = jnp.pad(ws[3], ((0, 0), (0, H4_PAD - ws[3].shape[1])))
    bs[3] = jnp.pad(bs[3], (0, H4_PAD - bs[3].shape[0]))
    ws[4] = jnp.pad(ws[4], ((0, H4_PAD - ws[4].shape[0]), (0, OUT_PAD - ws[4].shape[1])))
    bs[4] = jnp.pad(bs[4], (0, OUT_PAD - bs[4].shape[0]))

    ops = []
    for w, b in zip(ws, bs):
        ops.append(w.astype(jnp.bfloat16))                    # bf16 MXU operand
        ops.append(b.reshape(1, -1).astype(jnp.float32))      # f32 bias (incl. BN shift)
    return ops


@jax.jit
def esi_model_forward(x, params):
    B = x.shape[0]
    ops = _prepare_operands(params)

    # Pad batch to a multiple of the batch tile (zeros; extra rows are sliced off).
    B_pad = ((B + TB - 1) // TB) * TB
    if B_pad != B:
        x = jnp.pad(x, ((0, B_pad - B), (0, 0)))
    grid = (B_pad // TB,)

    # x is tiled along the batch axis; weights/biases have constant index maps so
    # they stay resident in VMEM across grid steps.
    in_specs = [pl.BlockSpec((TB, INPUT_SIZE), lambda i: (i, 0))]
    for a in ops:
        in_specs.append(pl.BlockSpec(a.shape, lambda i: (0, 0)))
    out_spec = pl.BlockSpec((TB, OUT_PAD), lambda i: (i, 0))

    flops = 2 * B_pad * (INPUT_SIZE * 512 + 512 * 256 + 256 * 128
                         + 128 * H4_PAD + H4_PAD * OUT_PAD)
    bytes_accessed = (B_pad * INPUT_SIZE * 4
                      + sum(int(a.size) * a.dtype.itemsize for a in ops)
                      + B_pad * OUT_PAD * 4)
    cost = pl.CostEstimate(flops=flops, transcendentals=0, bytes_accessed=bytes_accessed)

    out_padded = pl.pallas_call(
        esi_mlp_kernel,
        out_shape=jax.ShapeDtypeStruct((B_pad, OUT_PAD), jnp.float32),
        grid=grid,
        in_specs=in_specs,
        out_specs=out_spec,
        compiler_params=pltpu.CompilerParams(
            dimension_semantics=("parallel",),   # batch tiles shardable across v7x's 2 TCs
        ),
        cost_estimate=cost,
    )(x, *ops)

    return out_padded[:B, :OUT]


def esi_model_reference(x, params):
    h = x
    for li in range(1, 5):
        z = h @ params[f"w{li}"] + params[f"b{li}"]
        scale, shift = fold_bn(params, li)
        z = z * scale + shift
        h = jnp.maximum(z, 0.0)
    return h @ params["w5"] + params["b5"]


if __name__ == "__main__":
    key = jax.random.PRNGKey(0)
    k_params, k_x = jax.random.split(key)
    params = make_params(k_params)

    B = 8
    x = jax.random.normal(k_x, (B, INPUT_SIZE), jnp.float32)

    out = esi_model_forward(x, params)
    out = jax.block_until_ready(out)

    ref = esi_model_reference(x, params)
    assert out.shape == (B, OUT)
    # bf16 matmul operands -> loosened tolerance vs. the f32 reference.
    assert jnp.allclose(out, ref, atol=5e-2, rtol=5e-2), "mismatch vs reference"

    print("KERNEL_OK")
</pallas_src>

<mosaic_0001>
module attributes {stable_mosaic.version = 11 : i64} {
  func.func @esi_mlp_kernel(%arg0: i32, %arg1: memref<256x32xf32, #tpu.memory_space<vmem>>, %arg2: memref<32x512xbf16, #tpu.memory_space<vmem>>, %arg3: memref<1x512xf32, #tpu.memory_space<vmem>>, %arg4: memref<512x256xbf16, #tpu.memory_space<vmem>>, %arg5: memref<1x256xf32, #tpu.memory_space<vmem>>, %arg6: memref<256x128xbf16, #tpu.memory_space<vmem>>, %arg7: memref<1x128xf32, #tpu.memory_space<vmem>>, %arg8: memref<128x128xbf16, #tpu.memory_space<vmem>>, %arg9: memref<1x128xf32, #tpu.memory_space<vmem>>, %arg10: memref<128x128xbf16, #tpu.memory_space<vmem>>, %arg11: memref<1x128xf32, #tpu.memory_space<vmem>>, %arg12: memref<256x128xf32, #tpu.memory_space<vmem>>) attributes {dimension_semantics = [#tpu.dimension_semantics<parallel>], iteration_bounds = array<i64: 1>, scalar_prefetch = 0 : i64, scratch_operands = 0 : i64, tpu.core_type = #tpu.core_type<tc>, window_params = [{transform_indices = @transform_0, window_bounds = array<i64: 256, 32>}, {pipeline_mode = #tpu.pipeline_mode<synchronous>, transform_indices = @transform_1, window_bounds = array<i64: 32, 512>}, {pipeline_mode = #tpu.pipeline_mode<synchronous>, transform_indices = @transform_2, window_bounds = array<i64: 1, 512>}, {pipeline_mode = #tpu.pipeline_mode<synchronous>, transform_indices = @transform_3, window_bounds = array<i64: 512, 256>}, {pipeline_mode = #tpu.pipeline_mode<synchronous>, transform_indices = @transform_4, window_bounds = array<i64: 1, 256>}, {pipeline_mode = #tpu.pipeline_mode<synchronous>, transform_indices = @transform_5, window_bounds = array<i64: 256, 128>}, {pipeline_mode = #tpu.pipeline_mode<synchronous>, transform_indices = @transform_6, window_bounds = array<i64: 1, 128>}, {pipeline_mode = #tpu.pipeline_mode<synchronous>, transform_indices = @transform_7, window_bounds = array<i64: 128, 128>}, {pipeline_mode = #tpu.pipeline_mode<synchronous>, transform_indices = @transform_8, window_bounds = array<i64: 1, 128>}, {pipeline_mode = #tpu.pipeline_mode<synchronous>, transform_indices = @transform_9, window_bounds = array<i64: 128, 128>}, {pipeline_mode = #tpu.pipeline_mode<synchronous>, transform_indices = @transform_10, window_bounds = array<i64: 1, 128>}, {transform_indices = @transform_11, window_bounds = array<i64: 256, 128>}]} {
    %c0 = arith.constant 0 : index
    %c0_0 = arith.constant 0 : index
    %0 = vector.load %arg1[%c0, %c0_0] : memref<256x32xf32, #tpu.memory_space<vmem>>, vector<256x32xf32>
    %1 = arith.truncf %0 : vector<256x32xf32> to vector<256x32xbf16>
    %c0_1 = arith.constant 0 : index
    %c0_2 = arith.constant 0 : index
    %2 = vector.load %arg2[%c0_1, %c0_2] : memref<32x512xbf16, #tpu.memory_space<vmem>>, vector<32x512xbf16>
    %cst = arith.constant dense<0.000000e+00> : vector<256x512xf32>
    %3 = tpu.matmul %1, %2, %cst {dimension_numbers = #tpu.dot_dimension_numbers<[1], [0], [0], [1], [0, 0, 1, 1], [], []>} : vector<256x32xbf16>, vector<32x512xbf16>, vector<256x512xf32> -> vector<256x512xf32>
    %c0_3 = arith.constant 0 : index
    %c0_4 = arith.constant 0 : index
    %4 = vector.load %arg3[%c0_3, %c0_4] : memref<1x512xf32, #tpu.memory_space<vmem>>, vector<1x512xf32>
    %5 = vector.broadcast %4 : vector<1x512xf32> to vector<256x512xf32>
    %6 = arith.addf %3, %5 : vector<256x512xf32>
    %cst_5 = arith.constant 0.000000e+00 : f32
    %7 = vector.broadcast %cst_5 : f32 to vector<256x512xf32>
    %8 = arith.maximumf %6, %7 : vector<256x512xf32>
    %9 = arith.truncf %8 : vector<256x512xf32> to vector<256x512xbf16>
    %c0_6 = arith.constant 0 : index
    %c0_7 = arith.constant 0 : index
    %10 = vector.load %arg4[%c0_6, %c0_7] : memref<512x256xbf16, #tpu.memory_space<vmem>>, vector<512x256xbf16>
    %cst_8 = arith.constant dense<0.000000e+00> : vector<256x256xf32>
    %11 = tpu.matmul %9, %10, %cst_8 {dimension_numbers = #tpu.dot_dimension_numbers<[1], [0], [0], [1], [0, 0, 1, 1], [], []>} : vector<256x512xbf16>, vector<512x256xbf16>, vector<256x256xf32> -> vector<256x256xf32>
    %c0_9 = arith.constant 0 : index
    %c0_10 = arith.constant 0 : index
    %12 = vector.load %arg5[%c0_9, %c0_10] : memref<1x256xf32, #tpu.memory_space<vmem>>, vector<1x256xf32>
    %13 = vector.broadcast %12 : vector<1x256xf32> to vector<256x256xf32>
    %14 = arith.addf %11, %13 : vector<256x256xf32>
    %cst_11 = arith.constant 0.000000e+00 : f32
    %15 = vector.broadcast %cst_11 : f32 to vector<256x256xf32>
    %16 = arith.maximumf %14, %15 : vector<256x256xf32>
    %17 = arith.truncf %16 : vector<256x256xf32> to vector<256x256xbf16>
    %c0_12 = arith.constant 0 : index
    %c0_13 = arith.constant 0 : index
    %18 = vector.load %arg6[%c0_12, %c0_13] : memref<256x128xbf16, #tpu.memory_space<vmem>>, vector<256x128xbf16>
    %cst_14 = arith.constant dense<0.000000e+00> : vector<256x128xf32>
    %19 = tpu.matmul %17, %18, %cst_14 {dimension_numbers = #tpu.dot_dimension_numbers<[1], [0], [0], [1], [0, 0, 1, 1], [], []>} : vector<256x256xbf16>, vector<256x128xbf16>, vector<256x128xf32> -> vector<256x128xf32>
    %c0_15 = arith.constant 0 : index
    %c0_16 = arith.constant 0 : index
    %20 = vector.load %arg7[%c0_15, %c0_16] : memref<1x128xf32, #tpu.memory_space<vmem>>, vector<1x128xf32>
    %21 = vector.broadcast %20 : vector<1x128xf32> to vector<256x128xf32>
    %22 = arith.addf %19, %21 : vector<256x128xf32>
    %cst_17 = arith.constant 0.000000e+00 : f32
    %23 = vector.broadcast %cst_17 : f32 to vector<256x128xf32>
    %24 = arith.maximumf %22, %23 : vector<256x128xf32>
    %25 = arith.truncf %24 : vector<256x128xf32> to vector<256x128xbf16>
    %c0_18 = arith.constant 0 : index
    %c0_19 = arith.constant 0 : index
    %26 = vector.load %arg8[%c0_18, %c0_19] : memref<128x128xbf16, #tpu.memory_space<vmem>>, vector<128x128xbf16>
    %cst_20 = arith.constant dense<0.000000e+00> : vector<256x128xf32>
    %27 = tpu.matmul %25, %26, %cst_20 {dimension_numbers = #tpu.dot_dimension_numbers<[1], [0], [0], [1], [0, 0, 1, 1], [], []>} : vector<256x128xbf16>, vector<128x128xbf16>, vector<256x128xf32> -> vector<256x128xf32>
    %c0_21 = arith.constant 0 : index
    %c0_22 = arith.constant 0 : index
    %28 = vector.load %arg9[%c0_21, %c0_22] : memref<1x128xf32, #tpu.memory_space<vmem>>, vector<1x128xf32>
    %29 = vector.broadcast %28 : vector<1x128xf32> to vector<256x128xf32>
    %30 = arith.addf %27, %29 : vector<256x128xf32>
    %cst_23 = arith.constant 0.000000e+00 : f32
    %31 = vector.broadcast %cst_23 : f32 to vector<256x128xf32>
    %32 = arith.maximumf %30, %31 : vector<256x128xf32>
    %33 = arith.truncf %32 : vector<256x128xf32> to vector<256x128xbf16>
    %c0_24 = arith.constant 0 : index
    %c0_25 = arith.constant 0 : index
    %34 = vector.load %arg10[%c0_24, %c0_25] : memref<128x128xbf16, #tpu.memory_space<vmem>>, vector<128x128xbf16>
    %cst_26 = arith.constant dense<0.000000e+00> : vector<256x128xf32>
    %35 = tpu.matmul %33, %34, %cst_26 {dimension_numbers = #tpu.dot_dimension_numbers<[1], [0], [0], [1], [0, 0, 1, 1], [], []>} : vector<256x128xbf16>, vector<128x128xbf16>, vector<256x128xf32> -> vector<256x128xf32>
    %c0_27 = arith.constant 0 : index
    %c0_28 = arith.constant 0 : index
    %36 = vector.load %arg11[%c0_27, %c0_28] : memref<1x128xf32, #tpu.memory_space<vmem>>, vector<1x128xf32>
    %37 = vector.broadcast %36 : vector<1x128xf32> to vector<256x128xf32>
    %38 = arith.addf %35, %37 : vector<256x128xf32>
    %c0_29 = arith.constant 0 : index
    %c0_30 = arith.constant 0 : index
    %39 = vector.load %arg12[%c0_29, %c0_30] : memref<256x128xf32, #tpu.memory_space<vmem>>, vector<256x128xf32>
    tpu.vector_store %arg12[%c0_29, %c0_30], %38 {strides = array<i32>} : memref<256x128xf32, #tpu.memory_space<vmem>>, vector<256x128xf32>,
    return
  }
  func.func @transform_0(%arg0: i32) -> (i32, i32) {
    %c0_i32 = arith.constant 0 : i32
    %c0_i32_0 = arith.constant 0 : i32
    return %arg0, %c0_i32 : i32, i32
  }
  func.func @transform_1(%arg0: i32) -> (i32, i32) {
    %c0_i32 = arith.constant 0 : i32
    %c0_i32_0 = arith.constant 0 : i32
    %c0_i32_1 = arith.constant 0 : i32
    return %c0_i32, %c0_i32_0 : i32, i32
  }
  func.func @transform_2(%arg0: i32) -> (i32, i32) {
    %c0_i32 = arith.constant 0 : i32
    %c0_i32_0 = arith.constant 0 : i32
    %c0_i32_1 = arith.constant 0 : i32
    return %c0_i32, %c0_i32_0 : i32, i32
  }
  func.func @transform_3(%arg0: i32) -> (i32, i32) {
    %c0_i32 = arith.constant 0 : i32
    %c0_i32_0 = arith.constant 0 : i32
    %c0_i32_1 = arith.constant 0 : i32
    return %c0_i32, %c0_i32_0 : i32, i32
  }
  func.func @transform_4(%arg0: i32) -> (i32, i32) {
    %c0_i32 = arith.constant 0 : i32
    %c0_i32_0 = arith.constant 0 : i32
    %c0_i32_1 = arith.constant 0 : i32
    return %c0_i32, %c0_i32_0 : i32, i32
  }
  func.func @transform_5(%arg0: i32) -> (i32, i32) {
    %c0_i32 = arith.constant 0 : i32
    %c0_i32_0 = arith.constant 0 : i32
    %c0_i32_1 = arith.constant 0 : i32
    return %c0_i32, %c0_i32_0 : i32, i32
  }
  func.func @transform_6(%arg0: i32) -> (i32, i32) {
    %c0_i32 = arith.constant 0 : i32
    %c0_i32_0 = arith.constant 0 : i32
    %c0_i32_1 = arith.constant 0 : i32
    return %c0_i32, %c0_i32_0 : i32, i32
  }
  func.func @transform_7(%arg0: i32) -> (i32, i32) {
    %c0_i32 = arith.constant 0 : i32
    %c0_i32_0 = arith.constant 0 : i32
    %c0_i32_1 = arith.constant 0 : i32
    return %c0_i32, %c0_i32_0 : i32, i32
  }
  func.func @transform_8(%arg0: i32) -> (i32, i32) {
    %c0_i32 = arith.constant 0 : i32
    %c0_i32_0 = arith.constant 0 : i32
    %c0_i32_1 = arith.constant 0 : i32
    return %c0_i32, %c0_i32_0 : i32, i32
  }
  func.func @transform_9(%arg0: i32) -> (i32, i32) {
    %c0_i32 = arith.constant 0 : i32
    %c0_i32_0 = arith.constant 0 : i32
    %c0_i32_1 = arith.constant 0 : i32
    return %c0_i32, %c0_i32_0 : i32, i32
  }
  func.func @transform_10(%arg0: i32) -> (i32, i32) {
    %c0_i32 = arith.constant 0 : i32
    %c0_i32_0 = arith.constant 0 : i32
    %c0_i32_1 = arith.constant 0 : i32
    return %c0_i32, %c0_i32_0 : i32, i32
  }
  func.func @transform_11(%arg0: i32) -> (i32, i32) {
    %c0_i32 = arith.constant 0 : i32
    %c0_i32_0 = arith.constant 0 : i32
    return %arg0, %c0_i32 : i32, i32
  }
}

</mosaic_0001>

<bundles_post_ra>
// kernel: esi_model_forward.1
= control target key start
LH: loop header
LB: loop body
LE: loop exit
PB: predicated region body
PF: predicated region fallthrough
CT: control target
= control target key end

     0   :  { %vm145_vm0 = vcmask 261120   ;;  %s5002_s1 = inlined_call_operand.vmem [shape: bf16[32,512], index: 1, kind: input, shape index: {}]   ;;  %s5003_s0 = inlined_call_operand.vmem [shape: f32[256,32], index: 0, kind: input, shape index: {}]   ;;  %s5004_s3 = inlined_call_operand.vmem [shape: bf16[512,256], index: 3, kind: input, shape index: {}]   ;;  %s5005_s2 = inlined_call_operand.vmem [shape: f32[1,512], index: 2, kind: input, shape index: {}]   ;;  %s5006_s4 = inlined_call_operand.vmem [shape: f32[1,256], index: 4, kind: input, shape index: {}]   ;;  %s5007_s5 = inlined_call_operand.vmem [shape: bf16[256,128], index: 5, kind: input, shape index: {}]   ;;  %s5008_s7 = inlined_call_operand.vmem [shape: bf16[128,128], index: 7, kind: input, shape index: {}]   ;;  %s5009_s6 = inlined_call_operand.vmem [shape: f32[1,128], index: 6, kind: input, shape index: {}]   ;;  %s5010_s9 = inlined_call_operand.vmem [shape: bf16[128,128], index: 9, kind: input, shape index: {}]   ;;  %s5011_s8 = inlined_call_operand.vmem [shape: f32[1,128], index: 8, kind: input, shape index: {}]   ;;  %s5012_s10 = inlined_call_operand.vmem [shape: f32[1,128], index: 10, kind: input, shape index: {}]   ;;  %s5013_s11 = inlined_call_operand.vmem [shape: f32[256,128], index: 11, kind: output, shape index: {}]  }
   0x1   :  { %v2714_v0 = vld [vmem:[%s5002_s1 + $0x20] sm:$0xf]  ;;  %v3182_v1 = vld [vmem:[%s5002_s1 + $0x2c] sm:$0xf0]  ;;  %v3180_v2 = vld [vmem:[%s5002_s1 + $0x24] sm:$0xf] }
   0x2   :  { %v2715_v3 = vor.u32 %v3182_v1, %v2714_v0  ;;  %v2716_v4 = vld [vmem:[%s5002_s1 + $0x30] sm:$0xf0]  ;;  %v2722_v5 = vld [vmem:[%s5002_s1 + $0x28] sm:$0xf]  ;;  %v3183_v6 = vld [vmem:[%s5002_s1 + $0x34] sm:$0xf0] }
   0x3   :  { %v2719_v7 = vor.u32 %v3180_v2, %v2716_v4  ;;  %v2723_v8 = vor.u32 %v3183_v6, %v2722_v5  ;;  %v3181_v9 = vld [vmem:[%s5002_s1 + $0x2c] sm:$0xf]  ;;  %v2724_v10 = vld [vmem:[%s5002_s1 + $0x38] sm:$0xf0]  ;;  %v2698_v11 = vld [vmem:[%s5002_s1] sm:$0xf] }
   0x4   :  { %200 = vmatpush.bf16.msra.mxu0 %v2715_v3  ;;  %v2727_v12 = vor.u32 %v3181_v9, %v2724_v10  ;;  %v3178_v13 = vld [vmem:[%s5002_s1 + $0xc] sm:$0xf0]  ;;  %v3176_v14 = vld [vmem:[%s5002_s1 + $0x4] sm:$0xf]  ;;  %v2700_v15 = vld [vmem:[%s5002_s1 + $0x10] sm:$0xf0] }
   0x5   :  { %289 = vmatpush.bf16.msra.mxu1 %v2719_v7  ;;  %378 = vmatpush.bf16.msra.mxu2 %v2723_v8  ;;  %v2699_v16 = vor.u32 %v3178_v13, %v2698_v11  ;;  %v2703_v17 = vor.u32 %v3176_v14, %v2700_v15  ;;  %v2706_v18 = vld [vmem:[%s5002_s1 + $0x8] sm:$0xf]  ;;  %v3179_v19 = vld [vmem:[%s5002_s1 + $0x14] sm:$0xf0]  ;;  %v3177_v20 = vld [vmem:[%s5002_s1 + $0xc] sm:$0xf] }
   0x6   :  { %467 = vmatpush.bf16.msra.mxu3 %v2727_v12  ;;  %v2707_v21 = vor.u32 %v3179_v19, %v2706_v18  ;;  %v2708_v22 = vld [vmem:[%s5002_s1 + $0x18] sm:$0xf0]  ;;  %v39_v23 = vld [vmem:[%s5003_s0] sm:$0xff]  ;;  %v40_v24 = vld [vmem:[%s5003_s0 + $0x8] sm:$0xff] }
   0x7   :  { %v2711_v25 = vor.u32 %v3177_v20, %v2708_v22  ;;  %v71_v26 = vpack.c.bf16 %v40_v24, %v39_v23  ;;  %v2850_v27 = vld [vmem:[%s5004_s3 + $0x70] sm:$0xf]  ;;  %v3199_v28 = vld [vmem:[%s5004_s3 + $0x74] sm:$0xf0]  ;;  %v2842_v33 = vld [vmem:[%s5004_s3 + $0x60] sm:$0xf] }
   0x8   :  { %v2914_v29 = vld [vmem:[%s5004_s3 + $0xf0] sm:$0xf]  ;;  %201 = vmatpush.bf16.msra.mxu0 %v2699_v16  ;;  %v2851_v30 = vor.u32 %v3199_v28, %v2850_v27  ;;  %v3215_v31 = vld [vmem:[%s5004_s3 + $0xf4] sm:$0xf0]  ;;  %v3197_v34 = vld [vmem:[%s5004_s3 + $0x64] sm:$0xf0] }
   0x9   :  { %290 = vmatpush.bf16.msra.mxu1 %v2703_v17  ;;  %379 = vmatpush.bf16.msra.mxu2 %v2707_v21  ;;  %v2915_v32 = vor.u32 %v3215_v31, %v2914_v29  ;;  %v2906_v35 = vld [vmem:[%s5004_s3 + $0xe0] sm:$0xf]  ;;  %v2843_v36 = vor.u32 %v3197_v34, %v2842_v33  ;;  %v3213_v37 = vld [vmem:[%s5004_s3 + $0xe4] sm:$0xf0]  ;;  %v41_v39 = vld [vmem:[%s5003_s0 + $0x10] sm:$0xff] }
   0xa   :  { %468 = vmatpush.bf16.msra.mxu3 %v2711_v25  ;;  %v2907_v38 = vor.u32 %v3213_v37, %v2906_v35  ;;  %v42_v40 = vld [vmem:[%s5003_s0 + $0x18] sm:$0xff]  ;;  %v43_v42 = vld [vmem:[%s5003_s0 + $0x20] sm:$0xff]  ;;  %v44_v43 = vld [vmem:[%s5003_s0 + $0x28] sm:$0xff] }
   0xb   :  { %2728 = vmatmul.msk.bf16.vlgmr.msra.gmra.mxu0 %vm145_vm0, %v71_v26  ;;  %v72_v41 = vpack.c.bf16 %v42_v40, %v41_v39  ;;  %v73_v44 = vpack.c.bf16 %v44_v43, %v43_v42  ;;  %v2834_v45 = vld [vmem:[%s5004_s3 + $0x50] sm:$0xf]  ;;  %v3195_v46 = vld [vmem:[%s5004_s3 + $0x54] sm:$0xf0]  ;;  %v47_v54 = vld [vmem:[%s5003_s0 + $0x40] sm:$0xff] }
   0xc   :  { %1132 = vmatpush.bf16.msrb.mxu0 %v2851_v30  ;;  %2744 = vmatmul.msk.bf16.vlgmr.msra.gmra.mxu1 %vm145_vm0, %v71_v26  ;;  %v2898_v47 = vld [vmem:[%s5004_s3 + $0xd0] sm:$0xf]  ;;  %v2835_v48 = vor.u32 %v3195_v46, %v2834_v45  ;;  %v3211_v49 = vld [vmem:[%s5004_s3 + $0xd4] sm:$0xf0]  ;;  %v48_v55 = vld [vmem:[%s5003_s0 + $0x48] sm:$0xff] }
   0xd   :  { %1221 = vmatpush.bf16.msrb.mxu1 %v2915_v32  ;;  %2760 = vmatmul.msk.bf16.vlgmr.msra.gmra.mxu2 %vm145_vm0, %v71_v26  ;;  %v2899_v50 = vor.u32 %v3211_v49, %v2898_v47  ;;  %v45_v51 = vld [vmem:[%s5003_s0 + $0x30] sm:$0xff]  ;;  %v46_v52 = vld [vmem:[%s5003_s0 + $0x38] sm:$0xff]  ;;  %v75_v56 = vpack.c.bf16 %v48_v55, %v47_v54  ;;  %v2826_v57 = vld [vmem:[%s5004_s3 + $0x40] sm:$0xf] }
   0xe   :  { %2776 = vmatmul.msk.bf16.vlgmr.msra.gmra.mxu3 %vm145_vm0, %v71_v26  ;;  %v74_v53 = vpack.c.bf16 %v46_v52, %v45_v51  ;;  %v3193_v58 = vld [vmem:[%s5004_s3 + $0x44] sm:$0xf0]  ;;  %v2890_v59 = vld [vmem:[%s5004_s3 + $0xc0] sm:$0xf]  ;;  %v2978_v62 = vld [vmem:[%s5004_s3 + $0x170] sm:$0xf] }
   0xf   :  { %v2827_v60 = vor.u32 %v3193_v58, %v2826_v57  ;;  %v3209_v61 = vld [vmem:[%s5004_s3 + $0xc4] sm:$0xf0]  ;;  %v3231_v63 = vld [vmem:[%s5004_s3 + $0x174] sm:$0xf0]  ;;  %v49_v2 = vld [vmem:[%s5003_s0 + $0x50] sm:$0xff] }
  0x10   :  { %1133 = vmatpush.bf16.msrb.mxu0 %v2843_v36  ;;  %v2891_v0 = vor.u32 %v3209_v61, %v2890_v59  ;;  %v2979_v1 = vor.u32 %v3231_v63, %v2978_v62  ;;  %v50_v3 = vld [vmem:[%s5003_s0 + $0x58] sm:$0xff]  ;;  %v3042_v5 = vld [vmem:[%s5004_s3 + $0x1f0] sm:$0xf]  ;;  %v51_v8 = vld [vmem:[%s5003_s0 + $0x60] sm:$0xff] }
  0x11   :  { %1222 = vmatpush.bf16.msrb.mxu1 %v2907_v38  ;;  %v76_v4 = vpack.c.bf16 %v50_v3, %v49_v2  ;;  %v3247_v6 = vld [vmem:[%s5004_s3 + $0x1f4] sm:$0xf0]  ;;  %v52_v9 = vld [vmem:[%s5003_s0 + $0x68] sm:$0xff]  ;;  %v2818_v11 = vld [vmem:[%s5004_s3 + $0x30] sm:$0xf] }
  0x12   :  { %1310 = vmatpush.bf16.msrb.mxu2 %v2979_v1  ;;  %v3043_v7 = vor.u32 %v3247_v6, %v3042_v5  ;;  %v77_v10 = vpack.c.bf16 %v52_v9, %v51_v8  ;;  %v3191_v12 = vld [vmem:[%s5004_s3 + $0x34] sm:$0xf0]  ;;  %v2882_v13 = vld [vmem:[%s5004_s3 + $0xb0] sm:$0xf]  ;;  %v2970_v20 = vld [vmem:[%s5004_s3 + $0x160] sm:$0xf] }
  0x13   :  { %v2819_v14 = vor.u32 %v3191_v12, %v2818_v11  ;;  %v3207_v15 = vld [vmem:[%s5004_s3 + $0xb4] sm:$0xf0]  ;;  %v53_v17 = vld [vmem:[%s5003_s0 + $0x70] sm:$0xff]  ;;  %v3229_v21 = vld [vmem:[%s5004_s3 + $0x164] sm:$0xf0] }
  0x14   :  { %1134 = vmatpush.bf16.msrb.mxu0 %v2835_v48  ;;  %1399 = vmatpush.bf16.msrb.mxu3 %v3043_v7  ;;  %v2883_v16 = vor.u32 %v3207_v15, %v2882_v13  ;;  %v54_v18 = vld [vmem:[%s5003_s0 + $0x78] sm:$0xff]  ;;  %v3034_v22 = vld [vmem:[%s5004_s3 + $0x1e0] sm:$0xf]  ;;  %v2971_v23 = vor.u32 %v3229_v21, %v2970_v20  ;;  %v3245_v24 = vld [vmem:[%s5004_s3 + $0x1e4] sm:$0xf0] }
  0x15   :  { %1223 = vmatpush.bf16.msrb.mxu1 %v2899_v50  ;;  %v78_v19 = vpack.c.bf16 %v54_v18, %v53_v17  ;;  %v3035_v25 = vor.u32 %v3245_v24, %v3034_v22  ;;  %v55_v26 = vld [vmem:[%s5003_s0 + $0x80] sm:$0xff]  ;;  %v56_v27 = vld [vmem:[%s5003_s0 + $0x88] sm:$0xff]  ;;  %v57_v52 = vld [vmem:[%s5003_s0 + $0x90] sm:$0xff] }
  0x16   :  { %1311 = vmatpush.bf16.msrb.mxu2 %v2971_v23  ;;  %v79_v28 = vpack.c.bf16 %v56_v27, %v55_v26  ;;  %v3565_v29 = vld [vmem:[%s5005_s2] sm:$0xf]  ;;  %v3189_v35 = vld [vmem:[%s5004_s3 + $0x24] sm:$0xf0]  ;;  %v2962_v61 = vld [vmem:[%s5004_s3 + $0x150] sm:$0xf] }
  0x17   :  { %v3568_v32 = vperm.slane %v3565_v29, 0  ;;  %v3572_v33 = vperm.slane %v3565_v29, 1  ;;  %v2810_v34 = vld [vmem:[%s5004_s3 + $0x20] sm:$0xf]  ;;  %v3205_v38 = vld [vmem:[%s5004_s3 + $0xa4] sm:$0xf0] }
  0x18   :  { %1135 = vmatpush.bf16.msrb.mxu0 %v2827_v60  ;;  %1400 = vmatpush.bf16.msrb.mxu3 %v3035_v25  ;;  %v2874_v36 = vld [vmem:[%s5004_s3 + $0xa0] sm:$0xf]  ;;  %v2811_v37 = vor.u32 %v3189_v35, %v2810_v34  ;;  %v3227_v62 = vld [vmem:[%s5004_s3 + $0x154] sm:$0xf0]  ;;  %v2802_v24 = vld [vmem:[%s5004_s3 + $0x10] sm:$0xf] }
  0x19   :  { %1224 = vmatpush.bf16.msrb.mxu1 %v2891_v0  ;;  %v2963_v63 = vor.u32 %v3227_v62, %v2962_v61  ;;  %v3026_v0 = vld [vmem:[%s5004_s3 + $0x1d0] sm:$0xf]  ;;  %v3243_v1 = vld [vmem:[%s5004_s3 + $0x1d4] sm:$0xf0]  ;;  %v59_v15 = vld [vmem:[%s5003_s0 + $0xa0] sm:$0xff] }
  0x1a   :  { %v3027_v2 = vor.u32 %v3243_v1, %v3026_v0  ;;  %v3187_v25 = vld [vmem:[%s5004_s3 + $0x14] sm:$0xf0]  ;;  %v2866_v26 = vld [vmem:[%s5004_s3 + $0x90] sm:$0xf]  ;;  %v3225_v61 = vld [vmem:[%s5004_s3 + $0x144] sm:$0xf0] }
  0x1b   :  { %2729 = vmatmul.msk.bf16.gmra.mxu0 %vm145_vm0, %v72_v41  ;;  %1312 = vmatpush.bf16.msrb.mxu2 %v2963_v63  ;;  %v2803_v27 = vor.u32 %v3187_v25, %v2802_v24  ;;  %v3018_v63 = vld [vmem:[%s5004_s3 + $0x1c0] sm:$0xf]  ;;  %v3241_v0 = vld [vmem:[%s5004_s3 + $0x1c4] sm:$0xf0] }
  0x1c   :  { %2745 = vmatmul.msk.bf16.gmra.mxu1 %vm145_vm0, %v72_v41  ;;  %1136 = vmatpush.bf16.msrb.mxu0 %v2819_v14  ;;  %v3019_v1 = vor.u32 %v3241_v0, %v3018_v63  ;;  %v66_v63 = vld [vmem:[%s5003_s0 + $0xd8] sm:$0xff] }
  0x1d   :  { %2761 = vmatmul.msk.bf16.gmra.mxu2 %vm145_vm0, %v72_v41  ;;  %1225 = vmatpush.bf16.msrb.mxu1 %v2883_v16  ;;  %v60_v16 = vld [vmem:[%s5003_s0 + $0xa8] sm:$0xff] }
  0x1e   :  { %2777 = vmatmul.msk.bf16.gmra.mxu3 %vm145_vm0, %v72_v41  ;;  %v2875_v41 = vor.u32 %v3205_v38, %v2874_v36  ;;  %v81_v20 = vpack.c.bf16 %v60_v16, %v59_v15  ;;  %v63_v16 = vld [vmem:[%s5003_s0 + $0xc0] sm:$0xff] }
  0x1f   :  { %1401 = vmatpush.bf16.msrb.mxu3 %v3027_v2 }
  0x20   :  { %1137 = vmatpush.bf16.msrb.mxu0 %v2811_v37 }
  0x21   :  { %1226 = vmatpush.bf16.msrb.mxu1 %v2875_v41 }
  0x23   :  { %1402 = vmatpush.bf16.msrb.mxu3 %v3019_v1 }
  0x24   :  { %1138 = vmatpush.bf16.msrb.mxu0 %v2803_v27 }
  0x2b   :  { %2730 = vmatmul.msk.bf16.gmra.mxu0 %vm145_vm0, %v73_v44 }
  0x2c   :  { %2746 = vmatmul.msk.bf16.gmra.mxu1 %vm145_vm0, %v73_v44 }
  0x2d   :  { %2762 = vmatmul.msk.bf16.gmra.mxu2 %vm145_vm0, %v73_v44 }
  0x2e   :  { %2778 = vmatmul.msk.bf16.gmra.mxu3 %vm145_vm0, %v73_v44 }
  0x3b   :  { %2731 = vmatmul.msk.bf16.gmra.mxu0 %vm145_vm0, %v74_v53 }
  0x3c   :  { %2747 = vmatmul.msk.bf16.gmra.mxu1 %vm145_vm0, %v74_v53 }
  0x3d   :  { %2763 = vmatmul.msk.bf16.gmra.mxu2 %vm145_vm0, %v74_v53 }
  0x3e   :  { %2779 = vmatmul.msk.bf16.gmra.mxu3 %vm145_vm0, %v74_v53  ;;  %v58_v53 = vld [vmem:[%s5003_s0 + $0x98] sm:$0xff] }
  0x3f   :  { %v80_v57 = vpack.c.bf16 %v58_v53, %v57_v52 }
  0x4b   :  { %2732 = vmatmul.msk.bf16.gmra.mxu0 %vm145_vm0, %v75_v56 }
  0x4c   :  { %2748 = vmatmul.msk.bf16.gmra.mxu1 %vm145_vm0, %v75_v56 }
  0x4d   :  { %2764 = vmatmul.msk.bf16.gmra.mxu2 %vm145_vm0, %v75_v56 }
  0x4e   :  { %2780 = vmatmul.msk.bf16.gmra.mxu3 %vm145_vm0, %v75_v56 }
  0x5b   :  { %2733 = vmatmul.msk.bf16.gmra.mxu0 %vm145_vm0, %v76_v4 }
  0x5c   :  { %2749 = vmatmul.msk.bf16.gmra.mxu1 %vm145_vm0, %v76_v4 }
  0x5d   :  { %2765 = vmatmul.msk.bf16.gmra.mxu2 %vm145_vm0, %v76_v4 }
  0x5e   :  { %2781 = vmatmul.msk.bf16.gmra.mxu3 %vm145_vm0, %v76_v4 }
  0x6b   :  { %2734 = vmatmul.msk.bf16.gmra.mxu0 %vm145_vm0, %v77_v10 }
  0x6c   :  { %2750 = vmatmul.msk.bf16.gmra.mxu1 %vm145_vm0, %v77_v10 }
  0x6d   :  { %2766 = vmatmul.msk.bf16.gmra.mxu2 %vm145_vm0, %v77_v10 }
  0x6e   :  { %2782 = vmatmul.msk.bf16.gmra.mxu3 %vm145_vm0, %v77_v10 }
  0x7b   :  { %2735 = vmatmul.msk.bf16.gmra.mxu0 %vm145_vm0, %v78_v19 }
  0x7c   :  { %2751 = vmatmul.msk.bf16.gmra.mxu1 %vm145_vm0, %v78_v19 }
  0x7d   :  { %2767 = vmatmul.msk.bf16.gmra.mxu2 %vm145_vm0, %v78_v19 }
  0x7e   :  { %2783 = vmatmul.msk.bf16.gmra.mxu3 %vm145_vm0, %v78_v19 }
  0x88   :  { %v203_v30 = vpop.f32.mrf.mxu0 }
  0x89   :  { %v292_v31 = vpop.f32.mrf.mxu1  ;;  %v204_v39 = vadd.f32 %v203_v30, %v3568_v32 }
  0x8a   :  { %v293_v42 = vadd.f32 %v292_v31, %v3572_v33 }
  0x8b   :  { %2736 = vmatmul.msk.bf16.gmra.mxu0 %vm145_vm0, %v79_v28  ;;  %v550_v48 = vmax.f32 %v204_v39, 0.0 }
  0x8c   :  { %2752 = vmatmul.msk.bf16.gmra.mxu1 %vm145_vm0, %v79_v28  ;;  %v551_v50 = vmax.f32 %v293_v42, 0.0 }
  0x8d   :  { %2768 = vmatmul.msk.bf16.gmra.mxu2 %vm145_vm0, %v79_v28 }
  0x8e   :  { %2784 = vmatmul.msk.bf16.gmra.mxu3 %vm145_vm0, %v79_v28  ;;  %v3203_v28 = vld [vmem:[%s5004_s3 + $0x94] sm:$0xf0] }
  0x8f   :  { %v2867_v34 = vor.u32 %v3203_v28, %v2866_v26 }
  0x90   :  { %v3590_v40 = vpop.f32.mrf.mxu2  ;;  %v205_v44 = vpop.f32.mrf.mxu0 }
  0x91   :  { %v3593_v43 = vpop.f32.mrf.mxu3  ;;  %v206_v45 = vadd.f32 %v205_v44, %v3568_v32  ;;  %v294_v46 = vpop.f32.mrf.mxu1  ;;  %1227 = vmatpush.bf16.msrb.mxu1 %v2867_v34  ;;  %v3185_v34 = vld [vmem:[%s5004_s3 + $0x4] sm:$0xf0] }
  0x92   :  { %v295_v47 = vadd.f32 %v294_v46, %v3572_v33 }
  0x93   :  { %v554_v49 = vmax.f32 %v206_v45, 0.0 }
  0x94   :  { %v555_v51 = vmax.f32 %v295_v47, 0.0  ;;  %v61_v47 = vld [vmem:[%s5003_s0 + $0xb0] sm:$0xff] }
  0x95   :  { %v3603_v54 = vpack.c.bf16 %v554_v49, %v550_v48  ;;  %v62_v48 = vld [vmem:[%s5003_s0 + $0xb8] sm:$0xff] }
  0x96   :  { %v3605_v55 = vpack.c.bf16 %v555_v51, %v551_v50  ;;  %v82_v52 = vpack.c.bf16 %v62_v48, %v61_v47 }
  0x97   :  { %5048 = vst [vmem:[#allocation2_spill] sm:$0xff] %v3603_v54 }
  0x98   :  { %5049 = vst [vmem:[#allocation3_spill] sm:$0xff] %v3605_v55  ;;  %v3607_v56 = vpop.f32.mrf.mxu2  ;;  %v208_v59 = vpop.f32.mrf.mxu0 }
  0x99   :  { %v3609_v58 = vpop.f32.mrf.mxu3  ;;  %v297_v60 = vpop.f32.mrf.mxu1  ;;  %v209_v3 = vadd.f32 %v208_v59, %v3568_v32 }
  0x9a   :  { %v298_v5 = vadd.f32 %v297_v60, %v3572_v33  ;;  %v2954_v60 = vld [vmem:[%s5004_s3 + $0x140] sm:$0xf] }
  0x9b   :  { %2737 = vmatmul.msk.bf16.gmra.mxu0 %vm145_vm0, %v80_v57  ;;  %v558_v11 = vmax.f32 %v209_v3, 0.0  ;;  %v2955_v62 = vor.u32 %v3225_v61, %v2954_v60 }
  0x9c   :  { %2753 = vmatmul.msk.bf16.gmra.mxu1 %vm145_vm0, %v80_v57  ;;  %v559_v13 = vmax.f32 %v298_v5, 0.0 }
  0x9d   :  { %2769 = vmatmul.msk.bf16.gmra.mxu2 %vm145_vm0, %v80_v57 }
  0x9e   :  { %2785 = vmatmul.msk.bf16.gmra.mxu3 %vm145_vm0, %v80_v57  ;;  %1313 = vmatpush.bf16.msrb.mxu2 %v2955_v62  ;;  %v65_v62 = vld [vmem:[%s5003_s0 + $0xd0] sm:$0xff] }
  0xa0   :  { %v3628_v4 = vpop.f32.mrf.mxu2  ;;  %v210_v7 = vpop.f32.mrf.mxu0 }
  0xa1   :  { %v3631_v6 = vpop.f32.mrf.mxu3  ;;  %v211_v8 = vadd.f32 %v210_v7, %v3568_v32  ;;  %v299_v9 = vpop.f32.mrf.mxu1 }
  0xa2   :  { %v300_v10 = vadd.f32 %v299_v9, %v3572_v33 }
  0xa3   :  { %v562_v12 = vmax.f32 %v211_v8, 0.0 }
  0xa4   :  { %v563_v14 = vmax.f32 %v300_v10, 0.0 }
  0xa5   :  { %v3641_v17 = vpack.c.bf16 %v562_v12, %v558_v11 }
  0xa6   :  { %v3643_v18 = vpack.c.bf16 %v563_v14, %v559_v13 }
  0xa7   :  { %5050 = vst [vmem:[#allocation4_spill] sm:$0xff] %v3641_v17 }
  0xa8   :  { %5051 = vst [vmem:[#allocation5_spill] sm:$0xff] %v3643_v18  ;;  %v3645_v19 = vpop.f32.mrf.mxu2  ;;  %v213_v22 = vpop.f32.mrf.mxu0 }
  0xa9   :  { %v3647_v21 = vpop.f32.mrf.mxu3  ;;  %v302_v23 = vpop.f32.mrf.mxu1  ;;  %v214_v30 = vadd.f32 %v213_v22, %v3568_v32 }
  0xaa   :  { %v303_v35 = vadd.f32 %v302_v23, %v3572_v33 }
  0xab   :  { %2738 = vmatmul.msk.bf16.gmra.mxu0 %vm145_vm0, %v81_v20  ;;  %v566_v42 = vmax.f32 %v214_v30, 0.0  ;;  %v2794_v30 = vld [vmem:[%s5004_s3] sm:$0xf] }
  0xac   :  { %2754 = vmatmul.msk.bf16.gmra.mxu1 %vm145_vm0, %v81_v20  ;;  %v567_v45 = vmax.f32 %v303_v35, 0.0  ;;  %v2858_v35 = vld [vmem:[%s5004_s3 + $0x80] sm:$0xf] }
  0xad   :  { %2770 = vmatmul.msk.bf16.gmra.mxu2 %vm145_vm0, %v81_v20 }
  0xae   :  { %2786 = vmatmul.msk.bf16.gmra.mxu3 %vm145_vm0, %v81_v20  ;;  %v64_v20 = vld [vmem:[%s5003_s0 + $0xc8] sm:$0xff] }
  0xaf   :  { %v83_v25 = vpack.c.bf16 %v64_v20, %v63_v16 }
  0xb0   :  { %v3666_v31 = vpop.f32.mrf.mxu2  ;;  %v215_v37 = vpop.f32.mrf.mxu0 }
  0xb1   :  { %v3669_v36 = vpop.f32.mrf.mxu3  ;;  %v216_v38 = vadd.f32 %v215_v37, %v3568_v32  ;;  %v304_v39 = vpop.f32.mrf.mxu1  ;;  %v2795_v37 = vor.u32 %v3185_v34, %v2794_v30  ;;  %v3002_v30 = vld [vmem:[%s5004_s3 + $0x1a0] sm:$0xf] }
  0xb2   :  { %v305_v41 = vadd.f32 %v304_v39, %v3572_v33 }
  0xb3   :  { %v570_v44 = vmax.f32 %v216_v38, 0.0  ;;  %v3201_v38 = vld [vmem:[%s5004_s3 + $0x84] sm:$0xf0]  ;;  %1139 = vmatpush.bf16.msrb.mxu0 %v2795_v37 }
  0xb4   :  { %v571_v46 = vmax.f32 %v305_v41, 0.0 }
  0xb5   :  { %v3679_v49 = vpack.c.bf16 %v570_v44, %v566_v42  ;;  %v2859_v42 = vor.u32 %v3201_v38, %v2858_v35 }
  0xb6   :  { %v3681_v50 = vpack.c.bf16 %v571_v46, %v567_v45 }
  0xb7   :  { %5052 = vst [vmem:[#allocation6_spill] sm:$0xff] %v3679_v49  ;;  %1228 = vmatpush.bf16.msrb.mxu1 %v2859_v42 }
  0xb8   :  { %5053 = vst [vmem:[#allocation7_spill] sm:$0xff] %v3681_v50  ;;  %v3683_v51 = vpop.f32.mrf.mxu2  ;;  %v218_v57 = vpop.f32.mrf.mxu0 }
  0xb9   :  { %v3685_v53 = vpop.f32.mrf.mxu3  ;;  %v307_v59 = vpop.f32.mrf.mxu1  ;;  %v219_v2 = vadd.f32 %v218_v57, %v3568_v32 }
  0xba   :  { %v308_v5 = vadd.f32 %v307_v59, %v3572_v33 }
  0xbb   :  { %2739 = vmatmul.msk.bf16.gmra.mxu0 %vm145_vm0, %v82_v52  ;;  %v574_v12 = vmax.f32 %v219_v2, 0.0 }
  0xbc   :  { %2755 = vmatmul.msk.bf16.gmra.mxu1 %vm145_vm0, %v82_v52  ;;  %v575_v14 = vmax.f32 %v308_v5, 0.0  ;;  %v84_v5 = vpack.c.bf16 %v66_v63, %v65_v62 }
  0xbd   :  { %2771 = vmatmul.msk.bf16.gmra.mxu2 %vm145_vm0, %v82_v52 }
  0xbe   :  { %2787 = vmatmul.msk.bf16.gmra.mxu3 %vm145_vm0, %v82_v52 }
  0xc0   :  { %v3704_v3 = vpop.f32.mrf.mxu2  ;;  %v220_v8 = vpop.f32.mrf.mxu0 }
  0xc1   :  { %v3707_v7 = vpop.f32.mrf.mxu3  ;;  %v221_v9 = vadd.f32 %v220_v8, %v3568_v32  ;;  %v309_v10 = vpop.f32.mrf.mxu1 }
  0xc2   :  { %v310_v11 = vadd.f32 %v309_v10, %v3572_v33 }
  0xc3   :  { %v578_v13 = vmax.f32 %v221_v9, 0.0 }
  0xc4   :  { %v579_v15 = vmax.f32 %v310_v11, 0.0  ;;  %v2946_v11 = vld [vmem:[%s5004_s3 + $0x130] sm:$0xf] }
  0xc5   :  { %v3717_v22 = vpack.c.bf16 %v578_v13, %v574_v12  ;;  %v3223_v12 = vld [vmem:[%s5004_s3 + $0x134] sm:$0xf0] }
  0xc6   :  { %v3719_v23 = vpack.c.bf16 %v579_v15, %v575_v14  ;;  %v2947_v13 = vor.u32 %v3223_v12, %v2946_v11  ;;  %v3010_v14 = vld [vmem:[%s5004_s3 + $0x1b0] sm:$0xf]  ;;  %v3239_v15 = vld [vmem:[%s5004_s3 + $0x1b4] sm:$0xf0] }
  0xc7   :  { %5054 = vst [vmem:[#allocation8_spill] sm:$0xff] %v3717_v22  ;;  %v3011_v16 = vor.u32 %v3239_v15, %v3010_v14 }
  0xc8   :  { %5055 = vst [vmem:[#allocation9_spill] sm:$0xff] %v3719_v23  ;;  %v3721_v24 = vpop.f32.mrf.mxu2  ;;  %v223_v27 = vpop.f32.mrf.mxu0  ;;  %1314 = vmatpush.bf16.msrb.mxu2 %v2947_v13 }
  0xc9   :  { %v3723_v26 = vpop.f32.mrf.mxu3  ;;  %v312_v28 = vpop.f32.mrf.mxu1  ;;  %v224_v39 = vadd.f32 %v223_v27, %v3568_v32  ;;  %1403 = vmatpush.bf16.msrb.mxu3 %v3011_v16  ;;  %v2938_v27 = vld [vmem:[%s5004_s3 + $0x120] sm:$0xf] }
  0xca   :  { %v313_v44 = vadd.f32 %v312_v28, %v3572_v33  ;;  %v3221_v28 = vld [vmem:[%s5004_s3 + $0x124] sm:$0xf0]  ;;  %v2922_v16 = vld [vmem:[%s5004_s3 + $0x100] sm:$0xf] }
  0xcb   :  { %2740 = vmatmul.msk.bf16.gmra.mxu0 %vm145_vm0, %v83_v25  ;;  %v582_v57 = vmax.f32 %v224_v39, 0.0  ;;  %v2939_v38 = vor.u32 %v3221_v28, %v2938_v27  ;;  %v3237_v39 = vld [vmem:[%s5004_s3 + $0x1a4] sm:$0xf0]  ;;  %v2986_v27 = vld [vmem:[%s5004_s3 + $0x180] sm:$0xf] }
  0xcc   :  { %2756 = vmatmul.msk.bf16.gmra.mxu1 %vm145_vm0, %v83_v25  ;;  %v583_v60 = vmax.f32 %v313_v44, 0.0 }
  0xcd   :  { %2772 = vmatmul.msk.bf16.gmra.mxu2 %vm145_vm0, %v83_v25 }
  0xce   :  { %2788 = vmatmul.msk.bf16.gmra.mxu3 %vm145_vm0, %v83_v25  ;;  %1315 = vmatpush.bf16.msrb.mxu2 %v2939_v38 }
  0xd0   :  { %v3742_v41 = vpop.f32.mrf.mxu2  ;;  %v225_v46 = vpop.f32.mrf.mxu0 }
  0xd1   :  { %v3745_v45 = vpop.f32.mrf.mxu3  ;;  %v226_v47 = vadd.f32 %v225_v46, %v3568_v32  ;;  %v314_v48 = vpop.f32.mrf.mxu1  ;;  %v3003_v46 = vor.u32 %v3237_v39, %v3002_v30 }
  0xd2   :  { %v315_v52 = vadd.f32 %v314_v48, %v3572_v33  ;;  %v67_v48 = vld [vmem:[%s5003_s0 + $0xe0] sm:$0xff] }
  0xd3   :  { %v586_v59 = vmax.f32 %v226_v47, 0.0  ;;  %1404 = vmatpush.bf16.msrb.mxu3 %v3003_v46  ;;  %v3214_v46 = vld [vmem:[%s5004_s3 + $0xf4] sm:$0xf] }
  0xd4   :  { %v587_v61 = vmax.f32 %v315_v52, 0.0  ;;  %v68_v52 = vld [vmem:[%s5003_s0 + $0xe8] sm:$0xff] }
  0xd5   :  { %v3755_v0 = vpack.c.bf16 %v586_v59, %v582_v57  ;;  %v85_v15 = vpack.c.bf16 %v68_v52, %v67_v48  ;;  %v2916_v48 = vld [vmem:[%s5004_s3 + $0xf8] sm:$0xf0] }
  0xd6   :  { %v3757_v1 = vpack.c.bf16 %v587_v61, %v583_v60  ;;  %v2930_v60 = vld [vmem:[%s5004_s3 + $0x110] sm:$0xf]  ;;  %v3219_v61 = vld [vmem:[%s5004_s3 + $0x114] sm:$0xf0] }
  0xd7   :  { %5056 = vst [vmem:[#allocation10_spill] sm:$0xff] %v3755_v0 }
  0xd8   :  { %5057 = vst [vmem:[#allocation11_spill] sm:$0xff] %v3757_v1  ;;  %v3759_v2 = vpop.f32.mrf.mxu2  ;;  %v228_v9 = vpop.f32.mrf.mxu0 }
  0xd9   :  { %v3761_v8 = vpop.f32.mrf.mxu3  ;;  %v317_v10 = vpop.f32.mrf.mxu1  ;;  %v229_v20 = vadd.f32 %v228_v9, %v3568_v32  ;;  %v2994_v9 = vld [vmem:[%s5004_s3 + $0x190] sm:$0xf] }
  0xda   :  { %v318_v34 = vadd.f32 %v317_v10, %v3572_v33  ;;  %v3235_v10 = vld [vmem:[%s5004_s3 + $0x194] sm:$0xf0] }
  0xdb   :  { %2741 = vmatmul.msk.bf16.gmra.mxu0 %vm145_vm0, %v84_v5  ;;  %v590_v57 = vmax.f32 %v229_v20, 0.0  ;;  %v2995_v11 = vor.u32 %v3235_v10, %v2994_v9  ;;  %v3217_v20 = vld [vmem:[%s5004_s3 + $0x104] sm:$0xf0] }
  0xdc   :  { %2757 = vmatmul.msk.bf16.gmra.mxu1 %vm145_vm0, %v84_v5  ;;  %v591_v62 = vmax.f32 %v318_v34, 0.0  ;;  %v2923_v34 = vor.u32 %v3217_v20, %v2922_v16  ;;  %v69_v20 = vld [vmem:[%s5003_s0 + $0xf0] sm:$0xff] }
  0xdd   :  { %2773 = vmatmul.msk.bf16.gmra.mxu2 %vm145_vm0, %v84_v5  ;;  %1405 = vmatpush.bf16.msrb.mxu3 %v2995_v11 }
  0xde   :  { %2789 = vmatmul.msk.bf16.gmra.mxu3 %vm145_vm0, %v84_v5  ;;  %v2931_v5 = vor.u32 %v3219_v61, %v2930_v60 }
  0xe0   :  { %v3780_v25 = vpop.f32.mrf.mxu2  ;;  %v230_v37 = vpop.f32.mrf.mxu0  ;;  %1316 = vmatpush.bf16.msrb.mxu2 %v2931_v5 }
  0xe1   :  { %v3792_v35 = vpop.f32.mrf.mxu3  ;;  %v231_v42 = vadd.f32 %v230_v37, %v3568_v32  ;;  %v319_v44 = vpop.f32.mrf.mxu1  ;;  %v3233_v37 = vld [vmem:[%s5004_s3 + $0x184] sm:$0xf0] }
  0xe2   :  { %v320_v47 = vadd.f32 %v319_v44, %v3572_v33  ;;  %v2987_v39 = vor.u32 %v3233_v37, %v2986_v27  ;;  %v2852_v44 = vld [vmem:[%s5004_s3 + $0x78] sm:$0xf0] }
  0xe3   :  { %v594_v59 = vmax.f32 %v231_v42, 0.0  ;;  %v3198_v42 = vld [vmem:[%s5004_s3 + $0x74] sm:$0xf]  ;;  %v70_v27 = vld [vmem:[%s5003_s0 + $0xf8] sm:$0xff] }
  0xe4   :  { %v595_v63 = vmax.f32 %v320_v47, 0.0  ;;  %1317 = vmatpush.bf16.msrb.mxu2 %v2923_v34  ;;  %1406 = vmatpush.bf16.msrb.mxu3 %v2987_v39  ;;  %v2855_v47 = vor.u32 %v3198_v42, %v2852_v44 }
  0xe5   :  { %v3817_v12 = vpack.c.bf16 %v594_v59, %v590_v57  ;;  %v2919_v59 = vor.u32 %v3214_v46, %v2916_v48  ;;  %v3880_v46 = vperm.slane %v3565_v29, 2 }
  0xe6   :  { %v3819_v13 = vpack.c.bf16 %v595_v63, %v591_v62  ;;  %1488 = vmatpush.bf16.msra.mxu0 %v2855_v47  ;;  %v3883_v47 = vperm.slane %v3565_v29, 3 }
  0xe7   :  { %5058 = vst [vmem:[#allocation12_spill] sm:$0xff] %v3817_v12  ;;  %1577 = vmatpush.bf16.msra.mxu1 %v2919_v59 }
  0xe8   :  { %5059 = vst [vmem:[#allocation13_spill] sm:$0xff] %v3819_v13  ;;  %v3821_v14 = vpop.f32.mrf.mxu2  ;;  %v233_v30 = vpop.f32.mrf.mxu0 }
  0xe9   :  { %v3832_v28 = vpop.f32.mrf.mxu3  ;;  %v322_v38 = vpop.f32.mrf.mxu1  ;;  %v234_v52 = vadd.f32 %v233_v30, %v3568_v32 }
  0xea   :  { %v323_v60 = vadd.f32 %v322_v38, %v3572_v33  ;;  %v86_v38 = vpack.c.bf16 %v70_v27, %v69_v20 }
  0xeb   :  { %2742 = vmatmul.msk.bf16.gmra.mxu0 %vm145_vm0, %v85_v15  ;;  %v598_v10 = vmax.f32 %v234_v52, 0.0 }
  0xec   :  { %2758 = vmatmul.msk.bf16.gmra.mxu1 %vm145_vm0, %v85_v15 }
  0xed   :  { %2774 = vmatmul.msk.bf16.gmra.mxu2 %vm145_vm0, %v85_v15 }
  0xee   :  { %2790 = vmatmul.msk.bf16.gmra.mxu3 %vm145_vm0, %v85_v15  ;;  %v599_v15 = vmax.f32 %v323_v60, 0.0 }
  0xf0   :  { %v3854_v57 = vpop.f32.mrf.mxu2  ;;  %v235_v62 = vpop.f32.mrf.mxu0 }
  0xf1   :  { %v3857_v61 = vpop.f32.mrf.mxu3  ;;  %v236_v63 = vadd.f32 %v235_v62, %v3568_v32  ;;  %v324_v5 = vpop.f32.mrf.mxu1 }
  0xf2   :  { %v325_v9 = vadd.f32 %v324_v5, %v3572_v33 }
  0xf3   :  { %v602_v11 = vmax.f32 %v236_v63, 0.0 }
  0xf4   :  { %v603_v16 = vmax.f32 %v325_v9, 0.0  ;;  %v382_v9 = vadd.f32 %v3590_v40, %v3880_v46 }
  0xf5   :  { %v3867_v30 = vpack.c.bf16 %v602_v11, %v598_v10  ;;  %v384_v10 = vadd.f32 %v3607_v56, %v3880_v46  ;;  %v471_v11 = vadd.f32 %v3593_v43, %v3883_v47 }
  0xf6   :  { %v3869_v34 = vpack.c.bf16 %v603_v16, %v599_v15  ;;  %v473_v15 = vadd.f32 %v3609_v58, %v3883_v47 }
  0xf7   :  { %5060 = vst [vmem:[#allocation14_spill] sm:$0xff] %v3867_v30 }
  0xf8   :  { %5061 = vst [vmem:[#allocation15_spill] sm:$0xff] %v3869_v34  ;;  %v3871_v37 = vpop.f32.mrf.mxu2  ;;  %v238_v42 = vpop.f32.mrf.mxu0  ;;  %v557_v56 = vmax.f32 %v473_v15, 0.0 }
  0xf9   :  { %v3873_v39 = vpop.f32.mrf.mxu3  ;;  %v327_v44 = vpop.f32.mrf.mxu1  ;;  %v239_v48 = vadd.f32 %v238_v42, %v3568_v32 }
  0xfa   :  { %v328_v59 = vadd.f32 %v327_v44, %v3572_v33  ;;  %v552_v44 = vmax.f32 %v382_v9, 0.0  ;;  %v2908_v9 = vld [vmem:[%s5004_s3 + $0xe8] sm:$0xf0] }
  0xfb   :  { %2743 = vmatmul.msk.bf16.gmra.mxu0 %vm145_vm0, %v86_v38  ;;  %v606_v16 = vmax.f32 %v239_v48, 0.0  ;;  %v3196_v48 = vld [vmem:[%s5004_s3 + $0x64] sm:$0xf] }
  0xfc   :  { %2759 = vmatmul.msk.bf16.gmra.mxu1 %vm145_vm0, %v86_v38  ;;  %v607_v27 = vmax.f32 %v328_v59, 0.0  ;;  %v2844_v59 = vld [vmem:[%s5004_s3 + $0x68] sm:$0xf0] }
  0xfd   :  { %2775 = vmatmul.msk.bf16.gmra.mxu2 %vm145_vm0, %v86_v38 }
  0xfe   :  { %2791 = vmatmul.msk.bf16.gmra.mxu3 %vm145_vm0, %v86_v38 }
 0x100   :  { %v3886_v52 = vpop.f32.mrf.mxu2  ;;  %v240_v62 = vpop.f32.mrf.mxu0 }
 0x101   :  { %5062 = vst [vmem:[#allocation16_spill] sm:$0xff] %v3886_v52  ;;  %v3889_v60 = vpop.f32.mrf.mxu3  ;;  %v241_v63 = vadd.f32 %v240_v62, %v3568_v32  ;;  %v329_v5 = vpop.f32.mrf.mxu1  ;;  %v556_v62 = vmax.f32 %v384_v10, 0.0 }
 0x102   :  { %5063 = vst [vmem:[#allocation17_spill] sm:$0xff] %v3889_v60  ;;  %v330_v29 = vadd.f32 %v329_v5, %v3572_v33  ;;  %v553_v60 = vmax.f32 %v471_v11, 0.0 }
 0x103   :  { %v610_v20 = vmax.f32 %v241_v63, 0.0  ;;  %v3909_v30 = vpack.c.bf16 %v556_v62, %v552_v44  ;;  %v2847_v63 = vor.u32 %v3196_v48, %v2844_v59  ;;  %v387_v44 = vadd.f32 %v3628_v4, %v3880_v46 }
 0x104   :  { %v611_v38 = vmax.f32 %v330_v29, 0.0  ;;  %v3911_v58 = vpack.c.bf16 %v557_v56, %v553_v60  ;;  %v3212_v60 = vld [vmem:[%s5004_s3 + $0xe4] sm:$0xf]  ;;  %v389_v62 = vadd.f32 %v3645_v19, %v3880_v46 }
 0x105   :  { %v3901_v42 = vpack.c.bf16 %v610_v20, %v606_v16  ;;  %5064 = vst [vmem:[#allocation18_spill] sm:$0xff] %v3909_v30  ;;  %v2911_v11 = vor.u32 %v3212_v60, %v2908_v9  ;;  %1489 = vmatpush.bf16.msra.mxu0 %v2847_v63 }
 0x106   :  { %v3903_v40 = vpack.c.bf16 %v611_v38, %v607_v27  ;;  %5065 = vst [vmem:[#allocation19_spill] sm:$0xff] %v3911_v58 }
 0x107   :  { %1578 = vmatpush.bf16.msra.mxu1 %v2911_v11  ;;  %v560_v11 = vmax.f32 %v387_v44, 0.0 }
 0x108   :  { %v3905_v52 = vpop.f32.mrf.mxu2  ;;  %v243_v43 = vpop.f32.mrf.mxu0 }
 0x109   :  { %v3907_v5 = vpop.f32.mrf.mxu3  ;;  %v332_v34 = vpop.f32.mrf.mxu1  ;;  %v244_v10 = vadd.f32 %v243_v43, %v3568_v32  ;;  %v476_v43 = vadd.f32 %v3631_v6, %v3883_v47 }
 0x10a   :  { %v333_v15 = vadd.f32 %v332_v34, %v3572_v33  ;;  %v478_v34 = vadd.f32 %v3647_v21, %v3883_v47 }
 0x10b   :  { %1140 = vmatmul.bf16.vlgmr.msrb.gmra.mxu0 %v3603_v54  ;;  %v614_v48 = vmax.f32 %v244_v10, 0.0 }
 0x10c   :  { %1229 = vmatmul.bf16.vlgmr.msrb.gmra.mxu1 %v3605_v55  ;;  %v615_v60 = vmax.f32 %v333_v15, 0.0  ;;  %v565_v19 = vmax.f32 %v478_v34, 0.0  ;;  %v394_v34 = vadd.f32 %v3683_v51, %v3880_v46 }
 0x10d   :  { %1318 = vmatmul.bf16.vlgmr.msrb.gmra.mxu2 %v3909_v30 }
 0x10e   :  { %1407 = vmatmul.bf16.vlgmr.msrb.gmra.mxu3 %v3911_v58  ;;  %v561_v58 = vmax.f32 %v476_v43, 0.0 }
 0x110   :  { %v3930_v29 = vpop.f32.mrf.mxu2  ;;  %v245_v20 = vpop.f32.mrf.mxu0  ;;  %v3956_v21 = vpack.c.bf16 %v565_v19, %v561_v58  ;;  %v392_v58 = vadd.f32 %v3666_v31, %v3880_v46 }
 0x111   :  { %v3933_v16 = vpop.f32.mrf.mxu3  ;;  %v246_v27 = vadd.f32 %v245_v20, %v3568_v32  ;;  %v334_v38 = vpop.f32.mrf.mxu1  ;;  %v564_v20 = vmax.f32 %v389_v62, 0.0 }
 0x112   :  { %v335_v56 = vadd.f32 %v334_v38, %v3572_v33  ;;  %5067 = vst [vmem:[#allocation21_spill] sm:$0xff] %v3956_v21 }
 0x113   :  { %v618_v59 = vmax.f32 %v246_v27, 0.0  ;;  %v3953_v54 = vpack.c.bf16 %v564_v20, %v560_v11 }
 0x114   :  { %v619_v63 = vmax.f32 %v335_v56, 0.0 }
 0x115   :  { %v3945_v9 = vpack.c.bf16 %v618_v59, %v614_v48  ;;  %5066 = vst [vmem:[#allocation20_spill] sm:$0xff] %v3953_v54  ;;  %v481_v59 = vadd.f32 %v3669_v36, %v3883_v47 }
 0x116   :  { %v3947_v4 = vpack.c.bf16 %v619_v63, %v615_v60 }
 0x118   :  { %v3949_v30 = vpop.f32.mrf.mxu2  ;;  %v248_v6 = vpop.f32.mrf.mxu0 }
 0x119   :  { %v3951_v38 = vpop.f32.mrf.mxu3  ;;  %v337_v55 = vpop.f32.mrf.mxu1  ;;  %v249_v10 = vadd.f32 %v248_v6, %v3568_v32  ;;  %v568_v6 = vmax.f32 %v392_v58, 0.0  ;;  %v2900_v58 = vld [vmem:[%s5004_s3 + $0xd8] sm:$0xf0] }
 0x11a   :  { %v338_v27 = vadd.f32 %v337_v55, %v3572_v33  ;;  %v483_v55 = vadd.f32 %v3685_v53, %v3883_v47 }
 0x11b   :  { %1145 = vmatmul.bf16.gmra.mxu0 %v3641_v17  ;;  %v622_v60 = vmax.f32 %v249_v10, 0.0  ;;  %v3194_v10 = vld [vmem:[%s5004_s3 + $0x54] sm:$0xf] }
 0x11c   :  { %1234 = vmatmul.bf16.gmra.mxu1 %v3643_v18  ;;  %v623_v11 = vmax.f32 %v338_v27, 0.0  ;;  %v573_v51 = vmax.f32 %v483_v55, 0.0  ;;  %v2836_v27 = vld [vmem:[%s5004_s3 + $0x58] sm:$0xf0] }
 0x11d   :  { %1323 = vmatmul.bf16.gmra.mxu2 %v3953_v54 }
 0x11e   :  { %1412 = vmatmul.bf16.gmra.mxu3 %v3956_v21  ;;  %v569_v21 = vmax.f32 %v481_v59, 0.0 }
 0x120   :  { %v3962_v15 = vpop.f32.mrf.mxu2  ;;  %v250_v62 = vpop.f32.mrf.mxu0  ;;  %v3988_v53 = vpack.c.bf16 %v573_v51, %v569_v21  ;;  %v2839_v21 = vor.u32 %v3194_v10, %v2836_v27 }
 0x121   :  { %v3965_v44 = vpop.f32.mrf.mxu3  ;;  %v251_v56 = vadd.f32 %v250_v62, %v3568_v32  ;;  %v339_v43 = vpop.f32.mrf.mxu1  ;;  %v572_v62 = vmax.f32 %v394_v34, 0.0 }
 0x122   :  { %v340_v48 = vadd.f32 %v339_v43, %v3572_v33  ;;  %5069 = vst [vmem:[#allocation23_spill] sm:$0xff] %v3988_v53  ;;  %1490 = vmatpush.bf16.msra.mxu0 %v2839_v21 }
 0x123   :  { %v626_v63 = vmax.f32 %v251_v56, 0.0  ;;  %v3985_v17 = vpack.c.bf16 %v572_v62, %v568_v6  ;;  %v3210_v56 = vld [vmem:[%s5004_s3 + $0xd4] sm:$0xf]  ;;  %v397_v6 = vadd.f32 %v3704_v3, %v3880_v46  ;;  %v399_v62 = vadd.f32 %v3721_v24, %v3880_v46 }
 0x124   :  { %v627_v20 = vmax.f32 %v340_v48, 0.0  ;;  %v2903_v59 = vor.u32 %v3210_v56, %v2900_v58 }
 0x125   :  { %v3977_v19 = vpack.c.bf16 %v626_v63, %v622_v60  ;;  %5068 = vst [vmem:[#allocation22_spill] sm:$0xff] %v3985_v17 }
 0x126   :  { %v3979_v31 = vpack.c.bf16 %v627_v20, %v623_v11  ;;  %1579 = vmatpush.bf16.msra.mxu1 %v2903_v59  ;;  %v576_v59 = vmax.f32 %v397_v6, 0.0 }
 0x128   :  { %v3981_v54 = vpop.f32.mrf.mxu2  ;;  %v253_v36 = vpop.f32.mrf.mxu0 }
 0x129   :  { %v3983_v43 = vpop.f32.mrf.mxu3  ;;  %v342_v18 = vpop.f32.mrf.mxu1  ;;  %v254_v34 = vadd.f32 %v253_v36, %v3568_v32  ;;  %v486_v36 = vadd.f32 %v3707_v7, %v3883_v47 }
 0x12a   :  { %v343_v55 = vadd.f32 %v342_v18, %v3572_v33  ;;  %v488_v18 = vadd.f32 %v3723_v26, %v3883_v47 }
 0x12b   :  { %1150 = vmatmul.bf16.gmra.mxu0 %v3679_v49  ;;  %v630_v10 = vmax.f32 %v254_v34, 0.0 }
 0x12c   :  { %1239 = vmatmul.bf16.gmra.mxu1 %v3681_v50  ;;  %v631_v56 = vmax.f32 %v343_v55, 0.0  ;;  %v581_v24 = vmax.f32 %v488_v18, 0.0  ;;  %v404_v18 = vadd.f32 %v3759_v2, %v3880_v46 }
 0x12d   :  { %1328 = vmatmul.bf16.gmra.mxu2 %v3985_v17 }
 0x12e   :  { %1417 = vmatmul.bf16.gmra.mxu3 %v3988_v53  ;;  %v577_v53 = vmax.f32 %v486_v36, 0.0 }
 0x130   :  { %v4006_v48 = vpop.f32.mrf.mxu2  ;;  %v255_v63 = vpop.f32.mrf.mxu0  ;;  %v4032_v26 = vpack.c.bf16 %v581_v24, %v577_v53  ;;  %v402_v53 = vadd.f32 %v3742_v41, %v3880_v46 }
 0x131   :  { %v4009_v60 = vpop.f32.mrf.mxu3  ;;  %v256_v11 = vadd.f32 %v255_v63, %v3568_v32  ;;  %v344_v20 = vpop.f32.mrf.mxu1  ;;  %v580_v63 = vmax.f32 %v399_v62, 0.0 }
 0x132   :  { %v345_v51 = vadd.f32 %v344_v20, %v3572_v33  ;;  %5071 = vst [vmem:[#allocation25_spill] sm:$0xff] %v4032_v26 }
 0x133   :  { %v634_v27 = vmax.f32 %v256_v11, 0.0  ;;  %v4029_v49 = vpack.c.bf16 %v580_v63, %v576_v59 }
 0x134   :  { %v635_v21 = vmax.f32 %v345_v51, 0.0 }
 0x135   :  { %v4021_v58 = vpack.c.bf16 %v634_v27, %v630_v10  ;;  %5070 = vst [vmem:[#allocation24_spill] sm:$0xff] %v4029_v49  ;;  %v491_v27 = vadd.f32 %v3745_v45, %v3883_v47 }
 0x136   :  { %v4023_v3 = vpack.c.bf16 %v635_v21, %v631_v56 }
 0x138   :  { %v4025_v17 = vpop.f32.mrf.mxu2  ;;  %v258_v7 = vpop.f32.mrf.mxu0 }
 0x139   :  { %v4027_v20 = vpop.f32.mrf.mxu3  ;;  %v347_v50 = vpop.f32.mrf.mxu1  ;;  %v259_v34 = vadd.f32 %v258_v7, %v3568_v32  ;;  %v584_v7 = vmax.f32 %v402_v53, 0.0  ;;  %v2892_v53 = vld [vmem:[%s5004_s3 + $0xc8] sm:$0xf0] }
 0x13a   :  { %v348_v11 = vadd.f32 %v347_v50, %v3572_v33  ;;  %v493_v50 = vadd.f32 %v3761_v8, %v3883_v47 }
 0x13b   :  { %1155 = vmatmul.bf16.gmra.mxu0 %v3717_v22  ;;  %v638_v56 = vmax.f32 %v259_v34, 0.0  ;;  %v3192_v34 = vld [vmem:[%s5004_s3 + $0x44] sm:$0xf] }
 0x13c   :  { %1244 = vmatmul.bf16.gmra.mxu1 %v3719_v23  ;;  %v639_v59 = vmax.f32 %v348_v11, 0.0  ;;  %v589_v2 = vmax.f32 %v493_v50, 0.0  ;;  %v2828_v11 = vld [vmem:[%s5004_s3 + $0x48] sm:$0xf0] }
 0x13d   :  { %1333 = vmatmul.bf16.gmra.mxu2 %v4029_v49 }
 0x13e   :  { %1422 = vmatmul.bf16.gmra.mxu3 %v4032_v26  ;;  %v585_v26 = vmax.f32 %v491_v27, 0.0 }
 0x140   :  { %v4038_v55 = vpop.f32.mrf.mxu2  ;;  %v260_v62 = vpop.f32.mrf.mxu0  ;;  %v4064_v8 = vpack.c.bf16 %v589_v2, %v585_v26  ;;  %v2831_v26 = vor.u32 %v3192_v34, %v2828_v11 }
 0x141   :  { %v4041_v6 = vpop.f32.mrf.mxu3  ;;  %v261_v51 = vadd.f32 %v260_v62, %v3568_v32  ;;  %v349_v36 = vpop.f32.mrf.mxu1  ;;  %v588_v62 = vmax.f32 %v404_v18, 0.0 }
 0x142   :  { %v350_v10 = vadd.f32 %v349_v36, %v3572_v33  ;;  %5073 = vst [vmem:[#allocation27_spill] sm:$0xff] %v4064_v8  ;;  %1491 = vmatpush.bf16.msra.mxu0 %v2831_v26 }
 0x143   :  { %v642_v21 = vmax.f32 %v261_v51, 0.0  ;;  %v4061_v22 = vpack.c.bf16 %v588_v62, %v584_v7  ;;  %v3208_v51 = vld [vmem:[%s5004_s3 + $0xc4] sm:$0xf]  ;;  %v407_v7 = vadd.f32 %v3780_v25, %v3880_v46  ;;  %v409_v62 = vadd.f32 %v3821_v14, %v3880_v46 }
 0x144   :  { %v643_v63 = vmax.f32 %v350_v10, 0.0  ;;  %v2895_v27 = vor.u32 %v3208_v51, %v2892_v53 }
 0x145   :  { %v4053_v24 = vpack.c.bf16 %v642_v21, %v638_v56  ;;  %5072 = vst [vmem:[#allocation26_spill] sm:$0xff] %v4061_v22 }
 0x146   :  { %v4055_v41 = vpack.c.bf16 %v643_v63, %v639_v59  ;;  %1580 = vmatpush.bf16.msra.mxu1 %v2895_v27  ;;  %v592_v27 = vmax.f32 %v407_v7, 0.0  ;;  %v3044_v7 = vld [vmem:[%s5004_s3 + $0x1f8] sm:$0xf0] }
 0x148   :  { %v4057_v49 = vpop.f32.mrf.mxu2  ;;  %v263_v45 = vpop.f32.mrf.mxu0 }
 0x149   :  { %v4059_v36 = vpop.f32.mrf.mxu3  ;;  %v352_v23 = vpop.f32.mrf.mxu1  ;;  %v264_v18 = vadd.f32 %v263_v45, %v3568_v32  ;;  %v496_v45 = vadd.f32 %v3792_v35, %v3883_v47 }
 0x14a   :  { %v353_v50 = vadd.f32 %v352_v23, %v3572_v33  ;;  %v498_v23 = vadd.f32 %v3832_v28, %v3883_v47 }
 0x14b   :  { %1160 = vmatmul.bf16.gmra.mxu0 %v3755_v0  ;;  %v646_v34 = vmax.f32 %v264_v18, 0.0  ;;  %v3230_v18 = vld [vmem:[%s5004_s3 + $0x174] sm:$0xf] }
 0x14c   :  { %1249 = vmatmul.bf16.gmra.mxu1 %v3757_v1  ;;  %v647_v51 = vmax.f32 %v353_v50, 0.0  ;;  %v597_v14 = vmax.f32 %v498_v23, 0.0  ;;  %v2980_v50 = vld [vmem:[%s5004_s3 + $0x178] sm:$0xf0] }
 0x14d   :  { %1338 = vmatmul.bf16.gmra.mxu2 %v4061_v22 }
 0x14e   :  { %1427 = vmatmul.bf16.gmra.mxu3 %v4064_v8  ;;  %v593_v8 = vmax.f32 %v496_v45, 0.0 }
 0x150   :  { %v4082_v10 = vpop.f32.mrf.mxu2  ;;  %v265_v21 = vpop.f32.mrf.mxu0  ;;  %v4108_v28 = vpack.c.bf16 %v597_v14, %v593_v8  ;;  %v3246_v8 = vld [vmem:[%s5004_s3 + $0x1f4] sm:$0xf] }
 0x151   :  { %v4085_v56 = vpop.f32.mrf.mxu3  ;;  %v266_v59 = vadd.f32 %v265_v21, %v3568_v32  ;;  %v354_v63 = vpop.f32.mrf.mxu1  ;;  %v596_v21 = vmax.f32 %v409_v62, 0.0  ;;  %v3047_v62 = vor.u32 %v3246_v8, %v3044_v7 }
 0x152   :  { %v355_v2 = vadd.f32 %v354_v63, %v3572_v33  ;;  %5075 = vst [vmem:[#allocation29_spill] sm:$0xff] %v4108_v28 }
 0x153   :  { %v650_v11 = vmax.f32 %v266_v59, 0.0  ;;  %v4105_v0 = vpack.c.bf16 %v596_v21, %v592_v27  ;;  %v2983_v59 = vor.u32 %v3230_v18, %v2980_v50  ;;  %1755 = vmatpush.bf16.msra.mxu3 %v3047_v62  ;;  %v412_v27 = vadd.f32 %v3854_v57, %v3880_v46 }
 0x154   :  { %v651_v26 = vmax.f32 %v355_v2, 0.0  ;;  %v414_v21 = vadd.f32 %v3871_v37, %v3880_v46 }
 0x155   :  { %v4097_v53 = vpack.c.bf16 %v650_v11, %v646_v34  ;;  %5074 = vst [vmem:[#allocation28_spill] sm:$0xff] %v4105_v0  ;;  %1666 = vmatpush.bf16.msra.mxu2 %v2983_v59  ;;  %v600_v62 = vmax.f32 %v412_v27, 0.0  ;;  %v2820_v27 = vld [vmem:[%s5004_s3 + $0x38] sm:$0xf0] }
 0x156   :  { %v4099_v25 = vpack.c.bf16 %v651_v26, %v647_v51 }
 0x158   :  { %v4101_v22 = vpop.f32.mrf.mxu2  ;;  %v268_v35 = vpop.f32.mrf.mxu0 }
 0x159   :  { %v4103_v63 = vpop.f32.mrf.mxu3  ;;  %v357_v1 = vpop.f32.mrf.mxu1  ;;  %v269_v2 = vadd.f32 %v268_v35, %v3568_v32  ;;  %v501_v35 = vadd.f32 %v3857_v61, %v3883_v47 }
 0x15a   :  { %v358_v23 = vadd.f32 %v357_v1, %v3572_v33  ;;  %v503_v1 = vadd.f32 %v3873_v39, %v3883_v47  ;;  %v5079_v39 = vld [vmem:[#allocation14_spill] sm:$0xff] }
 0x15b   :  { %1165 = vmatmul.bf16.gmra.mxu0 %v3817_v12  ;;  %v654_v18 = vmax.f32 %v269_v2, 0.0 }
 0x15c   :  { %1254 = vmatmul.bf16.gmra.mxu1 %v3819_v13  ;;  %v655_v59 = vmax.f32 %v358_v23, 0.0  ;;  %v605_v37 = vmax.f32 %v503_v1, 0.0  ;;  %v5081_v23 = vld [vmem:[#allocation15_spill] sm:$0xff] }
 0x15d   :  { %1343 = vmatmul.bf16.gmra.mxu2 %v4105_v0 }
 0x15e   :  { %1432 = vmatmul.bf16.gmra.mxu3 %v4108_v28  ;;  %v601_v28 = vmax.f32 %v501_v35, 0.0 }
 0x160   :  { %v4126_v45 = vpop.f32.mrf.mxu2  ;;  %v270_v11 = vpop.f32.mrf.mxu0  ;;  %v4152_v2 = vpack.c.bf16 %v605_v37, %v601_v28  ;;  %v5084_v37 = vld [vmem:[#allocation16_spill] sm:$0xff] }
 0x161   :  { %v4129_v34 = vpop.f32.mrf.mxu3  ;;  %v271_v51 = vadd.f32 %v270_v11, %v3568_v32  ;;  %v359_v26 = vpop.f32.mrf.mxu1  ;;  %v604_v11 = vmax.f32 %v414_v21, 0.0  ;;  %v3206_v21 = vld [vmem:[%s5004_s3 + $0xb4] sm:$0xf] }
 0x162   :  { %v360_v14 = vadd.f32 %v359_v26, %v3572_v33  ;;  %5080 = vst [vmem:[#allocation33_spill] sm:$0xff] %v4152_v2 }
 0x163   :  { %v658_v50 = vmax.f32 %v271_v51, 0.0  ;;  %v4149_v12 = vpack.c.bf16 %v604_v11, %v600_v62  ;;  %v3190_v51 = vld [vmem:[%s5004_s3 + $0x34] sm:$0xf] }
 0x164   :  { %v659_v8 = vmax.f32 %v360_v14, 0.0  ;;  %v2823_v28 = vor.u32 %v3190_v51, %v2820_v27  ;;  %v2884_v14 = vld [vmem:[%s5004_s3 + $0xb8] sm:$0xf0]  ;;  %v417_v51 = vadd.f32 %v5084_v37, %v3880_v46  ;;  %v419_v27 = vadd.f32 %v3905_v52, %v3880_v46 }
 0x165   :  { %v4141_v7 = vpack.c.bf16 %v658_v50, %v654_v18  ;;  %5078 = vst [vmem:[#allocation32_spill] sm:$0xff] %v4149_v12  ;;  %v2887_v18 = vor.u32 %v3206_v21, %v2884_v14  ;;  %v5085_v21 = vld [vmem:[#allocation17_spill] sm:$0xff] }
 0x166   :  { %v4143_v57 = vpack.c.bf16 %v659_v8, %v655_v59  ;;  %1492 = vmatpush.bf16.msra.mxu0 %v2823_v28  ;;  %v506_v14 = vadd.f32 %v5085_v21, %v3883_v47 }
 0x167   :  { %5076 = vst [vmem:[#allocation30_spill] sm:$0xff] %v4141_v7  ;;  %1581 = vmatpush.bf16.msra.mxu1 %v2887_v18  ;;  %v608_v18 = vmax.f32 %v417_v51, 0.0 }
 0x168   :  { %5077 = vst [vmem:[#allocation31_spill] sm:$0xff] %v4143_v57  ;;  %v4145_v0 = vpop.f32.mrf.mxu2  ;;  %v273_v61 = vpop.f32.mrf.mxu0 }
 0x169   :  { %v4147_v26 = vpop.f32.mrf.mxu3  ;;  %v362_v13 = vpop.f32.mrf.mxu1  ;;  %v274_v35 = vadd.f32 %v273_v61, %v3568_v32 }
 0x16a   :  { %v363_v50 = vadd.f32 %v362_v13, %v3572_v33  ;;  %v508_v13 = vadd.f32 %v3907_v5, %v3883_v47 }
 0x16b   :  { %1170 = vmatmul.bf16.gmra.mxu0 %v5079_v39  ;;  %v612_v39 = vmax.f32 %v419_v27, 0.0 }
 0x16c   :  { %1259 = vmatmul.bf16.gmra.mxu1 %v5081_v23  ;;  %v613_v52 = vmax.f32 %v508_v13, 0.0 }
 0x16d   :  { %1348 = vmatmul.bf16.gmra.mxu2 %v4149_v12  ;;  %v663_v12 = vmax.f32 %v363_v50, 0.0  ;;  %v4193_v7 = vpack.c.bf16 %v612_v39, %v608_v18  ;;  %v3244_v39 = vld [vmem:[%s5004_s3 + $0x1e4] sm:$0xf]  ;;  %v424_v18 = vadd.f32 %v3949_v30, %v3880_v46 }
 0x16e   :  { %1437 = vmatmul.bf16.gmra.mxu3 %v4152_v2  ;;  %v662_v2 = vmax.f32 %v274_v35, 0.0 }
 0x16f   :  { %5086 = vst [vmem:[#allocation16_spill] sm:$0xff] %v4193_v7 }
 0x170   :  { %v4170_v1 = vpop.f32.mrf.mxu2  ;;  %v275_v8 = vpop.f32.mrf.mxu0 }
 0x171   :  { %5082 = vst [vmem:[#allocation34_spill] sm:$0xff] %v4170_v1  ;;  %v4173_v59 = vpop.f32.mrf.mxu3  ;;  %v276_v62 = vadd.f32 %v275_v8, %v3568_v32  ;;  %v364_v11 = vpop.f32.mrf.mxu1 }
 0x172   :  { %5083 = vst [vmem:[#allocation35_spill] sm:$0xff] %v4173_v59  ;;  %v365_v61 = vadd.f32 %v364_v11, %v3572_v33  ;;  %v609_v59 = vmax.f32 %v506_v14, 0.0 }
 0x173   :  { %v666_v28 = vmax.f32 %v276_v62, 0.0  ;;  %v3036_v62 = vld [vmem:[%s5004_s3 + $0x1e8] sm:$0xf0] }
 0x174   :  { %v667_v8 = vmax.f32 %v365_v61, 0.0  ;;  %v4196_v5 = vpack.c.bf16 %v613_v52, %v609_v59  ;;  %v3039_v14 = vor.u32 %v3244_v39, %v3036_v62  ;;  %v620_v62 = vmax.f32 %v424_v18, 0.0  ;;  %v3204_v18 = vld [vmem:[%s5004_s3 + $0xa4] sm:$0xf] }
 0x175   :  { %v4185_v23 = vpack.c.bf16 %v666_v28, %v662_v2  ;;  %v2972_v2 = vld [vmem:[%s5004_s3 + $0x168] sm:$0xf0] }
 0x176   :  { %v4187_v37 = vpack.c.bf16 %v667_v8, %v663_v12  ;;  %5087 = vst [vmem:[#allocation17_spill] sm:$0xff] %v4196_v5  ;;  %v3228_v12 = vld [vmem:[%s5004_s3 + $0x164] sm:$0xf]  ;;  %v422_v8 = vadd.f32 %v3930_v29, %v3880_v46  ;;  %1756 = vmatpush.bf16.msra.mxu3 %v3039_v14 }
 0x177   :  { %v2975_v59 = vor.u32 %v3228_v12, %v2972_v2 }
 0x178   :  { %v4189_v1 = vpop.f32.mrf.mxu2  ;;  %v278_v21 = vpop.f32.mrf.mxu0 }
 0x179   :  { %v4191_v11 = vpop.f32.mrf.mxu3  ;;  %v367_v57 = vpop.f32.mrf.mxu1  ;;  %v279_v35 = vadd.f32 %v278_v21, %v3568_v32  ;;  %1667 = vmatpush.bf16.msra.mxu2 %v2975_v59  ;;  %v511_v21 = vadd.f32 %v3933_v16, %v3883_v47 }
 0x17a   :  { %v368_v51 = vadd.f32 %v367_v57, %v3572_v33  ;;  %v806_v57 = vld [vmem:[%s5006_s4] sm:$0x3] }
 0x17b   :  { %1175 = vmatmul.bf16.gmra.mxu0 %v3901_v42  ;;  %v670_v12 = vmax.f32 %v279_v35, 0.0  ;;  %v4232_v59 = vperm.slane %v806_v57, 0 }
 0x17c   :  { %1264 = vmatmul.bf16.gmra.mxu1 %v3903_v40  ;;  %v671_v39 = vmax.f32 %v368_v51, 0.0 }
 0x17d   :  { %1353 = vmatmul.bf16.gmra.mxu2 %v4193_v7 }
 0x17e   :  { %1442 = vmatmul.bf16.gmra.mxu3 %v4196_v5 }
 0x180   :  { %v4211_v50 = vpop.f32.mrf.mxu2  ;;  %v280_v61 = vpop.f32.mrf.mxu0 }
 0x181   :  { %v4217_v27 = vpop.f32.mrf.mxu3  ;;  %v281_v13 = vadd.f32 %v280_v61, %v3568_v32  ;;  %v369_v28 = vpop.f32.mrf.mxu1  ;;  %v513_v32 = vadd.f32 %v3951_v38, %v3883_v47 }
 0x182   :  { %v370_v52 = vadd.f32 %v369_v28, %v3572_v33  ;;  %v616_v33 = vmax.f32 %v422_v8, 0.0  ;;  %v617_v28 = vmax.f32 %v511_v21, 0.0  ;;  %v3188_v8 = vld [vmem:[%s5004_s3 + $0x24] sm:$0xf]  ;;  %v2876_v21 = vld [vmem:[%s5004_s3 + $0xa8] sm:$0xf0] }
 0x183   :  { %v674_v2 = vmax.f32 %v281_v13, 0.0  ;;  %v621_v14 = vmax.f32 %v513_v32, 0.0 }
 0x184   :  { %v675_v29 = vmax.f32 %v370_v52, 0.0  ;;  %v4243_v51 = vpack.c.bf16 %v620_v62, %v616_v33 }
 0x185   :  { %v4234_v30 = vpack.c.bf16 %v674_v2, %v670_v12  ;;  %v4246_v52 = vpack.c.bf16 %v621_v14, %v617_v28  ;;  %v2879_v12 = vor.u32 %v3204_v18, %v2876_v21  ;;  %v427_v28 = vadd.f32 %v3962_v15, %v3880_v46 }
 0x186   :  { %v4236_v61 = vpack.c.bf16 %v675_v29, %v671_v39  ;;  %5088 = vst [vmem:[#allocation36_spill] sm:$0xff] %v4243_v51  ;;  %v429_v14 = vadd.f32 %v3981_v54, %v3880_v46 }
 0x187   :  { %5089 = vst [vmem:[#allocation37_spill] sm:$0xff] %v4246_v52  ;;  %1582 = vmatpush.bf16.msra.mxu1 %v2879_v12 }
 0x188   :  { %v4238_v5 = vpop.f32.mrf.mxu2  ;;  %v1141_v7 = vpop.f32.mrf.mxu0  ;;  %v628_v18 = vmax.f32 %v429_v14, 0.0  ;;  %v3028_v14 = vld [vmem:[%s5004_s3 + $0x1d8] sm:$0xf0] }
 0x189   :  { %v4240_v16 = vpop.f32.mrf.mxu3  ;;  %v1142_v38 = vadd.f32 %v1141_v7, %v4232_v59  ;;  %v1230_v35 = vpop.f32.mrf.mxu1  ;;  %v2812_v7 = vld [vmem:[%s5004_s3 + $0x28] sm:$0xf0] }
 0x18a   :  { %v2815_v57 = vor.u32 %v3188_v8, %v2812_v7  ;;  %v624_v7 = vmax.f32 %v427_v28, 0.0  ;;  %v3242_v28 = vld [vmem:[%s5004_s3 + $0x1d4] sm:$0xf] }
 0x18b   :  { %v1231_v13 = vadd.f32 %v1230_v35, %v1142_v38  ;;  %1180 = vmatmul.bf16.gmra.mxu0 %v3945_v9  ;;  %v516_v35 = vadd.f32 %v3965_v44, %v3883_v47 }
 0x18c   :  { %1269 = vmatmul.bf16.gmra.mxu1 %v3947_v4  ;;  %1493 = vmatpush.bf16.msra.mxu0 %v2815_v57 }
 0x18d   :  { %1358 = vmatmul.bf16.gmra.mxu2 %v4243_v51  ;;  %v625_v57 = vmax.f32 %v516_v35, 0.0  ;;  %v3031_v35 = vor.u32 %v3242_v28, %v3028_v14 }
 0x18e   :  { %1447 = vmatmul.bf16.gmra.mxu3 %v4246_v52 }
 0x18f   :  { %1757 = vmatpush.bf16.msra.mxu3 %v3031_v35 }
 0x190   :  { %v1319_v32 = vpop.f32.mrf.mxu2  ;;  %v1143_v29 = vpop.f32.mrf.mxu0 }
 0x191   :  { %v1320_v2 = vadd.f32 %v1319_v32, %v1231_v13  ;;  %v1408_v39 = vpop.f32.mrf.mxu3  ;;  %v1144_v33 = vadd.f32 %v1143_v29, %v4232_v59  ;;  %v1232_v62 = vpop.f32.mrf.mxu1  ;;  %v518_v13 = vadd.f32 %v3983_v43, %v3883_v47 }
 0x193   :  { %v1409_v38 = vadd.f32 %v1408_v39, %v1320_v2  ;;  %v1233_v8 = vadd.f32 %v1232_v62, %v1144_v33  ;;  %v629_v21 = vmax.f32 %v518_v13, 0.0  ;;  %v4273_v2 = vpack.c.bf16 %v628_v18, %v624_v7  ;;  %v3226_v62 = vld [vmem:[%s5004_s3 + $0x154] sm:$0xf] }
 0x195   :  { %v4276_v44 = vpack.c.bf16 %v629_v21, %v625_v57  ;;  %v1844_v43 = vmax.f32 %v1409_v38, 0.0 }
 0x198   :  { %v1321_v32 = vpop.f32.mrf.mxu2  ;;  %v1146_v52 = vpop.f32.mrf.mxu0 }
 0x199   :  { %v1322_v12 = vadd.f32 %v1321_v32, %v1233_v8  ;;  %v1410_v29 = vpop.f32.mrf.mxu3  ;;  %v1147_v15 = vadd.f32 %v1146_v52, %v4232_v59  ;;  %v1235_v51 = vpop.f32.mrf.mxu1  ;;  %v2964_v52 = vld [vmem:[%s5004_s3 + $0x158] sm:$0xf0]  ;;  %v432_v32 = vadd.f32 %v4006_v48, %v3880_v46 }
 0x19b   :  { %v1411_v54 = vadd.f32 %v1410_v29, %v1322_v12  ;;  %v1236_v39 = vadd.f32 %v1235_v51, %v1147_v15  ;;  %1185 = vmatmul.bf16.gmra.mxu0 %v3977_v19  ;;  %v2967_v51 = vor.u32 %v3226_v62, %v2964_v52  ;;  %v434_v12 = vadd.f32 %v4025_v17, %v3880_v46 }
 0x19c   :  { %1274 = vmatmul.bf16.gmra.mxu1 %v3979_v31  ;;  %v521_v15 = vadd.f32 %v4009_v60, %v3883_v47 }
 0x19d   :  { %v1846_v33 = vmax.f32 %v1411_v54, 0.0  ;;  %1363 = vmatmul.bf16.gmra.mxu2 %v4273_v2  ;;  %v523_v54 = vadd.f32 %v4027_v20, %v3883_v47 }
 0x19e   :  { %1452 = vmatmul.bf16.gmra.mxu3 %v4276_v44  ;;  %1668 = vmatpush.bf16.msra.mxu2 %v2967_v51  ;;  %v633_v62 = vmax.f32 %v521_v15, 0.0 }
 0x19f   :  { %v4293_v38 = vpack.c.bf16 %v1846_v33, %v1844_v43  ;;  %v632_v43 = vmax.f32 %v432_v32, 0.0  ;;  %v636_v33 = vmax.f32 %v434_v12, 0.0  ;;  %v637_v52 = vmax.f32 %v523_v54, 0.0  ;;  %v3202_v32 = vld [vmem:[%s5004_s3 + $0x94] sm:$0xf] }
 0x1a0   :  { %v1324_v13 = vpop.f32.mrf.mxu2  ;;  %v1148_v18 = vpop.f32.mrf.mxu0 }
 0x1a1   :  { %v1325_v8 = vadd.f32 %v1324_v13, %v1236_v39  ;;  %v1413_v7 = vpop.f32.mrf.mxu3  ;;  %v1149_v57 = vadd.f32 %v1148_v18, %v4232_v59  ;;  %v1237_v21 = vpop.f32.mrf.mxu1  ;;  %v4308_v60 = vpack.c.bf16 %v637_v52, %v633_v62 }
 0x1a3   :  { %v1414_v29 = vadd.f32 %v1413_v7, %v1325_v8  ;;  %v1238_v39 = vadd.f32 %v1237_v21, %v1149_v57  ;;  %v4305_v8 = vpack.c.bf16 %v636_v33, %v632_v43  ;;  %v3186_v57 = vld [vmem:[%s5004_s3 + $0x14] sm:$0xf]  ;;  %v2804_v21 = vld [vmem:[%s5004_s3 + $0x18] sm:$0xf0] }
 0x1a4   :  { %v2807_v12 = vor.u32 %v3186_v57, %v2804_v21 }
 0x1a5   :  { %v1848_v20 = vmax.f32 %v1414_v29, 0.0  ;;  %v2868_v29 = vld [vmem:[%s5004_s3 + $0x98] sm:$0xf0] }
 0x1a6   :  { %1494 = vmatpush.bf16.msra.mxu0 %v2807_v12 }
 0x1a8   :  { %v1326_v51 = vpop.f32.mrf.mxu2  ;;  %v1151_v35 = vpop.f32.mrf.mxu0 }
 0x1a9   :  { %v1327_v28 = vadd.f32 %v1326_v51, %v1238_v39  ;;  %v1415_v14 = vpop.f32.mrf.mxu3  ;;  %v1152_v48 = vadd.f32 %v1151_v35, %v4232_v59  ;;  %v1240_v13 = vpop.f32.mrf.mxu1  ;;  %v2871_v39 = vor.u32 %v3202_v32, %v2868_v29 }
 0x1ab   :  { %v1416_v17 = vadd.f32 %v1415_v14, %v1327_v28  ;;  %v1241_v7 = vadd.f32 %v1240_v13, %v1152_v48  ;;  %1190 = vmatmul.bf16.gmra.mxu0 %v4021_v58  ;;  %1583 = vmatpush.bf16.msra.mxu1 %v2871_v39  ;;  %v437_v28 = vadd.f32 %v4038_v55, %v3880_v46 }
 0x1ac   :  { %1279 = vmatmul.bf16.gmra.mxu1 %v4023_v3  ;;  %v439_v14 = vadd.f32 %v4057_v49, %v3880_v46  ;;  %v526_v48 = vadd.f32 %v4041_v6, %v3883_v47  ;;  %v528_v13 = vadd.f32 %v4059_v36, %v3883_v47 }
 0x1ad   :  { %v1850_v18 = vmax.f32 %v1416_v17, 0.0  ;;  %1368 = vmatmul.bf16.gmra.mxu2 %v4305_v8 }
 0x1ae   :  { %1457 = vmatmul.bf16.gmra.mxu3 %v4308_v60  ;;  %v645_v57 = vmax.f32 %v528_v13, 0.0 }
 0x1af   :  { %v4325_v15 = vpack.c.bf16 %v1850_v18, %v1848_v20  ;;  %v644_v20 = vmax.f32 %v439_v14, 0.0  ;;  %v641_v18 = vmax.f32 %v526_v48, 0.0  ;;  %v3020_v14 = vld [vmem:[%s5004_s3 + $0x1c8] sm:$0xf0] }
 0x1b0   :  { %v1329_v54 = vpop.f32.mrf.mxu2  ;;  %v1153_v62 = vpop.f32.mrf.mxu0 }
 0x1b1   :  { %v1330_v43 = vadd.f32 %v1329_v54, %v1241_v7  ;;  %v1418_v33 = vpop.f32.mrf.mxu3  ;;  %v1154_v52 = vadd.f32 %v1153_v62, %v4232_v59  ;;  %v1242_v51 = vpop.f32.mrf.mxu1  ;;  %v640_v7 = vmax.f32 %v437_v28, 0.0  ;;  %v4340_v6 = vpack.c.bf16 %v645_v57, %v641_v18  ;;  %v3224_v62 = vld [vmem:[%s5004_s3 + $0x144] sm:$0xf] }
 0x1b2   :  { %v3240_v28 = vld [vmem:[%s5004_s3 + $0x1c4] sm:$0xf] }
 0x1b3   :  { %v1419_v35 = vadd.f32 %v1418_v33, %v1330_v43  ;;  %v1243_v17 = vadd.f32 %v1242_v51, %v1154_v52  ;;  %v4337_v39 = vpack.c.bf16 %v644_v20, %v640_v7  ;;  %v2956_v52 = vld [vmem:[%s5004_s3 + $0x148] sm:$0xf0] }
 0x1b4   :  { %v2959_v51 = vor.u32 %v3224_v62, %v2956_v52 }
 0x1b5   :  { %v1852_v36 = vmax.f32 %v1419_v35, 0.0  ;;  %v3023_v35 = vor.u32 %v3240_v28, %v3020_v14 }
 0x1b6   :  { %1669 = vmatpush.bf16.msra.mxu2 %v2959_v51 }
 0x1b7   :  { %1758 = vmatpush.bf16.msra.mxu3 %v3023_v35 }
 0x1b8   :  { %v1331_v21 = vpop.f32.mrf.mxu2  ;;  %v1156_v29 = vpop.f32.mrf.mxu0 }
 0x1b9   :  { %v1332_v32 = vadd.f32 %v1331_v21, %v1243_v17  ;;  %v1420_v12 = vpop.f32.mrf.mxu3  ;;  %v1157_v55 = vadd.f32 %v1156_v29, %v4232_v59  ;;  %v1245_v54 = vpop.f32.mrf.mxu1  ;;  %v442_v21 = vadd.f32 %v4082_v10, %v3880_v46  ;;  %v531_v29 = vadd.f32 %v4085_v56, %v3883_v47 }
 0x1bb   :  { %v1421_v49 = vadd.f32 %v1420_v12, %v1332_v32  ;;  %v1246_v43 = vadd.f32 %v1245_v54, %v1157_v55  ;;  %1195 = vmatmul.bf16.gmra.mxu0 %v4053_v24  ;;  %v444_v32 = vadd.f32 %v4101_v22, %v3880_v46  ;;  %v533_v55 = vadd.f32 %v4103_v63, %v3883_v47 }
 0x1bc   :  { %1284 = vmatmul.bf16.gmra.mxu1 %v4055_v41 }
 0x1bd   :  { %v1854_v33 = vmax.f32 %v1421_v49, 0.0  ;;  %1373 = vmatmul.bf16.gmra.mxu2 %v4337_v39  ;;  %v648_v49 = vmax.f32 %v442_v21, 0.0  ;;  %v2860_v21 = vld [vmem:[%s5004_s3 + $0x88] sm:$0xf0] }
 0x1be   :  { %1462 = vmatmul.bf16.gmra.mxu3 %v4340_v6 }
 0x1bf   :  { %v4357_v48 = vpack.c.bf16 %v1854_v33, %v1852_v36  ;;  %v649_v36 = vmax.f32 %v531_v29, 0.0  ;;  %v653_v33 = vmax.f32 %v533_v55, 0.0 }
 0x1c0   :  { %v1334_v13 = vpop.f32.mrf.mxu2  ;;  %v1158_v20 = vpop.f32.mrf.mxu0 }
 0x1c1   :  { %v1335_v17 = vadd.f32 %v1334_v13, %v1246_v43  ;;  %v1423_v7 = vpop.f32.mrf.mxu3  ;;  %v1159_v18 = vadd.f32 %v1158_v20, %v4232_v59  ;;  %v1247_v57 = vpop.f32.mrf.mxu1  ;;  %v652_v43 = vmax.f32 %v444_v32, 0.0  ;;  %v4372_v56 = vpack.c.bf16 %v653_v33, %v649_v36  ;;  %v2796_v20 = vld [vmem:[%s5004_s3 + $0x8] sm:$0xf0] }
 0x1c2   :  { %v447_v33 = vadd.f32 %v4126_v45, %v3880_v46 }
 0x1c3   :  { %v1424_v12 = vadd.f32 %v1423_v7, %v1335_v17  ;;  %v1248_v54 = vadd.f32 %v1247_v57, %v1159_v18  ;;  %v4369_v35 = vpack.c.bf16 %v652_v43, %v648_v49  ;;  %v3184_v7 = vld [vmem:[%s5004_s3 + $0x4] sm:$0xf] }
 0x1c4   :  { %v3200_v18 = vld [vmem:[%s5004_s3 + $0x84] sm:$0xf]  ;;  %v2799_v57 = vor.u32 %v3184_v7, %v2796_v20 }
 0x1c5   :  { %v1856_v63 = vmax.f32 %v1424_v12, 0.0  ;;  %v2863_v29 = vor.u32 %v3200_v18, %v2860_v21 }
 0x1c6   :  { %1495 = vmatpush.bf16.msra.mxu0 %v2799_v57 }
 0x1c7   :  { %1584 = vmatpush.bf16.msra.mxu1 %v2863_v29 }
 0x1c8   :  { %v1336_v62 = vpop.f32.mrf.mxu2  ;;  %v1161_v28 = vpop.f32.mrf.mxu0 }
 0x1c9   :  { %v1337_v52 = vadd.f32 %v1336_v62, %v1248_v54  ;;  %v1425_v51 = vpop.f32.mrf.mxu3  ;;  %v1162_v10 = vadd.f32 %v1161_v28, %v4232_v59  ;;  %v1250_v14 = vpop.f32.mrf.mxu1  ;;  %v449_v62 = vadd.f32 %v4145_v0, %v3880_v46  ;;  %v538_v28 = vadd.f32 %v4147_v26, %v3883_v47  ;;  %v3222_v26 = vld [vmem:[%s5004_s3 + $0x134] sm:$0xf] }
 0x1cb   :  { %v1426_v22 = vadd.f32 %v1425_v51, %v1337_v52  ;;  %v1251_v13 = vadd.f32 %v1250_v14, %v1162_v10  ;;  %1200 = vmatmul.bf16.gmra.mxu0 %v4097_v53  ;;  %v536_v51 = vadd.f32 %v4129_v34, %v3883_v47  ;;  %v656_v14 = vmax.f32 %v447_v33, 0.0  ;;  %v5090_v34 = vld [vmem:[#allocation30_spill] sm:$0xff] }
 0x1cc   :  { %1289 = vmatmul.bf16.gmra.mxu1 %v4099_v25 }
 0x1cd   :  { %v1858_v17 = vmax.f32 %v1426_v22, 0.0  ;;  %1378 = vmatmul.bf16.gmra.mxu2 %v4369_v35  ;;  %v660_v22 = vmax.f32 %v449_v62, 0.0  ;;  %v3012_v62 = vld [vmem:[%s5004_s3 + $0x1b8] sm:$0xf0] }
 0x1ce   :  { %1467 = vmatmul.bf16.gmra.mxu3 %v4372_v56 }
 0x1cf   :  { %v4389_v32 = vpack.c.bf16 %v1858_v17, %v1856_v63  ;;  %v661_v63 = vmax.f32 %v538_v28, 0.0  ;;  %v4401_v21 = vpack.c.bf16 %v660_v22, %v656_v14  ;;  %v2940_v14 = vld [vmem:[%s5004_s3 + $0x128] sm:$0xf0]  ;;  %v3236_v22 = vld [vmem:[%s5004_s3 + $0x1a4] sm:$0xf] }
 0x1d0   :  { %v1339_v12 = vpop.f32.mrf.mxu2  ;;  %v1163_v49 = vpop.f32.mrf.mxu0 }
 0x1d1   :  { %v1340_v55 = vadd.f32 %v1339_v12, %v1251_v13  ;;  %v1428_v54 = vpop.f32.mrf.mxu3  ;;  %v1164_v43 = vadd.f32 %v1163_v49, %v4232_v59  ;;  %v1252_v36 = vpop.f32.mrf.mxu1  ;;  %v657_v13 = vmax.f32 %v536_v51, 0.0 }
 0x1d3   :  { %v1429_v52 = vadd.f32 %v1428_v54, %v1340_v55  ;;  %v1253_v10 = vadd.f32 %v1252_v36, %v1164_v43  ;;  %v4404_v29 = vpack.c.bf16 %v661_v63, %v657_v13  ;;  %v2948_v55 = vld [vmem:[%s5004_s3 + $0x138] sm:$0xf0]  ;;  %v3238_v54 = vld [vmem:[%s5004_s3 + $0x1b4] sm:$0xf]  ;;  %v5091_v36 = vld [vmem:[#allocation31_spill] sm:$0xff] }
 0x1d4   :  { %v2951_v33 = vor.u32 %v3222_v26, %v2948_v55  ;;  %v3015_v51 = vor.u32 %v3238_v54, %v3012_v62  ;;  %v5093_v55 = vld [vmem:[#allocation35_spill] sm:$0xff]  ;;  %v3218_v62 = vld [vmem:[%s5004_s3 + $0x114] sm:$0xf] }
 0x1d5   :  { %v1860_v49 = vmax.f32 %v1429_v52, 0.0  ;;  %v3220_v52 = vld [vmem:[%s5004_s3 + $0x124] sm:$0xf]  ;;  %v541_v54 = vadd.f32 %v5093_v55, %v3883_v47  ;;  %v2988_v55 = vld [vmem:[%s5004_s3 + $0x188] sm:$0xf0] }
 0x1d6   :  { %1670 = vmatpush.bf16.msra.mxu2 %v2951_v33  ;;  %1759 = vmatpush.bf16.msra.mxu3 %v3015_v51  ;;  %v2932_v51 = vld [vmem:[%s5004_s3 + $0x118] sm:$0xf0] }
 0x1d8   :  { %v1341_v17 = vpop.f32.mrf.mxu2  ;;  %v1166_v18 = vpop.f32.mrf.mxu0 }
 0x1d9   :  { %v1342_v7 = vadd.f32 %v1341_v17, %v1253_v10  ;;  %v1430_v20 = vpop.f32.mrf.mxu3  ;;  %v1167_v45 = vadd.f32 %v1166_v18, %v4232_v59  ;;  %v1255_v57 = vpop.f32.mrf.mxu1  ;;  %v5092_v18 = vld [vmem:[#allocation34_spill] sm:$0xff] }
 0x1db   :  { %v1431_v0 = vadd.f32 %v1430_v20, %v1342_v7  ;;  %v1256_v12 = vadd.f32 %v1255_v57, %v1167_v45  ;;  %1205 = vmatmul.bf16.gmra.mxu0 %v5090_v34  ;;  %v2943_v7 = vor.u32 %v3220_v52, %v2940_v14  ;;  %v3004_v20 = vld [vmem:[%s5004_s3 + $0x1a8] sm:$0xf0]  ;;  %v452_v45 = vadd.f32 %v5092_v18, %v3880_v46  ;;  %v3232_v18 = vld [vmem:[%s5004_s3 + $0x184] sm:$0xf] }
 0x1dc   :  { %1294 = vmatmul.bf16.gmra.mxu1 %v5091_v36  ;;  %v3007_v26 = vor.u32 %v3236_v22, %v3004_v20  ;;  %v665_v22 = vmax.f32 %v541_v54, 0.0  ;;  %v2924_v20 = vld [vmem:[%s5004_s3 + $0x108] sm:$0xf0] }
 0x1dd   :  { %v1862_v43 = vmax.f32 %v1431_v0, 0.0  ;;  %1383 = vmatmul.bf16.gmra.mxu2 %v4401_v21  ;;  %v664_v14 = vmax.f32 %v452_v45, 0.0 }
 0x1de   :  { %1472 = vmatmul.bf16.gmra.mxu3 %v4404_v29  ;;  %1671 = vmatpush.bf16.msra.mxu2 %v2943_v7  ;;  %v3216_v7 = vld [vmem:[%s5004_s3 + $0x104] sm:$0xf] }
 0x1df   :  { %v4421_v28 = vpack.c.bf16 %v1862_v43, %v1860_v49  ;;  %v543_v49 = vadd.f32 %v4191_v11, %v3883_v47  ;;  %1760 = vmatpush.bf16.msra.mxu3 %v3007_v26  ;;  %v2996_v11 = vld [vmem:[%s5004_s3 + $0x198] sm:$0xf0]  ;;  %v2927_v26 = vor.u32 %v3216_v7, %v2924_v20 }
 0x1e0   :  { %v1344_v10 = vpop.f32.mrf.mxu2  ;;  %v1168_v17 = vpop.f32.mrf.mxu0 }
 0x1e1   :  { %v1345_v13 = vadd.f32 %v1344_v10, %v1256_v12  ;;  %v1433_v63 = vpop.f32.mrf.mxu3  ;;  %v1169_v57 = vadd.f32 %v1168_v17, %v4232_v59  ;;  %v1257_v0 = vpop.f32.mrf.mxu1  ;;  %v454_v12 = vadd.f32 %v4189_v1, %v3880_v46  ;;  %v3234_v10 = vld [vmem:[%s5004_s3 + $0x194] sm:$0xf]  ;;  %v2935_v1 = vor.u32 %v3218_v62, %v2932_v51 }
 0x1e2   :  { %v2999_v52 = vor.u32 %v3234_v10, %v2996_v11 }
 0x1e3   :  { %v1434_v43 = vadd.f32 %v1433_v63, %v1345_v13  ;;  %v1258_v33 = vadd.f32 %v1257_v0, %v1169_v57  ;;  %v668_v13 = vmax.f32 %v454_v12, 0.0  ;;  %v669_v63 = vmax.f32 %v543_v49, 0.0  ;;  %1672 = vmatpush.bf16.msra.mxu2 %v2935_v1 }
 0x1e4   :  { %1761 = vmatpush.bf16.msra.mxu3 %v2999_v52  ;;  %v2991_v49 = vor.u32 %v3232_v18, %v2988_v55  ;;  %v3255_v52 = vld [vmem:[%s5007_s5 + $0x38] sm:$0xff]  ;;  %v457_v18 = vadd.f32 %v4211_v50, %v3880_v46 }
 0x1e5   :  { %v4469_v51 = vpack.c.bf16 %v668_v13, %v664_v14  ;;  %v4472_v1 = vpack.c.bf16 %v669_v63, %v665_v22  ;;  %v3263_v14 = vld [vmem:[%s5007_s5 + $0x78] sm:$0xff]  ;;  %2072 = vmatpush.bf16.msrb.mxu0 %v3255_v52 }
 0x1e6   :  { %2161 = vmatpush.bf16.msrb.mxu1 %v3263_v14 }
 0x1e7   :  { %1673 = vmatpush.bf16.msra.mxu2 %v2927_v26  ;;  %v548_v26 = vadd.f32 %v4240_v16, %v3883_v47 }
 0x1e8   :  { %v1346_v17 = vpop.f32.mrf.mxu2  ;;  %v1171_v0 = vpop.f32.mrf.mxu0  ;;  %1762 = vmatpush.bf16.msra.mxu3 %v2991_v49 }
 0x1e9   :  { %v1347_v57 = vadd.f32 %v1346_v17, %v1258_v33  ;;  %v1435_v45 = vpop.f32.mrf.mxu3  ;;  %v1172_v54 = vadd.f32 %v1171_v0, %v4232_v59  ;;  %v1260_v12 = vpop.f32.mrf.mxu1  ;;  %v1864_v33 = vmax.f32 %v1434_v43, 0.0  ;;  %v546_v0 = vadd.f32 %v4217_v27, %v3883_v47 }
 0x1eb   :  { %v1436_v62 = vadd.f32 %v1435_v45, %v1347_v57  ;;  %v1261_v10 = vadd.f32 %v1260_v12, %v1172_v54  ;;  %1210 = vmatmul.bf16.gmra.mxu0 %v4185_v23  ;;  %v459_v57 = vadd.f32 %v4238_v5, %v3880_v46  ;;  %v672_v54 = vmax.f32 %v457_v18, 0.0 }
 0x1ec   :  { %1299 = vmatmul.bf16.gmra.mxu1 %v4187_v37  ;;  %v673_v49 = vmax.f32 %v546_v0, 0.0 }
 0x1ed   :  { %v1866_v11 = vmax.f32 %v1436_v62, 0.0  ;;  %1388 = vmatmul.bf16.gmra.mxu2 %v4469_v51  ;;  %v676_v12 = vmax.f32 %v459_v57, 0.0  ;;  %v677_v62 = vmax.f32 %v548_v26, 0.0 }
 0x1ee   :  { %1477 = vmatmul.bf16.gmra.mxu3 %v4472_v1 }
 0x1ef   :  { %v4483_v13 = vpack.c.bf16 %v1866_v11, %v1864_v33  ;;  %v4495_v5 = vpack.c.bf16 %v676_v12, %v672_v54  ;;  %v4498_v27 = vpack.c.bf16 %v677_v62, %v673_v49 }
 0x1f0   :  { %v1349_v22 = vpop.f32.mrf.mxu2  ;;  %v1173_v17 = vpop.f32.mrf.mxu0 }
 0x1f1   :  { %v1350_v43 = vadd.f32 %v1349_v22, %v1261_v10  ;;  %v1438_v63 = vpop.f32.mrf.mxu3  ;;  %v1174_v7 = vadd.f32 %v1173_v17, %v4232_v59  ;;  %v1262_v20 = vpop.f32.mrf.mxu1 }
 0x1f3   :  { %v1439_v45 = vadd.f32 %v1438_v63, %v1350_v43  ;;  %v1263_v55 = vadd.f32 %v1262_v20, %v1174_v7 }
 0x1f5   :  { %v1868_v47 = vmax.f32 %v1439_v45, 0.0 }
 0x1f8   :  { %v1351_v10 = vpop.f32.mrf.mxu2  ;;  %v1176_v52 = vpop.f32.mrf.mxu0 }
 0x1f9   :  { %v1352_v33 = vadd.f32 %v1351_v10, %v1263_v55  ;;  %v1440_v11 = vpop.f32.mrf.mxu3  ;;  %v1177_v50 = vadd.f32 %v1176_v52, %v4232_v59  ;;  %v1265_v14 = vpop.f32.mrf.mxu1 }
 0x1fb   :  { %v1441_v46 = vadd.f32 %v1440_v11, %v1352_v33  ;;  %v1266_v22 = vadd.f32 %v1265_v14, %v1177_v50  ;;  %1215 = vmatmul.bf16.gmra.mxu0 %v4234_v30  ;;  %v5094_v11 = vld [vmem:[#allocation2_spill] sm:$0xff]  ;;  %v5095_v14 = vld [vmem:[#allocation3_spill] sm:$0xff] }
 0x1fc   :  { %1304 = vmatmul.bf16.gmra.mxu1 %v4236_v61 }
 0x1fd   :  { %v1870_v16 = vmax.f32 %v1441_v46, 0.0  ;;  %1393 = vmatmul.bf16.gmra.mxu2 %v4495_v5  ;;  %v5096_v46 = vld [vmem:[#allocation18_spill] sm:$0xff] }
 0x1fe   :  { %1482 = vmatmul.bf16.gmra.mxu3 %v4498_v27 }
 0x1ff   :  { %v4503_v43 = vpack.c.bf16 %v1870_v16, %v1868_v47  ;;  %v3254_v47 = vld [vmem:[%s5007_s5 + $0x30] sm:$0xff] }
 0x200   :  { %v1354_v63 = vpop.f32.mrf.mxu2  ;;  %v1178_v20 = vpop.f32.mrf.mxu0  ;;  %v3262_v16 = vld [vmem:[%s5007_s5 + $0x70] sm:$0xff]  ;;  %2073 = vmatpush.bf16.msrb.mxu0 %v3254_v47  ;;  %v5101_v47 = vld [vmem:[#allocation21_spill] sm:$0xff] }
 0x201   :  { %v1355_v17 = vadd.f32 %v1354_v63, %v1266_v22  ;;  %v1443_v7 = vpop.f32.mrf.mxu3  ;;  %v1179_v18 = vadd.f32 %v1178_v20, %v4232_v59  ;;  %v1267_v57 = vpop.f32.mrf.mxu1  ;;  %v5097_v22 = vld [vmem:[#allocation19_spill] sm:$0xff]  ;;  %2162 = vmatpush.bf16.msrb.mxu1 %v3262_v16 }
 0x203   :  { %v1444_v0 = vadd.f32 %v1443_v7, %v1355_v17  ;;  %v1268_v26 = vadd.f32 %v1267_v57, %v1179_v18 }
 0x205   :  { %v1872_v52 = vmax.f32 %v1444_v0, 0.0 }
 0x208   :  { %v1356_v55 = vpop.f32.mrf.mxu2  ;;  %v1181_v12 = vpop.f32.mrf.mxu0 }
 0x209   :  { %v1357_v45 = vadd.f32 %v1356_v55, %v1268_v26  ;;  %v1445_v54 = vpop.f32.mrf.mxu3  ;;  %v1182_v49 = vadd.f32 %v1181_v12, %v4232_v59  ;;  %v1270_v62 = vpop.f32.mrf.mxu1 }
 0x20b   :  { %v1446_v10 = vadd.f32 %v1445_v54, %v1357_v45  ;;  %v1271_v33 = vadd.f32 %v1270_v62, %v1182_v49  ;;  %1496 = vmatmul.bf16.vlgmr.msra.gmra.mxu0 %v5094_v11 }
 0x20c   :  { %1585 = vmatmul.bf16.vlgmr.msra.gmra.mxu1 %v5095_v14 }
 0x20d   :  { %v1874_v50 = vmax.f32 %v1446_v10, 0.0  ;;  %1674 = vmatmul.bf16.vlgmr.msra.gmra.mxu2 %v5096_v46  ;;  %v5099_v46 = vld [vmem:[#allocation5_spill] sm:$0xff] }
 0x20e   :  { %1763 = vmatmul.bf16.vlgmr.msra.gmra.mxu3 %v5097_v22  ;;  %v5100_v22 = vld [vmem:[#allocation20_spill] sm:$0xff] }
 0x20f   :  { %v4517_v63 = vpack.c.bf16 %v1874_v50, %v1872_v52  ;;  %v5098_v50 = vld [vmem:[#allocation4_spill] sm:$0xff] }
 0x210   :  { %v1359_v17 = vpop.f32.mrf.mxu2  ;;  %v1183_v18 = vpop.f32.mrf.mxu0 }
 0x211   :  { %v1360_v7 = vadd.f32 %v1359_v17, %v1271_v33  ;;  %v1448_v20 = vpop.f32.mrf.mxu3  ;;  %v1184_v57 = vadd.f32 %v1183_v18, %v4232_v59  ;;  %v1272_v0 = vpop.f32.mrf.mxu1 }
 0x213   :  { %v1449_v26 = vadd.f32 %v1448_v20, %v1360_v7  ;;  %v1273_v55 = vadd.f32 %v1272_v0, %v1184_v57 }
 0x215   :  { %v1876_v14 = vmax.f32 %v1449_v26, 0.0 }
 0x218   :  { %v1361_v45 = vpop.f32.mrf.mxu2  ;;  %v1186_v49 = vpop.f32.mrf.mxu0 }
 0x219   :  { %v1362_v54 = vadd.f32 %v1361_v45, %v1273_v55  ;;  %v1450_v12 = vpop.f32.mrf.mxu3  ;;  %v1187_v62 = vadd.f32 %v1186_v49, %v4232_v59  ;;  %v1275_v10 = vpop.f32.mrf.mxu1 }
 0x21b   :  { %v1451_v11 = vadd.f32 %v1450_v12, %v1362_v54  ;;  %v1276_v52 = vadd.f32 %v1275_v10, %v1187_v62  ;;  %1501 = vmatmul.bf16.gmra.mxu0 %v5098_v50 }
 0x21c   :  { %1590 = vmatmul.bf16.gmra.mxu1 %v5099_v46  ;;  %v5103_v46 = vld [vmem:[#allocation7_spill] sm:$0xff] }
 0x21d   :  { %v1878_v33 = vmax.f32 %v1451_v11, 0.0  ;;  %1679 = vmatmul.bf16.gmra.mxu2 %v5100_v22  ;;  %v5104_v22 = vld [vmem:[#allocation22_spill] sm:$0xff] }
 0x21e   :  { %1768 = vmatmul.bf16.gmra.mxu3 %v5101_v47  ;;  %v5105_v47 = vld [vmem:[#allocation23_spill] sm:$0xff] }
 0x21f   :  { %v4525_v16 = vpack.c.bf16 %v1878_v33, %v1876_v14  ;;  %v5102_v14 = vld [vmem:[#allocation6_spill] sm:$0xff] }
 0x220   :  { %v1364_v17 = vpop.f32.mrf.mxu2  ;;  %v1188_v18 = vpop.f32.mrf.mxu0 }
 0x221   :  { %v1365_v7 = vadd.f32 %v1364_v17, %v1276_v52  ;;  %v1453_v20 = vpop.f32.mrf.mxu3  ;;  %v1189_v57 = vadd.f32 %v1188_v18, %v4232_v59  ;;  %v1277_v0 = vpop.f32.mrf.mxu1  ;;  %v3253_v17 = vld [vmem:[%s5007_s5 + $0x28] sm:$0xff] }
 0x222   :  { %2074 = vmatpush.bf16.msrb.mxu0 %v3253_v17  ;;  %v5107_v17 = vld [vmem:[#allocation9_spill] sm:$0xff] }
 0x223   :  { %v1454_v55 = vadd.f32 %v1453_v20, %v1365_v7  ;;  %v1278_v45 = vadd.f32 %v1277_v0, %v1189_v57  ;;  %v3261_v7 = vld [vmem:[%s5007_s5 + $0x68] sm:$0xff] }
 0x224   :  { %2163 = vmatpush.bf16.msrb.mxu1 %v3261_v7  ;;  %v5108_v7 = vld [vmem:[#allocation24_spill] sm:$0xff] }
 0x225   :  { %v1880_v33 = vmax.f32 %v1454_v55, 0.0 }
 0x228   :  { %v1366_v54 = vpop.f32.mrf.mxu2  ;;  %v1191_v49 = vpop.f32.mrf.mxu0 }
 0x229   :  { %v1367_v26 = vadd.f32 %v1366_v54, %v1278_v45  ;;  %v1455_v12 = vpop.f32.mrf.mxu3  ;;  %v1192_v62 = vadd.f32 %v1191_v49, %v4232_v59  ;;  %v1280_v10 = vpop.f32.mrf.mxu1 }
 0x22b   :  { %v1456_v11 = vadd.f32 %v1455_v12, %v1367_v26  ;;  %v1281_v50 = vadd.f32 %v1280_v10, %v1192_v62  ;;  %1506 = vmatmul.bf16.gmra.mxu0 %v5102_v14 }
 0x22c   :  { %1595 = vmatmul.bf16.gmra.mxu1 %v5103_v46 }
 0x22d   :  { %v1882_v52 = vmax.f32 %v1456_v11, 0.0  ;;  %1684 = vmatmul.bf16.gmra.mxu2 %v5104_v22  ;;  %v5106_v22 = vld [vmem:[#allocation8_spill] sm:$0xff] }
 0x22e   :  { %1773 = vmatmul.bf16.gmra.mxu3 %v5105_v47 }
 0x22f   :  { %v4539_v20 = vpack.c.bf16 %v1882_v52, %v1880_v33 }
 0x230   :  { %v1369_v18 = vpop.f32.mrf.mxu2  ;;  %v1193_v55 = vpop.f32.mrf.mxu0 }
 0x231   :  { %v1370_v57 = vadd.f32 %v1369_v18, %v1281_v50  ;;  %v1458_v0 = vpop.f32.mrf.mxu3  ;;  %v1194_v45 = vadd.f32 %v1193_v55, %v4232_v59  ;;  %v1282_v54 = vpop.f32.mrf.mxu1  ;;  %v5109_v18 = vld [vmem:[#allocation25_spill] sm:$0xff] }
 0x233   :  { %v1459_v26 = vadd.f32 %v1458_v0, %v1370_v57  ;;  %v1283_v12 = vadd.f32 %v1282_v54, %v1194_v45 }
 0x235   :  { %v1884_v47 = vmax.f32 %v1459_v26, 0.0 }
 0x238   :  { %v1371_v49 = vpop.f32.mrf.mxu2  ;;  %v1196_v11 = vpop.f32.mrf.mxu0 }
 0x239   :  { %v1372_v62 = vadd.f32 %v1371_v49, %v1283_v12  ;;  %v1460_v10 = vpop.f32.mrf.mxu3  ;;  %v1197_v14 = vadd.f32 %v1196_v11, %v4232_v59  ;;  %v1285_v46 = vpop.f32.mrf.mxu1 }
 0x23b   :  { %v1461_v33 = vadd.f32 %v1460_v10, %v1372_v62  ;;  %v1286_v52 = vadd.f32 %v1285_v46, %v1197_v14  ;;  %1511 = vmatmul.bf16.gmra.mxu0 %v5106_v22 }
 0x23c   :  { %1600 = vmatmul.bf16.gmra.mxu1 %v5107_v17 }
 0x23d   :  { %v1886_v50 = vmax.f32 %v1461_v33, 0.0  ;;  %1689 = vmatmul.bf16.gmra.mxu2 %v5108_v7 }
 0x23e   :  { %1778 = vmatmul.bf16.gmra.mxu3 %v5109_v18  ;;  %v5111_v18 = vld [vmem:[#allocation11_spill] sm:$0xff] }
 0x23f   :  { %v4547_v57 = vpack.c.bf16 %v1886_v50, %v1884_v47  ;;  %v5110_v47 = vld [vmem:[#allocation10_spill] sm:$0xff] }
 0x240   :  { %v1374_v0 = vpop.f32.mrf.mxu2  ;;  %v1198_v54 = vpop.f32.mrf.mxu0 }
 0x241   :  { %v1375_v55 = vadd.f32 %v1374_v0, %v1286_v52  ;;  %v1463_v45 = vpop.f32.mrf.mxu3  ;;  %v1199_v12 = vadd.f32 %v1198_v54, %v4232_v59  ;;  %v1287_v49 = vpop.f32.mrf.mxu1  ;;  %v5112_v0 = vld [vmem:[#allocation26_spill] sm:$0xff]  ;;  %v5113_v54 = vld [vmem:[#allocation27_spill] sm:$0xff] }
 0x243   :  { %v1464_v62 = vadd.f32 %v1463_v45, %v1375_v55  ;;  %v1288_v10 = vadd.f32 %v1287_v49, %v1199_v12  ;;  %v3252_v55 = vld [vmem:[%s5007_s5 + $0x20] sm:$0xff] }
 0x244   :  { %v3260_v45 = vld [vmem:[%s5007_s5 + $0x60] sm:$0xff]  ;;  %2075 = vmatpush.bf16.msrb.mxu0 %v3252_v55 }
 0x245   :  { %v1888_v50 = vmax.f32 %v1464_v62, 0.0  ;;  %2164 = vmatpush.bf16.msrb.mxu1 %v3260_v45  ;;  %v5116_v45 = vld [vmem:[#allocation13_spill] sm:$0xff] }
 0x248   :  { %v1376_v11 = vpop.f32.mrf.mxu2  ;;  %v1201_v46 = vpop.f32.mrf.mxu0 }
 0x249   :  { %v1377_v26 = vadd.f32 %v1376_v11, %v1288_v10  ;;  %v1465_v14 = vpop.f32.mrf.mxu3  ;;  %v1202_v33 = vadd.f32 %v1201_v46, %v4232_v59  ;;  %v1290_v22 = vpop.f32.mrf.mxu1 }
 0x24b   :  { %v1466_v17 = vadd.f32 %v1465_v14, %v1377_v26  ;;  %v1291_v7 = vadd.f32 %v1290_v22, %v1202_v33  ;;  %1516 = vmatmul.bf16.gmra.mxu0 %v5110_v47 }
 0x24c   :  { %1605 = vmatmul.bf16.gmra.mxu1 %v5111_v18 }
 0x24d   :  { %v1890_v52 = vmax.f32 %v1466_v17, 0.0  ;;  %1694 = vmatmul.bf16.gmra.mxu2 %v5112_v0 }
 0x24e   :  { %1783 = vmatmul.bf16.gmra.mxu3 %v5113_v54 }
 0x24f   :  { %v4561_v12 = vpack.c.bf16 %v1890_v52, %v1888_v50 }
 0x250   :  { %v1379_v49 = vpop.f32.mrf.mxu2  ;;  %v1203_v11 = vpop.f32.mrf.mxu0 }
 0x251   :  { %5114 = vst [vmem:[#allocation30_spill] sm:$0xff] %v4561_v12  ;;  %v1380_v62 = vadd.f32 %v1379_v49, %v1291_v7  ;;  %v1468_v10 = vpop.f32.mrf.mxu3  ;;  %v1204_v26 = vadd.f32 %v1203_v11, %v4232_v59  ;;  %v1292_v14 = vpop.f32.mrf.mxu1  ;;  %v5115_v12 = vld [vmem:[#allocation12_spill] sm:$0xff]  ;;  %v5118_v11 = vld [vmem:[#allocation29_spill] sm:$0xff] }
 0x252   :  { %v5117_v49 = vld [vmem:[#allocation28_spill] sm:$0xff] }
 0x253   :  { %v1469_v46 = vadd.f32 %v1468_v10, %v1380_v62  ;;  %v1293_v33 = vadd.f32 %v1292_v14, %v1204_v26 }
 0x255   :  { %v1892_v55 = vmax.f32 %v1469_v46, 0.0 }
 0x258   :  { %v1381_v22 = vpop.f32.mrf.mxu2  ;;  %v1206_v18 = vpop.f32.mrf.mxu0 }
 0x259   :  { %v1382_v17 = vadd.f32 %v1381_v22, %v1293_v33  ;;  %v1470_v47 = vpop.f32.mrf.mxu3  ;;  %v1207_v0 = vadd.f32 %v1206_v18, %v4232_v59  ;;  %v1295_v54 = vpop.f32.mrf.mxu1 }
 0x25b   :  { %v1471_v50 = vadd.f32 %v1470_v47, %v1382_v17  ;;  %v1296_v52 = vadd.f32 %v1295_v54, %v1207_v0  ;;  %1521 = vmatmul.bf16.gmra.mxu0 %v5115_v12 }
 0x25c   :  { %1610 = vmatmul.bf16.gmra.mxu1 %v5116_v45 }
 0x25d   :  { %v1894_v7 = vmax.f32 %v1471_v50, 0.0  ;;  %1699 = vmatmul.bf16.gmra.mxu2 %v5117_v49 }
 0x25e   :  { %1788 = vmatmul.bf16.gmra.mxu3 %v5118_v11 }
 0x25f   :  { %v4569_v62 = vpack.c.bf16 %v1894_v7, %v1892_v55  ;;  %v5120_v55 = vld [vmem:[#allocation14_spill] sm:$0xff] }
 0x260   :  { %v1384_v10 = vpop.f32.mrf.mxu2  ;;  %v1208_v33 = vpop.f32.mrf.mxu0 }
 0x261   :  { %5119 = vst [vmem:[#allocation31_spill] sm:$0xff] %v4569_v62  ;;  %v1385_v26 = vadd.f32 %v1384_v10, %v1296_v52  ;;  %v1473_v14 = vpop.f32.mrf.mxu3  ;;  %v1209_v22 = vadd.f32 %v1208_v33, %v4232_v59  ;;  %v1297_v17 = vpop.f32.mrf.mxu1  ;;  %v5121_v10 = vld [vmem:[#allocation15_spill] sm:$0xff]  ;;  %v5122_v62 = vld [vmem:[#allocation32_spill] sm:$0xff]  ;;  %v5123_v33 = vld [vmem:[#allocation33_spill] sm:$0xff] }
 0x263   :  { %v1474_v47 = vadd.f32 %v1473_v14, %v1385_v26  ;;  %v1298_v18 = vadd.f32 %v1297_v17, %v1209_v22  ;;  %v3251_v26 = vld [vmem:[%s5007_s5 + $0x18] sm:$0xff] }
 0x264   :  { %v3259_v14 = vld [vmem:[%s5007_s5 + $0x58] sm:$0xff]  ;;  %2076 = vmatpush.bf16.msrb.mxu0 %v3251_v26 }
 0x265   :  { %v1896_v7 = vmax.f32 %v1474_v47, 0.0  ;;  %2165 = vmatpush.bf16.msrb.mxu1 %v3259_v14  ;;  %v5124_v14 = vld [vmem:[#allocation16_spill] sm:$0xff] }
 0x268   :  { %v1386_v12 = vpop.f32.mrf.mxu2  ;;  %v1211_v54 = vpop.f32.mrf.mxu0 }
 0x269   :  { %v1387_v46 = vadd.f32 %v1386_v12, %v1298_v18  ;;  %v1475_v0 = vpop.f32.mrf.mxu3  ;;  %v1212_v50 = vadd.f32 %v1211_v54, %v4232_v59  ;;  %v1300_v45 = vpop.f32.mrf.mxu1 }
 0x26b   :  { %v1476_v49 = vadd.f32 %v1475_v0, %v1387_v46  ;;  %v1301_v11 = vadd.f32 %v1300_v45, %v1212_v50  ;;  %1526 = vmatmul.bf16.gmra.mxu0 %v5120_v55 }
 0x26c   :  { %1615 = vmatmul.bf16.gmra.mxu1 %v5121_v10 }
 0x26d   :  { %v1898_v52 = vmax.f32 %v1476_v49, 0.0  ;;  %1704 = vmatmul.bf16.gmra.mxu2 %v5122_v62 }
 0x26e   :  { %1793 = vmatmul.bf16.gmra.mxu3 %v5123_v33 }
 0x26f   :  { %v4583_v22 = vpack.c.bf16 %v1898_v52, %v1896_v7 }
 0x270   :  { %v1389_v17 = vpop.f32.mrf.mxu2  ;;  %v1213_v12 = vpop.f32.mrf.mxu0 }
 0x271   :  { %v1390_v47 = vadd.f32 %v1389_v17, %v1301_v11  ;;  %v1478_v18 = vpop.f32.mrf.mxu3  ;;  %v1214_v62 = vadd.f32 %v1213_v12, %v4232_v59  ;;  %v1302_v46 = vpop.f32.mrf.mxu1  ;;  %v5125_v17 = vld [vmem:[#allocation17_spill] sm:$0xff] }
 0x273   :  { %v1479_v0 = vadd.f32 %v1478_v18, %v1390_v47  ;;  %v1303_v54 = vadd.f32 %v1302_v46, %v1214_v62  ;;  %v3271_v47 = vld [vmem:[%s5008_s7 + $0x38] sm:$0xff] }
 0x274   :  { %2366 = vmatpush.bf16.msrb.mxu2 %v3271_v47  ;;  %v5126_v47 = vld [vmem:[#allocation36_spill] sm:$0xff] }
 0x275   :  { %v1900_v26 = vmax.f32 %v1479_v0, 0.0 }
 0x278   :  { %v1391_v50 = vpop.f32.mrf.mxu2  ;;  %v1216_v55 = vpop.f32.mrf.mxu0 }
 0x279   :  { %v1392_v45 = vadd.f32 %v1391_v50, %v1303_v54  ;;  %v1480_v49 = vpop.f32.mrf.mxu3  ;;  %v1217_v10 = vadd.f32 %v1216_v55, %v4232_v59  ;;  %v1305_v33 = vpop.f32.mrf.mxu1 }
 0x27b   :  { %v1481_v7 = vadd.f32 %v1480_v49, %v1392_v45  ;;  %v1306_v52 = vadd.f32 %v1305_v33, %v1217_v10  ;;  %1531 = vmatmul.bf16.gmra.mxu0 %v3901_v42  ;;  %v3283_v45 = vld [vmem:[%s5006_s4] sm:$0x3] }
 0x27c   :  { %1620 = vmatmul.bf16.gmra.mxu1 %v3903_v40  ;;  %v4600_v49 = vperm.slane %v3283_v45, 1 }
 0x27d   :  { %v1902_v11 = vmax.f32 %v1481_v7, 0.0  ;;  %1709 = vmatmul.bf16.gmra.mxu2 %v5124_v14 }
 0x27e   :  { %1798 = vmatmul.bf16.gmra.mxu3 %v5125_v17 }
 0x27f   :  { %v4594_v18 = vpack.c.bf16 %v1902_v11, %v1900_v26 }
 0x280   :  { %v1394_v12 = vpop.f32.mrf.mxu2  ;;  %v1218_v54 = vpop.f32.mrf.mxu0 }
 0x281   :  { %v1395_v62 = vadd.f32 %v1394_v12, %v1306_v52  ;;  %v1483_v46 = vpop.f32.mrf.mxu3  ;;  %v1219_v42 = vadd.f32 %v1218_v54, %v4232_v59  ;;  %v1307_v0 = vpop.f32.mrf.mxu1  ;;  %v5127_v12 = vld [vmem:[#allocation37_spill] sm:$0xff] }
 0x283   :  { %v1484_v50 = vadd.f32 %v1483_v46, %v1395_v62  ;;  %v1308_v40 = vadd.f32 %v1307_v0, %v1219_v42  ;;  %v3250_v62 = vld [vmem:[%s5007_s5 + $0x10] sm:$0xff] }
 0x284   :  { %v3258_v46 = vld [vmem:[%s5007_s5 + $0x50] sm:$0xff]  ;;  %2077 = vmatpush.bf16.msrb.mxu0 %v3250_v62 }
 0x285   :  { %v1904_v59 = vmax.f32 %v1484_v50, 0.0  ;;  %2166 = vmatpush.bf16.msrb.mxu1 %v3258_v46 }
 0x288   :  { %v1396_v55 = vpop.f32.mrf.mxu2  ;;  %v1497_v7 = vpop.f32.mrf.mxu0 }
 0x289   :  { %v1397_v10 = vadd.f32 %v1396_v55, %v1308_v40  ;;  %v1485_v33 = vpop.f32.mrf.mxu3  ;;  %v1498_v52 = vadd.f32 %v1497_v7, %v4600_v49  ;;  %v1586_v26 = vpop.f32.mrf.mxu1 }
 0x28b   :  { %v1486_v11 = vadd.f32 %v1485_v33, %v1397_v10  ;;  %v1587_v14 = vadd.f32 %v1586_v26, %v1498_v52  ;;  %1536 = vmatmul.bf16.gmra.mxu0 %v3945_v9 }
 0x28c   :  { %1625 = vmatmul.bf16.gmra.mxu1 %v3947_v4 }
 0x28d   :  { %v1906_v17 = vmax.f32 %v1486_v11, 0.0  ;;  %1714 = vmatmul.bf16.gmra.mxu2 %v5126_v47 }
 0x28e   :  { %1803 = vmatmul.bf16.gmra.mxu3 %v5127_v12  ;;  %v3270_v12 = vld [vmem:[%s5008_s7 + $0x30] sm:$0xff] }
 0x28f   :  { %v4613_v54 = vpack.c.bf16 %v1906_v17, %v1904_v59  ;;  %2367 = vmatpush.bf16.msrb.mxu2 %v3270_v12 }
 0x290   :  { %v1675_v42 = vpop.f32.mrf.mxu2  ;;  %v1499_v4 = vpop.f32.mrf.mxu0 }
 0x291   :  { %v1676_v9 = vadd.f32 %v1675_v42, %v1587_v14  ;;  %v1764_v0 = vpop.f32.mrf.mxu3  ;;  %v1500_v50 = vadd.f32 %v1499_v4, %v4600_v49  ;;  %v1588_v40 = vpop.f32.mrf.mxu1 }
 0x293   :  { %v1765_v45 = vadd.f32 %v1764_v0, %v1676_v9  ;;  %v1589_v55 = vadd.f32 %v1588_v40, %v1500_v50 }
 0x295   :  { %v1845_v47 = vmax.f32 %v1765_v45, 0.0 }
 0x298   :  { %v1677_v10 = vpop.f32.mrf.mxu2  ;;  %v1502_v52 = vpop.f32.mrf.mxu0 }
 0x299   :  { %v1678_v33 = vadd.f32 %v1677_v10, %v1589_v55  ;;  %v1766_v7 = vpop.f32.mrf.mxu3  ;;  %v1503_v26 = vadd.f32 %v1502_v52, %v4600_v49  ;;  %v1591_v11 = vpop.f32.mrf.mxu1 }
 0x29b   :  { %v1767_v59 = vadd.f32 %v1766_v7, %v1678_v33  ;;  %v1592_v17 = vadd.f32 %v1591_v11, %v1503_v26  ;;  %1541 = vmatmul.bf16.gmra.mxu0 %v3977_v19  ;;  %v3249_v11 = vld [vmem:[%s5007_s5 + $0x8] sm:$0xff] }
 0x29c   :  { %1630 = vmatmul.bf16.gmra.mxu1 %v3979_v31  ;;  %2078 = vmatpush.bf16.msrb.mxu0 %v3249_v11 }
 0x29d   :  { %v1847_v14 = vmax.f32 %v1767_v59, 0.0  ;;  %1719 = vmatmul.bf16.gmra.mxu2 %v4273_v2  ;;  %v3257_v59 = vld [vmem:[%s5007_s5 + $0x48] sm:$0xff] }
 0x29e   :  { %1808 = vmatmul.bf16.gmra.mxu3 %v4276_v44  ;;  %2167 = vmatpush.bf16.msrb.mxu1 %v3257_v59 }
 0x29f   :  { %v4624_v62 = vpack.c.bf16 %v1847_v14, %v1845_v47 }
 0x2a0   :  { %v1680_v46 = vpop.f32.mrf.mxu2  ;;  %v1504_v0 = vpop.f32.mrf.mxu0 }
 0x2a1   :  { %v1681_v42 = vadd.f32 %v1680_v46, %v1592_v17  ;;  %v1769_v9 = vpop.f32.mrf.mxu3  ;;  %v1505_v19 = vadd.f32 %v1504_v0, %v4600_v49  ;;  %v1593_v4 = vpop.f32.mrf.mxu1 }
 0x2a3   :  { %v1770_v50 = vadd.f32 %v1769_v9, %v1681_v42  ;;  %v1594_v31 = vadd.f32 %v1593_v4, %v1505_v19 }
 0x2a5   :  { %v1849_v52 = vmax.f32 %v1770_v50, 0.0 }
 0x2a8   :  { %v1682_v40 = vpop.f32.mrf.mxu2  ;;  %v1507_v55 = vpop.f32.mrf.mxu0 }
 0x2a9   :  { %v1683_v2 = vadd.f32 %v1682_v40, %v1594_v31  ;;  %v1771_v45 = vpop.f32.mrf.mxu3  ;;  %v1508_v10 = vadd.f32 %v1507_v55, %v4600_v49  ;;  %v1596_v33 = vpop.f32.mrf.mxu1  ;;  %v3269_v55 = vld [vmem:[%s5008_s7 + $0x28] sm:$0xff] }
 0x2aa   :  { %2368 = vmatpush.bf16.msrb.mxu2 %v3269_v55 }
 0x2ab   :  { %v1772_v44 = vadd.f32 %v1771_v45, %v1683_v2  ;;  %v1597_v7 = vadd.f32 %v1596_v33, %v1508_v10  ;;  %1546 = vmatmul.bf16.gmra.mxu0 %v4021_v58 }
 0x2ac   :  { %1635 = vmatmul.bf16.gmra.mxu1 %v4023_v3 }
 0x2ad   :  { %v1851_v26 = vmax.f32 %v1772_v44, 0.0  ;;  %1724 = vmatmul.bf16.gmra.mxu2 %v4305_v8 }
 0x2ae   :  { %1813 = vmatmul.bf16.gmra.mxu3 %v4308_v60 }
 0x2af   :  { %v4638_v17 = vpack.c.bf16 %v1851_v26, %v1849_v52 }
 0x2b0   :  { %v1685_v47 = vpop.f32.mrf.mxu2  ;;  %v1509_v3 = vpop.f32.mrf.mxu0 }
 0x2b1   :  { %v1686_v58 = vadd.f32 %v1685_v47, %v1597_v7  ;;  %v1774_v14 = vpop.f32.mrf.mxu3  ;;  %v1510_v8 = vadd.f32 %v1509_v3, %v4600_v49  ;;  %v1598_v12 = vpop.f32.mrf.mxu1 }
 0x2b3   :  { %v1775_v60 = vadd.f32 %v1774_v14, %v1686_v58  ;;  %v1599_v46 = vadd.f32 %v1598_v12, %v1510_v8 }
 0x2b5   :  { %v1853_v2 = vmax.f32 %v1775_v60, 0.0 }
 0x2b8   :  { %v1687_v42 = vpop.f32.mrf.mxu2  ;;  %v1512_v19 = vpop.f32.mrf.mxu0 }
 0x2b9   :  { %v1688_v9 = vadd.f32 %v1687_v42, %v1599_v46  ;;  %v1776_v0 = vpop.f32.mrf.mxu3  ;;  %v1513_v4 = vadd.f32 %v1512_v19, %v4600_v49  ;;  %v1601_v50 = vpop.f32.mrf.mxu1  ;;  %v3248_v46 = vld [vmem:[%s5007_s5] sm:$0xff] }
 0x2ba   :  { %v3256_v42 = vld [vmem:[%s5007_s5 + $0x40] sm:$0xff]  ;;  %2079 = vmatpush.bf16.msrb.mxu0 %v3248_v46 }
 0x2bb   :  { %v1777_v31 = vadd.f32 %v1776_v0, %v1688_v9  ;;  %v1602_v40 = vadd.f32 %v1601_v50, %v1513_v4  ;;  %1551 = vmatmul.bf16.gmra.mxu0 %v4053_v24  ;;  %2168 = vmatpush.bf16.msrb.mxu1 %v3256_v42 }
 0x2bc   :  { %1640 = vmatmul.bf16.gmra.mxu1 %v4055_v41 }
 0x2bd   :  { %v1855_v45 = vmax.f32 %v1777_v31, 0.0  ;;  %1729 = vmatmul.bf16.gmra.mxu2 %v4337_v39 }
 0x2be   :  { %1818 = vmatmul.bf16.gmra.mxu3 %v4340_v6 }
 0x2bf   :  { %v4649_v10 = vpack.c.bf16 %v1855_v45, %v1853_v2 }
 0x2c0   :  { %v1690_v33 = vpop.f32.mrf.mxu2  ;;  %v1514_v52 = vpop.f32.mrf.mxu0 }
 0x2c1   :  { %v1691_v44 = vadd.f32 %v1690_v33, %v1602_v40  ;;  %v1779_v7 = vpop.f32.mrf.mxu3  ;;  %v1515_v24 = vadd.f32 %v1514_v52, %v4600_v49  ;;  %v1603_v26 = vpop.f32.mrf.mxu1 }
 0x2c3   :  { %v1780_v11 = vadd.f32 %v1779_v7, %v1691_v44  ;;  %v1604_v41 = vadd.f32 %v1603_v26, %v1515_v24  ;;  %v3268_v26 = vld [vmem:[%s5008_s7 + $0x20] sm:$0xff] }
 0x2c4   :  { %2369 = vmatpush.bf16.msrb.mxu2 %v3268_v26 }
 0x2c5   :  { %v1857_v12 = vmax.f32 %v1780_v11, 0.0 }
 0x2c8   :  { %v1692_v59 = vpop.f32.mrf.mxu2  ;;  %v1517_v58 = vpop.f32.mrf.mxu0 }
 0x2c9   :  { %v1693_v39 = vadd.f32 %v1692_v59, %v1604_v41  ;;  %v1781_v47 = vpop.f32.mrf.mxu3  ;;  %v1518_v14 = vadd.f32 %v1517_v58, %v4600_v49  ;;  %v1606_v3 = vpop.f32.mrf.mxu1 }
 0x2cb   :  { %v1782_v6 = vadd.f32 %v1781_v47, %v1693_v39  ;;  %v1607_v8 = vadd.f32 %v1606_v3, %v1518_v14  ;;  %1556 = vmatmul.bf16.gmra.mxu0 %v4097_v53 }
 0x2cc   :  { %1645 = vmatmul.bf16.gmra.mxu1 %v4099_v25 }
 0x2cd   :  { %v1859_v60 = vmax.f32 %v1782_v6, 0.0  ;;  %1734 = vmatmul.bf16.gmra.mxu2 %v4369_v35 }
 0x2ce   :  { %1823 = vmatmul.bf16.gmra.mxu3 %v4372_v56 }
 0x2cf   :  { %v4663_v9 = vpack.c.bf16 %v1859_v60, %v1857_v12 }
 0x2d0   :  { %v1695_v0 = vpop.f32.mrf.mxu2  ;;  %v1519_v19 = vpop.f32.mrf.mxu0 }
 0x2d1   :  { %v1784_v53 = vpop.f32.mrf.mxu3  ;;  %v1520_v25 = vadd.f32 %v1519_v19, %v4600_v49  ;;  %v1608_v35 = vpop.f32.mrf.mxu1  ;;  %v1696_v56 = vadd.f32 %v1695_v0, %v1607_v8 }
 0x2d3   :  { %v1609_v4 = vadd.f32 %v1608_v35, %v1520_v25  ;;  %v1785_v31 = vadd.f32 %v1784_v53, %v1696_v56 }
 0x2d5   :  { %v1861_v52 = vmax.f32 %v1785_v31, 0.0 }
 0x2d8   :  { %v1697_v50 = vpop.f32.mrf.mxu2  ;;  %v1522_v45 = vpop.f32.mrf.mxu0 }
 0x2d9   :  { %v1698_v40 = vadd.f32 %v1697_v50, %v1609_v4  ;;  %v1786_v2 = vpop.f32.mrf.mxu3  ;;  %v1523_v55 = vadd.f32 %v1522_v45, %v4600_v49  ;;  %v1611_v33 = vpop.f32.mrf.mxu1 }
 0x2db   :  { %v1787_v44 = vadd.f32 %v1786_v2, %v1698_v40  ;;  %v1612_v7 = vadd.f32 %v1611_v33, %v1523_v55  ;;  %1561 = vmatmul.bf16.gmra.mxu0 %v5090_v34 }
 0x2dc   :  { %1650 = vmatmul.bf16.gmra.mxu1 %v5091_v36 }
 0x2dd   :  { %v1863_v24 = vmax.f32 %v1787_v44, 0.0  ;;  %1739 = vmatmul.bf16.gmra.mxu2 %v4401_v21 }
 0x2de   :  { %1828 = vmatmul.bf16.gmra.mxu3 %v4404_v29 }
 0x2df   :  { %v4674_v11 = vpack.c.bf16 %v1863_v24, %v1861_v52  ;;  %v3267_v52 = vld [vmem:[%s5008_s7 + $0x18] sm:$0xff] }
 0x2e0   :  { %v1700_v41 = vpop.f32.mrf.mxu2  ;;  %v1524_v39 = vpop.f32.mrf.mxu0  ;;  %2370 = vmatpush.bf16.msrb.mxu2 %v3267_v52 }
 0x2e1   :  { %v1789_v59 = vpop.f32.mrf.mxu3  ;;  %v1525_v34 = vadd.f32 %v1524_v39, %v4600_v49  ;;  %v1613_v47 = vpop.f32.mrf.mxu1  ;;  %v1701_v14 = vadd.f32 %v1700_v41, %v1612_v7 }
 0x2e3   :  { %v1614_v58 = vadd.f32 %v1613_v47, %v1525_v34  ;;  %v1790_v3 = vadd.f32 %v1789_v59, %v1701_v14 }
 0x2e5   :  { %v1865_v42 = vmax.f32 %v1790_v3, 0.0 }
 0x2e8   :  { %v1702_v36 = vpop.f32.mrf.mxu2  ;;  %v1527_v8 = vpop.f32.mrf.mxu0 }
 0x2e9   :  { %v1703_v21 = vadd.f32 %v1702_v36, %v1614_v58  ;;  %v1791_v6 = vpop.f32.mrf.mxu3  ;;  %v1528_v12 = vadd.f32 %v1527_v8, %v4600_v49  ;;  %v1616_v60 = vpop.f32.mrf.mxu1 }
 0x2eb   :  { %v1792_v29 = vadd.f32 %v1791_v6, %v1703_v21  ;;  %v1617_v46 = vadd.f32 %v1616_v60, %v1528_v12  ;;  %1566 = vmatmul.bf16.gmra.mxu0 %v4185_v23  ;;  %v3279_v60 = vld [vmem:[%s5010_s9 + $0x38] sm:$0xff] }
 0x2ec   :  { %1655 = vmatmul.bf16.gmra.mxu1 %v4187_v37  ;;  %2571 = vmatpush.bf16.msrb.mxu3 %v3279_v60 }
 0x2ed   :  { %v1867_v0 = vmax.f32 %v1792_v29, 0.0  ;;  %1744 = vmatmul.bf16.gmra.mxu2 %v4469_v51 }
 0x2ee   :  { %1833 = vmatmul.bf16.gmra.mxu3 %v4472_v1 }
 0x2ef   :  { %v4682_v53 = vpack.c.bf16 %v1867_v0, %v1865_v42 }
 0x2f0   :  { %v1705_v19 = vpop.f32.mrf.mxu2  ;;  %v1529_v35 = vpop.f32.mrf.mxu0 }
 0x2f1   :  { %v1794_v25 = vpop.f32.mrf.mxu3  ;;  %v1530_v4 = vadd.f32 %v1529_v35, %v4600_v49  ;;  %v1618_v56 = vpop.f32.mrf.mxu1  ;;  %v1706_v31 = vadd.f32 %v1705_v19, %v1617_v46 }
 0x2f3   :  { %v1619_v50 = vadd.f32 %v1618_v56, %v1530_v4  ;;  %v1795_v23 = vadd.f32 %v1794_v25, %v1706_v31 }
 0x2f5   :  { %v1869_v44 = vmax.f32 %v1795_v23, 0.0 }
 0x2f8   :  { %v1707_v40 = vpop.f32.mrf.mxu2  ;;  %v1532_v55 = vpop.f32.mrf.mxu0 }
 0x2f9   :  { %v1708_v2 = vadd.f32 %v1707_v40, %v1619_v50  ;;  %v1796_v45 = vpop.f32.mrf.mxu3  ;;  %v1533_v37 = vadd.f32 %v1532_v55, %v4600_v49  ;;  %v1621_v51 = vpop.f32.mrf.mxu1 }
 0x2fb   :  { %v1797_v33 = vadd.f32 %v1796_v45, %v1708_v2  ;;  %v1622_v1 = vadd.f32 %v1621_v51, %v1533_v37  ;;  %1571 = vmatmul.bf16.gmra.mxu0 %v4234_v30  ;;  %v3266_v51 = vld [vmem:[%s5008_s7 + $0x10] sm:$0xff] }
 0x2fc   :  { %1660 = vmatmul.bf16.gmra.mxu1 %v4236_v61  ;;  %2371 = vmatpush.bf16.msrb.mxu2 %v3266_v51 }
 0x2fd   :  { %v1871_v7 = vmax.f32 %v1797_v33, 0.0  ;;  %1749 = vmatmul.bf16.gmra.mxu2 %v4495_v5 }
 0x2fe   :  { %1838 = vmatmul.bf16.gmra.mxu3 %v4498_v27 }
 0x2ff   :  { %v4693_v24 = vpack.c.bf16 %v1871_v7, %v1869_v44 }
 0x300   :  { %v1710_v26 = vpop.f32.mrf.mxu2  ;;  %v1534_v59 = vpop.f32.mrf.mxu0 }
 0x301   :  { %v1799_v41 = vpop.f32.mrf.mxu3  ;;  %v1535_v30 = vadd.f32 %v1534_v59, %v4600_v49  ;;  %v1623_v39 = vpop.f32.mrf.mxu1  ;;  %v1711_v47 = vadd.f32 %v1710_v26, %v1622_v1 }
 0x303   :  { %v1624_v34 = vadd.f32 %v1623_v39, %v1535_v30  ;;  %v1800_v58 = vadd.f32 %v1799_v41, %v1711_v47 }
 0x305   :  { %v1873_v8 = vmax.f32 %v1800_v58, 0.0 }
 0x308   :  { %v1712_v61 = vpop.f32.mrf.mxu2  ;;  %v1537_v36 = vpop.f32.mrf.mxu0 }
 0x309   :  { %v1713_v5 = vadd.f32 %v1712_v61, %v1624_v34  ;;  %v1801_v14 = vpop.f32.mrf.mxu3  ;;  %v1538_v3 = vadd.f32 %v1537_v36, %v4600_v49  ;;  %v1626_v21 = vpop.f32.mrf.mxu1 }
 0x30b   :  { %v1802_v27 = vadd.f32 %v1801_v14, %v1713_v5  ;;  %v1627_v6 = vadd.f32 %v1626_v21, %v1538_v3  ;;  %2080 = vmatmul.bf16.vlgmr.msrb.gmra.mxu0 %v4293_v38  ;;  %v3278_v3 = vld [vmem:[%s5010_s9 + $0x30] sm:$0xff] }
 0x30c   :  { %2169 = vmatmul.bf16.vlgmr.msrb.gmra.mxu1 %v4624_v62  ;;  %2572 = vmatpush.bf16.msrb.mxu3 %v3278_v3 }
 0x30d   :  { %v1875_v12 = vmax.f32 %v1802_v27, 0.0 }
 0x30f   :  { %v4702_v29 = vpack.c.bf16 %v1875_v12, %v1873_v8 }
 0x310   :  { %v1715_v46 = vpop.f32.mrf.mxu2  ;;  %v1539_v0 = vpop.f32.mrf.mxu0 }
 0x311   :  { %v1804_v42 = vpop.f32.mrf.mxu3  ;;  %v1540_v19 = vadd.f32 %v1539_v0, %v4600_v49  ;;  %v1628_v25 = vpop.f32.mrf.mxu1  ;;  %v1716_v4 = vadd.f32 %v1715_v46, %v1627_v6 }
 0x313   :  { %v1629_v35 = vadd.f32 %v1628_v25, %v1540_v19  ;;  %v1805_v56 = vadd.f32 %v1804_v42, %v1716_v4 }
 0x315   :  { %v1877_v55 = vmax.f32 %v1805_v56, 0.0 }
 0x318   :  { %v1717_v38 = vpop.f32.mrf.mxu2  ;;  %v1542_v62 = vpop.f32.mrf.mxu0 }
 0x319   :  { %v1718_v50 = vadd.f32 %v1717_v38, %v1629_v35  ;;  %v1806_v31 = vpop.f32.mrf.mxu3  ;;  %v1543_v40 = vadd.f32 %v1542_v62, %v4600_v49  ;;  %v1631_v23 = vpop.f32.mrf.mxu1  ;;  %v3265_v62 = vld [vmem:[%s5008_s7 + $0x8] sm:$0xff] }
 0x31a   :  { %2372 = vmatpush.bf16.msrb.mxu2 %v3265_v62 }
 0x31b   :  { %v1807_v2 = vadd.f32 %v1806_v31, %v1718_v50  ;;  %v1632_v45 = vadd.f32 %v1631_v23, %v1543_v40  ;;  %2085 = vmatmul.bf16.gmra.mxu0 %v4325_v15 }
 0x31c   :  { %2174 = vmatmul.bf16.gmra.mxu1 %v4638_v17 }
 0x31d   :  { %v1879_v37 = vmax.f32 %v1807_v2, 0.0 }
 0x31f   :  { %v4711_v33 = vpack.c.bf16 %v1879_v37, %v1877_v55 }
 0x320   :  { %v1720_v1 = vpop.f32.mrf.mxu2  ;;  %v1544_v7 = vpop.f32.mrf.mxu0 }
 0x321   :  { %v1809_v44 = vpop.f32.mrf.mxu3  ;;  %v1545_v52 = vadd.f32 %v1544_v7, %v4600_v49  ;;  %v1633_v26 = vpop.f32.mrf.mxu1  ;;  %v1721_v59 = vadd.f32 %v1720_v1, %v1632_v45 }
 0x323   :  { %v1634_v41 = vadd.f32 %v1633_v26, %v1545_v52  ;;  %v1810_v30 = vadd.f32 %v1809_v44, %v1721_v59 }
 0x325   :  { %v1881_v14 = vmax.f32 %v1810_v30, 0.0 }
 0x328   :  { %v1722_v15 = vpop.f32.mrf.mxu2  ;;  %v1547_v17 = vpop.f32.mrf.mxu0 }
 0x329   :  { %v1723_v39 = vadd.f32 %v1722_v15, %v1634_v41  ;;  %v1811_v34 = vpop.f32.mrf.mxu3  ;;  %v1548_v47 = vadd.f32 %v1547_v17, %v4600_v49  ;;  %v1636_v61 = vpop.f32.mrf.mxu1 }
 0x32b   :  { %v1812_v58 = vadd.f32 %v1811_v34, %v1723_v39  ;;  %v1637_v5 = vadd.f32 %v1636_v61, %v1548_v47  ;;  %2090 = vmatmul.bf16.gmra.mxu0 %v4357_v48  ;;  %v3277_v34 = vld [vmem:[%s5010_s9 + $0x28] sm:$0xff] }
 0x32c   :  { %2179 = vmatmul.bf16.gmra.mxu1 %v4649_v10  ;;  %2573 = vmatpush.bf16.msrb.mxu3 %v3277_v34 }
 0x32d   :  { %v1883_v36 = vmax.f32 %v1812_v58, 0.0 }
 0x32f   :  { %v4720_v21 = vpack.c.bf16 %v1883_v36, %v1881_v14 }
 0x330   :  { %v1725_v27 = vpop.f32.mrf.mxu2  ;;  %v1549_v8 = vpop.f32.mrf.mxu0 }
 0x331   :  { %v1814_v6 = vpop.f32.mrf.mxu3  ;;  %v1550_v12 = vadd.f32 %v1549_v8, %v4600_v49  ;;  %v1638_v60 = vpop.f32.mrf.mxu1  ;;  %v1726_v42 = vadd.f32 %v1725_v27, %v1637_v5 }
 0x333   :  { %v1639_v46 = vadd.f32 %v1638_v60, %v1550_v12  ;;  %v1815_v0 = vadd.f32 %v1814_v6, %v1726_v42 }
 0x335   :  { %v1885_v50 = vmax.f32 %v1815_v0, 0.0 }
 0x338   :  { %v1727_v48 = vpop.f32.mrf.mxu2  ;;  %v1552_v10 = vpop.f32.mrf.mxu0 }
 0x339   :  { %v1728_v19 = vadd.f32 %v1727_v48, %v1639_v46  ;;  %v1816_v25 = vpop.f32.mrf.mxu3  ;;  %v1553_v35 = vadd.f32 %v1552_v10, %v4600_v49  ;;  %v1641_v4 = vpop.f32.mrf.mxu1 }
 0x33b   :  { %v1817_v38 = vadd.f32 %v1816_v25, %v1728_v19  ;;  %v1642_v56 = vadd.f32 %v1641_v4, %v1553_v35  ;;  %2095 = vmatmul.bf16.gmra.mxu0 %v4389_v32  ;;  %v3264_v19 = vld [vmem:[%s5008_s7] sm:$0xff] }
 0x33c   :  { %2184 = vmatmul.bf16.gmra.mxu1 %v4663_v9  ;;  %2373 = vmatpush.bf16.msrb.mxu2 %v3264_v19 }
 0x33d   :  { %v1887_v31 = vmax.f32 %v1817_v38, 0.0 }
 0x33f   :  { %v4729_v40 = vpack.c.bf16 %v1887_v31, %v1885_v50 }
 0x340   :  { %v1730_v23 = vpop.f32.mrf.mxu2  ;;  %v1554_v45 = vpop.f32.mrf.mxu0 }
 0x341   :  { %v1819_v2 = vpop.f32.mrf.mxu3  ;;  %v1555_v55 = vadd.f32 %v1554_v45, %v4600_v49  ;;  %v1643_v37 = vpop.f32.mrf.mxu1  ;;  %v1731_v1 = vadd.f32 %v1730_v23, %v1642_v56 }
 0x343   :  { %v1644_v51 = vadd.f32 %v1643_v37, %v1555_v55  ;;  %v1820_v44 = vadd.f32 %v1819_v2, %v1731_v1 }
 0x345   :  { %v1889_v30 = vmax.f32 %v1820_v44, 0.0  ;;  %v3276_v44 = vld [vmem:[%s5010_s9 + $0x20] sm:$0xff] }
 0x346   :  { %2574 = vmatpush.bf16.msrb.mxu3 %v3276_v44 }
 0x348   :  { %v1732_v32 = vpop.f32.mrf.mxu2  ;;  %v1557_v9 = vpop.f32.mrf.mxu0 }
 0x349   :  { %v1733_v7 = vadd.f32 %v1732_v32, %v1644_v51  ;;  %v1821_v52 = vpop.f32.mrf.mxu3  ;;  %v1558_v26 = vadd.f32 %v1557_v9, %v4600_v49  ;;  %v1646_v41 = vpop.f32.mrf.mxu1 }
 0x34b   :  { %v1822_v59 = vadd.f32 %v1821_v52, %v1733_v7  ;;  %v1647_v15 = vadd.f32 %v1646_v41, %v1558_v26  ;;  %2100 = vmatmul.bf16.gmra.mxu0 %v4421_v28 }
 0x34c   :  { %2189 = vmatmul.bf16.gmra.mxu1 %v4674_v11 }
 0x34d   :  { %v1891_v39 = vmax.f32 %v1822_v59, 0.0 }
 0x34f   :  { %v4738_v17 = vpack.c.bf16 %v1891_v39, %v1889_v30 }
 0x350   :  { %v1735_v47 = vpop.f32.mrf.mxu2  ;;  %v1559_v58 = vpop.f32.mrf.mxu0 }
 0x351   :  { %v1824_v61 = vpop.f32.mrf.mxu3  ;;  %v1560_v5 = vadd.f32 %v1559_v58, %v4600_v49  ;;  %v1648_v14 = vpop.f32.mrf.mxu1  ;;  %v1736_v3 = vadd.f32 %v1735_v47, %v1647_v15 }
 0x353   :  { %v1649_v36 = vadd.f32 %v1648_v14, %v1560_v5  ;;  %v1825_v27 = vadd.f32 %v1824_v61, %v1736_v3 }
 0x355   :  { %v1893_v48 = vmax.f32 %v1825_v27, 0.0 }
 0x358   :  { %v1737_v28 = vpop.f32.mrf.mxu2  ;;  %v1562_v11 = vpop.f32.mrf.mxu0 }
 0x359   :  { %v1738_v6 = vadd.f32 %v1737_v28, %v1649_v36  ;;  %v1826_v8 = vpop.f32.mrf.mxu3  ;;  %v1563_v12 = vadd.f32 %v1562_v11, %v4600_v49  ;;  %v1651_v60 = vpop.f32.mrf.mxu1 }
 0x35b   :  { %v1827_v46 = vadd.f32 %v1826_v8, %v1738_v6  ;;  %v1652_v42 = vadd.f32 %v1651_v60, %v1563_v12  ;;  %2105 = vmatmul.bf16.gmra.mxu0 %v4483_v13 }
 0x35c   :  { %2194 = vmatmul.bf16.gmra.mxu1 %v4682_v53 }
 0x35d   :  { %v1895_v0 = vmax.f32 %v1827_v46, 0.0 }
 0x35f   :  { %v4747_v25 = vpack.c.bf16 %v1895_v0, %v1893_v48 }
 0x360   :  { %v1740_v10 = vpop.f32.mrf.mxu2  ;;  %v1564_v4 = vpop.f32.mrf.mxu0 }
 0x361   :  { %v1829_v35 = vpop.f32.mrf.mxu3  ;;  %v1565_v38 = vadd.f32 %v1564_v4, %v4600_v49  ;;  %v1653_v56 = vpop.f32.mrf.mxu1  ;;  %v1741_v31 = vadd.f32 %v1740_v10, %v1652_v42 }
 0x363   :  { %v1654_v50 = vadd.f32 %v1653_v56, %v1565_v38  ;;  %v1830_v62 = vadd.f32 %v1829_v35, %v1741_v31  ;;  %v3275_v56 = vld [vmem:[%s5010_s9 + $0x18] sm:$0xff] }
 0x364   :  { %2575 = vmatpush.bf16.msrb.mxu3 %v3275_v56 }
 0x365   :  { %v1897_v1 = vmax.f32 %v1830_v62, 0.0 }
 0x368   :  { %v1742_v13 = vpop.f32.mrf.mxu2  ;;  %v1567_v53 = vpop.f32.mrf.mxu0 }
 0x369   :  { %v1743_v23 = vadd.f32 %v1742_v13, %v1654_v50  ;;  %v1831_v2 = vpop.f32.mrf.mxu3  ;;  %v1568_v45 = vadd.f32 %v1567_v53, %v4600_v49  ;;  %v1656_v55 = vpop.f32.mrf.mxu1 }
 0x36b   :  { %v1832_v37 = vadd.f32 %v1831_v2, %v1743_v23  ;;  %v1657_v51 = vadd.f32 %v1656_v55, %v1568_v45  ;;  %2110 = vmatmul.bf16.gmra.mxu0 %v4503_v43 }
 0x36c   :  { %2199 = vmatmul.bf16.gmra.mxu1 %v4693_v24 }
 0x36d   :  { %v1899_v32 = vmax.f32 %v1832_v37, 0.0 }
 0x36f   :  { %v4756_v7 = vpack.c.bf16 %v1899_v32, %v1897_v1 }
 0x370   :  { %v1745_v52 = vpop.f32.mrf.mxu2  ;;  %v1569_v26 = vpop.f32.mrf.mxu0 }
 0x371   :  { %v1834_v9 = vpop.f32.mrf.mxu3  ;;  %v1570_v41 = vadd.f32 %v1569_v26, %v4600_v49  ;;  %v1658_v59 = vpop.f32.mrf.mxu1  ;;  %v1746_v30 = vadd.f32 %v1745_v52, %v1657_v51 }
 0x373   :  { %v1659_v15 = vadd.f32 %v1658_v59, %v1570_v41  ;;  %v1835_v39 = vadd.f32 %v1834_v9, %v1746_v30 }
 0x375   :  { %v1901_v36 = vmax.f32 %v1835_v39, 0.0 }
 0x378   :  { %v1747_v43 = vpop.f32.mrf.mxu2  ;;  %v1572_v24 = vpop.f32.mrf.mxu0 }
 0x379   :  { %v1748_v34 = vadd.f32 %v1747_v43, %v1659_v15  ;;  %v1836_v47 = vpop.f32.mrf.mxu3  ;;  %v1573_v61 = vadd.f32 %v1572_v24, %v4600_v49  ;;  %v1661_v58 = vpop.f32.mrf.mxu1 }
 0x37b   :  { %v1837_v5 = vadd.f32 %v1836_v47, %v1748_v34  ;;  %v1662_v14 = vadd.f32 %v1661_v58, %v1573_v61  ;;  %2115 = vmatmul.bf16.gmra.mxu0 %v4517_v63  ;;  %v4768_v63 = vld [vmem:[%s5009_s6] ss:$0 sm:$0xff] }
 0x37c   :  { %2204 = vmatmul.bf16.gmra.mxu1 %v4702_v29 }
 0x37d   :  { %v1903_v3 = vmax.f32 %v1837_v5, 0.0 }
 0x37f   :  { %v4762_v28 = vpack.c.bf16 %v1903_v3, %v1901_v36 }
 0x380   :  { %v1750_v27 = vpop.f32.mrf.mxu2  ;;  %v1574_v8 = vpop.f32.mrf.mxu0 }
 0x381   :  { %v1839_v6 = vpop.f32.mrf.mxu3  ;;  %v1575_v11 = vadd.f32 %v1574_v8, %v4600_v49  ;;  %v1663_v12 = vpop.f32.mrf.mxu1  ;;  %v1751_v46 = vadd.f32 %v1750_v27, %v1662_v14 }
 0x383   :  { %v1664_v60 = vadd.f32 %v1663_v12, %v1575_v11  ;;  %v1840_v48 = vadd.f32 %v1839_v6, %v1751_v46 }
 0x385   :  { %v1905_v4 = vmax.f32 %v1840_v48, 0.0  ;;  %v5129_v48 = vld [vmem:[#allocation31_spill] sm:$0xff] }
 0x388   :  { %v1752_v42 = vpop.f32.mrf.mxu2  ;;  %v2081_v19 = vpop.f32.mrf.mxu0 }
 0x389   :  { %v1753_v0 = vadd.f32 %v1752_v42, %v1664_v60  ;;  %v1841_v10 = vpop.f32.mrf.mxu3  ;;  %v2170_v29 = vpop.f32.mrf.mxu1  ;;  %v2082_v49 = vadd.f32 %v4768_v63, %v2081_v19 }
 0x38b   :  { %v1842_v35 = vadd.f32 %v1841_v10, %v1753_v0  ;;  %2120 = vmatmul.bf16.gmra.mxu0 %v4525_v16  ;;  %v2171_v13 = vadd.f32 %v2170_v29, %v2082_v49  ;;  %v3273_v0 = vld [vmem:[%s5010_s9 + $0x8] sm:$0xff] }
 0x38c   :  { %2209 = vmatmul.bf16.gmra.mxu1 %v4711_v33 }
 0x38d   :  { %v1907_v38 = vmax.f32 %v1842_v35, 0.0  ;;  %v2250_v16 = vmax.f32 %v2171_v13, 0.0 }
 0x38f   :  { %v4776_v50 = vpack.c.bf16 %v1907_v38, %v1905_v4 }
 0x390   :  { %v2083_v31 = vpop.f32.mrf.mxu0 }
 0x391   :  { %v2084_v62 = vadd.f32 %v4768_v63, %v2083_v31  ;;  %v2172_v23 = vpop.f32.mrf.mxu1 }
 0x393   :  { %v2173_v2 = vadd.f32 %v2172_v23, %v2084_v62 }
 0x395   :  { %v2251_v53 = vmax.f32 %v2173_v2, 0.0 }
 0x397   :  { %v2282_v45 = vpack.c.bf16 %v2251_v53, %v2250_v16 }
 0x398   :  { %v2086_v55 = vpop.f32.mrf.mxu0 }
 0x399   :  { %v2175_v33 = vpop.f32.mrf.mxu1  ;;  %2374 = vmatmul.bf16.vlgmr.msrb.gmra.mxu2 %v2282_v45  ;;  %v2087_v37 = vadd.f32 %v4768_v63, %v2086_v55 }
 0x39b   :  { %2125 = vmatmul.bf16.gmra.mxu0 %v4539_v20  ;;  %v2176_v1 = vadd.f32 %v2175_v33, %v2087_v37 }
 0x39c   :  { %2214 = vmatmul.bf16.gmra.mxu1 %v4720_v21  ;;  %v3274_v21 = vld [vmem:[%s5010_s9 + $0x10] sm:$0xff] }
 0x39d   :  { %v2252_v9 = vmax.f32 %v2176_v1, 0.0  ;;  %2576 = vmatpush.bf16.msrb.mxu3 %v3274_v21 }
 0x3a0   :  { %v2088_v51 = vpop.f32.mrf.mxu0 }
 0x3a1   :  { %v2089_v32 = vadd.f32 %v4768_v63, %v2088_v51  ;;  %v2177_v44 = vpop.f32.mrf.mxu1  ;;  %2577 = vmatpush.bf16.msrb.mxu3 %v3273_v0 }
 0x3a3   :  { %v2178_v52 = vadd.f32 %v2177_v44, %v2089_v32 }
 0x3a5   :  { %v2253_v26 = vmax.f32 %v2178_v52, 0.0 }
 0x3a7   :  { %v2283_v41 = vpack.c.bf16 %v2253_v26, %v2252_v9 }
 0x3a8   :  { %v2091_v59 = vpop.f32.mrf.mxu0 }
 0x3a9   :  { %v2180_v15 = vpop.f32.mrf.mxu1  ;;  %2379 = vmatmul.bf16.gmra.mxu2 %v2283_v41  ;;  %v2092_v20 = vadd.f32 %v4768_v63, %v2091_v59 }
 0x3ab   :  { %2130 = vmatmul.bf16.gmra.mxu0 %v4547_v57  ;;  %v2181_v43 = vadd.f32 %v2180_v15, %v2092_v20 }
 0x3ac   :  { %2219 = vmatmul.bf16.gmra.mxu1 %v4729_v40  ;;  %v5128_v40 = vld [vmem:[#allocation30_spill] sm:$0xff] }
 0x3ad   :  { %v2254_v24 = vmax.f32 %v2181_v43, 0.0 }
 0x3b0   :  { %v2093_v30 = vpop.f32.mrf.mxu0 }
 0x3b1   :  { %v2094_v39 = vadd.f32 %v4768_v63, %v2093_v30  ;;  %v2182_v34 = vpop.f32.mrf.mxu1 }
 0x3b3   :  { %v2183_v47 = vadd.f32 %v2182_v34, %v2094_v39 }
 0x3b5   :  { %v2255_v61 = vmax.f32 %v2183_v47, 0.0 }
 0x3b7   :  { %v2284_v58 = vpack.c.bf16 %v2255_v61, %v2254_v24 }
 0x3b8   :  { %v2096_v5 = vpop.f32.mrf.mxu0 }
 0x3b9   :  { %v2185_v57 = vpop.f32.mrf.mxu1  ;;  %2384 = vmatmul.bf16.gmra.mxu2 %v2284_v58  ;;  %v2097_v14 = vadd.f32 %v4768_v63, %v2096_v5 }
 0x3bb   :  { %2135 = vmatmul.bf16.gmra.mxu0 %v5128_v40  ;;  %v2186_v3 = vadd.f32 %v2185_v57, %v2097_v14 }
 0x3bc   :  { %2224 = vmatmul.bf16.gmra.mxu1 %v4738_v17 }
 0x3bd   :  { %v2256_v11 = vmax.f32 %v2186_v3, 0.0 }
 0x3c0   :  { %v2098_v36 = vpop.f32.mrf.mxu0 }
 0x3c1   :  { %v2099_v27 = vadd.f32 %v4768_v63, %v2098_v36  ;;  %v2187_v6 = vpop.f32.mrf.mxu1 }
 0x3c3   :  { %v2188_v8 = vadd.f32 %v2187_v6, %v2099_v27 }
 0x3c5   :  { %v2257_v12 = vmax.f32 %v2188_v8, 0.0 }
 0x3c7   :  { %v2285_v60 = vpack.c.bf16 %v2257_v12, %v2256_v11 }
 0x3c8   :  { %v2101_v46 = vpop.f32.mrf.mxu0 }
 0x3c9   :  { %v2190_v42 = vpop.f32.mrf.mxu1  ;;  %2389 = vmatmul.bf16.gmra.mxu2 %v2285_v60  ;;  %v2102_v17 = vadd.f32 %v4768_v63, %v2101_v46  ;;  %v4822_v60 = vld [vmem:[%s5011_s8] ss:$0 sm:$0xff] }
 0x3cb   :  { %2140 = vmatmul.bf16.gmra.mxu0 %v5129_v48  ;;  %v2191_v10 = vadd.f32 %v2190_v42, %v2102_v17 }
 0x3cc   :  { %2229 = vmatmul.bf16.gmra.mxu1 %v4747_v25 }
 0x3cd   :  { %v2258_v38 = vmax.f32 %v2191_v10, 0.0 }
 0x3d0   :  { %v2103_v19 = vpop.f32.mrf.mxu0 }
 0x3d1   :  { %v2104_v29 = vadd.f32 %v4768_v63, %v2103_v19  ;;  %v2192_v35 = vpop.f32.mrf.mxu1 }
 0x3d3   :  { %v2193_v4 = vadd.f32 %v2192_v35, %v2104_v29 }
 0x3d5   :  { %v2259_v49 = vmax.f32 %v2193_v4, 0.0 }
 0x3d7   :  { %v2286_v56 = vpack.c.bf16 %v2259_v49, %v2258_v38 }
 0x3d8   :  { %v2106_v31 = vpop.f32.mrf.mxu0 }
 0x3d9   :  { %v2195_v13 = vpop.f32.mrf.mxu1  ;;  %2394 = vmatmul.bf16.gmra.mxu2 %v2286_v56  ;;  %v2107_v25 = vadd.f32 %v4768_v63, %v2106_v31 }
 0x3db   :  { %2145 = vmatmul.bf16.gmra.mxu0 %v4583_v22  ;;  %v2196_v23 = vadd.f32 %v2195_v13, %v2107_v25 }
 0x3dc   :  { %2234 = vmatmul.bf16.gmra.mxu1 %v4756_v7  ;;  %v3272_v7 = vld [vmem:[%s5010_s9] sm:$0xff] }
 0x3dd   :  { %v2260_v45 = vmax.f32 %v2196_v23, 0.0  ;;  %2578 = vmatpush.bf16.msrb.mxu3 %v3272_v7 }
 0x3e0   :  { %v2108_v62 = vpop.f32.mrf.mxu0 }
 0x3e1   :  { %v2109_v2 = vadd.f32 %v4768_v63, %v2108_v62  ;;  %v2197_v16 = vpop.f32.mrf.mxu1 }
 0x3e3   :  { %v2198_v53 = vadd.f32 %v2197_v16, %v2109_v2 }
 0x3e5   :  { %v2261_v55 = vmax.f32 %v2198_v53, 0.0 }
 0x3e7   :  { %v2287_v33 = vpack.c.bf16 %v2261_v55, %v2260_v45 }
 0x3e8   :  { %v2111_v37 = vpop.f32.mrf.mxu0 }
 0x3e9   :  { %v2200_v51 = vpop.f32.mrf.mxu1  ;;  %2399 = vmatmul.bf16.gmra.mxu2 %v2287_v33  ;;  %v2112_v22 = vadd.f32 %v4768_v63, %v2111_v37 }
 0x3eb   :  { %2150 = vmatmul.bf16.gmra.mxu0 %v4594_v18  ;;  %v2201_v32 = vadd.f32 %v2200_v51, %v2112_v22 }
 0x3ec   :  { %2239 = vmatmul.bf16.gmra.mxu1 %v4762_v28 }
 0x3ed   :  { %v2262_v26 = vmax.f32 %v2201_v32, 0.0 }
 0x3f0   :  { %v2113_v1 = vpop.f32.mrf.mxu0 }
 0x3f1   :  { %v2114_v44 = vadd.f32 %v4768_v63, %v2113_v1  ;;  %v2202_v52 = vpop.f32.mrf.mxu1 }
 0x3f3   :  { %v2203_v9 = vadd.f32 %v2202_v52, %v2114_v44 }
 0x3f5   :  { %v2263_v41 = vmax.f32 %v2203_v9, 0.0 }
 0x3f7   :  { %v2288_v59 = vpack.c.bf16 %v2263_v41, %v2262_v26 }
 0x3f8   :  { %v2116_v15 = vpop.f32.mrf.mxu0 }
 0x3f9   :  { %v2205_v18 = vpop.f32.mrf.mxu1  ;;  %2404 = vmatmul.bf16.gmra.mxu2 %v2288_v59  ;;  %v2117_v28 = vadd.f32 %v4768_v63, %v2116_v15 }
 0x3fb   :  { %2155 = vmatmul.bf16.gmra.mxu0 %v4613_v54  ;;  %v2206_v21 = vadd.f32 %v2205_v18, %v2117_v28 }
 0x3fc   :  { %2244 = vmatmul.bf16.gmra.mxu1 %v4776_v50 }
 0x3fd   :  { %v2264_v34 = vmax.f32 %v2206_v21, 0.0 }
 0x400   :  { %v2118_v20 = vpop.f32.mrf.mxu0 }
 0x401   :  { %v2119_v30 = vadd.f32 %v4768_v63, %v2118_v20  ;;  %v2207_v43 = vpop.f32.mrf.mxu1 }
 0x403   :  { %v2208_v39 = vadd.f32 %v2207_v43, %v2119_v30 }
 0x405   :  { %v2265_v47 = vmax.f32 %v2208_v39, 0.0 }
 0x407   :  { %v2289_v24 = vpack.c.bf16 %v2265_v47, %v2264_v34 }
 0x408   :  { %v2121_v61 = vpop.f32.mrf.mxu0 }
 0x409   :  { %v2210_v58 = vpop.f32.mrf.mxu1  ;;  %2409 = vmatmul.bf16.gmra.mxu2 %v2289_v24  ;;  %v2122_v5 = vadd.f32 %v4768_v63, %v2121_v61 }
 0x40b   :  { %v2211_v54 = vadd.f32 %v2210_v58, %v2122_v5 }
 0x40d   :  { %v2266_v36 = vmax.f32 %v2211_v54, 0.0 }
 0x410   :  { %v2123_v57 = vpop.f32.mrf.mxu0 }
 0x411   :  { %v2124_v50 = vadd.f32 %v4768_v63, %v2123_v57  ;;  %v2212_v40 = vpop.f32.mrf.mxu1 }
 0x413   :  { %v2213_v14 = vadd.f32 %v2212_v40, %v2124_v50 }
 0x415   :  { %v2267_v3 = vmax.f32 %v2213_v14, 0.0 }
 0x417   :  { %v2290_v27 = vpack.c.bf16 %v2267_v3, %v2266_v36 }
 0x418   :  { %v2126_v6 = vpop.f32.mrf.mxu0 }
 0x419   :  { %v2215_v8 = vpop.f32.mrf.mxu1  ;;  %2414 = vmatmul.bf16.gmra.mxu2 %v2290_v27  ;;  %v2127_v12 = vadd.f32 %v4768_v63, %v2126_v6 }
 0x41b   :  { %v2216_v42 = vadd.f32 %v2215_v8, %v2127_v12 }
 0x41c   :  { %v2375_v11 = vpop.f32.mrf.mxu2 }
 0x41d   :  { %v2376_v0 = vadd.f32 %v4822_v60, %v2375_v11  ;;  %v2268_v29 = vmax.f32 %v2216_v42, 0.0 }
 0x41f   :  { %v2455_v38 = vmax.f32 %v2376_v0, 0.0 }
 0x420   :  { %v2128_v46 = vpop.f32.mrf.mxu0 }
 0x421   :  { %v2129_v48 = vadd.f32 %v4768_v63, %v2128_v46  ;;  %v2217_v17 = vpop.f32.mrf.mxu1 }
 0x423   :  { %v2218_v19 = vadd.f32 %v2217_v17, %v2129_v48 }
 0x424   :  { %v2377_v10 = vpop.f32.mrf.mxu2 }
 0x425   :  { %v2269_v35 = vmax.f32 %v2218_v19, 0.0  ;;  %v2378_v4 = vadd.f32 %v4822_v60, %v2377_v10 }
 0x427   :  { %v2291_v49 = vpack.c.bf16 %v2269_v35, %v2268_v29  ;;  %v2456_v56 = vmax.f32 %v2378_v4, 0.0 }
 0x428   :  { %v2131_v31 = vpop.f32.mrf.mxu0 }
 0x429   :  { %v2487_v13 = vpack.c.bf16 %v2456_v56, %v2455_v38  ;;  %v2220_v25 = vpop.f32.mrf.mxu1  ;;  %2419 = vmatmul.bf16.gmra.mxu2 %v2291_v49  ;;  %v2132_v23 = vadd.f32 %v4768_v63, %v2131_v31 }
 0x42b   :  { %2579 = vmatmul.bf16.vlgmr.msrb.gmra.mxu3 %v2487_v13  ;;  %v2221_v16 = vadd.f32 %v2220_v25, %v2132_v23 }
 0x42c   :  { %v2380_v62 = vpop.f32.mrf.mxu2 }
 0x42d   :  { %v2381_v55 = vadd.f32 %v4822_v60, %v2380_v62  ;;  %v2270_v51 = vmax.f32 %v2221_v16, 0.0 }
 0x42f   :  { %v2457_v1 = vmax.f32 %v2381_v55, 0.0 }
 0x430   :  { %v2133_v2 = vpop.f32.mrf.mxu0 }
 0x431   :  { %v2134_v53 = vadd.f32 %v4768_v63, %v2133_v2  ;;  %v2222_v45 = vpop.f32.mrf.mxu1 }
 0x433   :  { %v2223_v33 = vadd.f32 %v2222_v45, %v2134_v53 }
 0x434   :  { %v2382_v37 = vpop.f32.mrf.mxu2 }
 0x435   :  { %v2271_v22 = vmax.f32 %v2223_v33, 0.0  ;;  %v2383_v7 = vadd.f32 %v4822_v60, %v2382_v37 }
 0x437   :  { %v2292_v32 = vpack.c.bf16 %v2271_v22, %v2270_v51  ;;  %v2458_v44 = vmax.f32 %v2383_v7, 0.0 }
 0x438   :  { %v2136_v52 = vpop.f32.mrf.mxu0 }
 0x439   :  { %v2225_v9 = vpop.f32.mrf.mxu1  ;;  %2424 = vmatmul.bf16.gmra.mxu2 %v2292_v32  ;;  %v2488_v26 = vpack.c.bf16 %v2458_v44, %v2457_v1  ;;  %v2137_v59 = vadd.f32 %v4768_v63, %v2136_v52 }
 0x43b   :  { %2584 = vmatmul.bf16.gmra.mxu3 %v2488_v26  ;;  %v2226_v18 = vadd.f32 %v2225_v9, %v2137_v59 }
 0x43c   :  { %v2385_v41 = vpop.f32.mrf.mxu2 }
 0x43d   :  { %v2386_v21 = vadd.f32 %v4822_v60, %v2385_v41  ;;  %v2272_v39 = vmax.f32 %v2226_v18, 0.0 }
 0x43f   :  { %v2459_v24 = vmax.f32 %v2386_v21, 0.0 }
 0x440   :  { %v2138_v15 = vpop.f32.mrf.mxu0 }
 0x441   :  { %v2139_v28 = vadd.f32 %v4768_v63, %v2138_v15  ;;  %v2227_v20 = vpop.f32.mrf.mxu1 }
 0x443   :  { %v2228_v30 = vadd.f32 %v2227_v20, %v2139_v28 }
 0x444   :  { %v2387_v43 = vpop.f32.mrf.mxu2 }
 0x445   :  { %v2273_v34 = vmax.f32 %v2228_v30, 0.0  ;;  %v2388_v47 = vadd.f32 %v4822_v60, %v2387_v43 }
 0x447   :  { %v2293_v61 = vpack.c.bf16 %v2273_v34, %v2272_v39  ;;  %v2460_v58 = vmax.f32 %v2388_v47, 0.0 }
 0x448   :  { %v2141_v5 = vpop.f32.mrf.mxu0 }
 0x449   :  { %v2230_v57 = vpop.f32.mrf.mxu1  ;;  %2429 = vmatmul.bf16.gmra.mxu2 %v2293_v61  ;;  %v2489_v54 = vpack.c.bf16 %v2460_v58, %v2459_v24  ;;  %v2142_v40 = vadd.f32 %v4768_v63, %v2141_v5 }
 0x44b   :  { %2589 = vmatmul.bf16.gmra.mxu3 %v2489_v54  ;;  %v2231_v36 = vadd.f32 %v2230_v57, %v2142_v40 }
 0x44c   :  { %v2390_v50 = vpop.f32.mrf.mxu2 }
 0x44d   :  { %v2391_v6 = vadd.f32 %v4822_v60, %v2390_v50  ;;  %v2274_v12 = vmax.f32 %v2231_v36, 0.0 }
 0x44f   :  { %v2461_v48 = vmax.f32 %v2391_v6, 0.0 }
 0x450   :  { %v2143_v14 = vpop.f32.mrf.mxu0 }
 0x451   :  { %v2144_v3 = vadd.f32 %v4768_v63, %v2143_v14  ;;  %v2232_v27 = vpop.f32.mrf.mxu1 }
 0x453   :  { %v2233_v8 = vadd.f32 %v2232_v27, %v2144_v3 }
 0x454   :  { %v2392_v11 = vpop.f32.mrf.mxu2 }
 0x455   :  { %v2275_v46 = vmax.f32 %v2233_v8, 0.0  ;;  %v2393_v42 = vadd.f32 %v4822_v60, %v2392_v11 }
 0x457   :  { %v2294_v17 = vpack.c.bf16 %v2275_v46, %v2274_v12  ;;  %v2462_v0 = vmax.f32 %v2393_v42, 0.0 }
 0x458   :  { %v2146_v19 = vpop.f32.mrf.mxu0 }
 0x459   :  { %v2235_v10 = vpop.f32.mrf.mxu1  ;;  %2434 = vmatmul.bf16.gmra.mxu2 %v2294_v17  ;;  %v2490_v29 = vpack.c.bf16 %v2462_v0, %v2461_v48  ;;  %v2147_v4 = vadd.f32 %v4768_v63, %v2146_v19 }
 0x45b   :  { %2594 = vmatmul.bf16.gmra.mxu3 %v2490_v29  ;;  %v2236_v49 = vadd.f32 %v2235_v10, %v2147_v4 }
 0x45c   :  { %v2395_v35 = vpop.f32.mrf.mxu2 }
 0x45d   :  { %v2396_v13 = vadd.f32 %v4822_v60, %v2395_v35  ;;  %v2276_v23 = vmax.f32 %v2236_v49, 0.0  ;;  %v4858_v49 = vld [vmem:[%s5012_s10] ss:$0 sm:$0xff] }
 0x45f   :  { %v2463_v53 = vmax.f32 %v2396_v13, 0.0 }
 0x460   :  { %v2148_v38 = vpop.f32.mrf.mxu0 }
 0x461   :  { %v2149_v56 = vadd.f32 %v4768_v63, %v2148_v38  ;;  %v2237_v31 = vpop.f32.mrf.mxu1 }
 0x463   :  { %v2238_v25 = vadd.f32 %v2237_v31, %v2149_v56 }
 0x464   :  { %v2397_v62 = vpop.f32.mrf.mxu2 }
 0x465   :  { %v2277_v2 = vmax.f32 %v2238_v25, 0.0  ;;  %v2398_v16 = vadd.f32 %v4822_v60, %v2397_v62 }
 0x467   :  { %v2295_v45 = vpack.c.bf16 %v2277_v2, %v2276_v23  ;;  %v2464_v55 = vmax.f32 %v2398_v16, 0.0 }
 0x468   :  { %v2151_v33 = vpop.f32.mrf.mxu0 }
 0x469   :  { %v2491_v37 = vpack.c.bf16 %v2464_v55, %v2463_v53  ;;  %v2240_v51 = vpop.f32.mrf.mxu1  ;;  %2439 = vmatmul.bf16.gmra.mxu2 %v2295_v45  ;;  %v2152_v7 = vadd.f32 %v4768_v63, %v2151_v33 }
 0x46b   :  { %2599 = vmatmul.bf16.gmra.mxu3 %v2491_v37  ;;  %v2241_v32 = vadd.f32 %v2240_v51, %v2152_v7 }
 0x46c   :  { %v2400_v22 = vpop.f32.mrf.mxu2 }
 0x46d   :  { %v2401_v9 = vadd.f32 %v4822_v60, %v2400_v22  ;;  %v2278_v59 = vmax.f32 %v2241_v32, 0.0 }
 0x46f   :  { %v2465_v28 = vmax.f32 %v2401_v9, 0.0 }
 0x470   :  { %v2153_v1 = vpop.f32.mrf.mxu0 }
 0x471   :  { %v2154_v44 = vadd.f32 %v4768_v63, %v2153_v1  ;;  %v2242_v52 = vpop.f32.mrf.mxu1 }
 0x473   :  { %v2243_v26 = vadd.f32 %v2242_v52, %v2154_v44 }
 0x474   :  { %v2402_v41 = vpop.f32.mrf.mxu2 }
 0x475   :  { %v2279_v15 = vmax.f32 %v2243_v26, 0.0  ;;  %v2403_v18 = vadd.f32 %v4822_v60, %v2402_v41 }
 0x477   :  { %v2296_v20 = vpack.c.bf16 %v2279_v15, %v2278_v59  ;;  %v2466_v21 = vmax.f32 %v2403_v18, 0.0 }
 0x478   :  { %v2156_v30 = vpop.f32.mrf.mxu0 }
 0x479   :  { %v2492_v43 = vpack.c.bf16 %v2466_v21, %v2465_v28  ;;  %v2245_v39 = vpop.f32.mrf.mxu1  ;;  %2444 = vmatmul.bf16.gmra.mxu2 %v2296_v20  ;;  %v2157_v47 = vadd.f32 %v4768_v63, %v2156_v30 }
 0x47b   :  { %2604 = vmatmul.bf16.gmra.mxu3 %v2492_v43  ;;  %v2246_v61 = vadd.f32 %v2245_v39, %v2157_v47 }
 0x47c   :  { %v2405_v34 = vpop.f32.mrf.mxu2 }
 0x47d   :  { %v2406_v57 = vadd.f32 %v4822_v60, %v2405_v34  ;;  %v2280_v40 = vmax.f32 %v2246_v61, 0.0 }
 0x47f   :  { %v2467_v3 = vmax.f32 %v2406_v57, 0.0 }
 0x480   :  { %v2158_v24 = vpop.f32.mrf.mxu0 }
 0x481   :  { %v2159_v58 = vadd.f32 %v4768_v63, %v2158_v24  ;;  %v2247_v5 = vpop.f32.mrf.mxu1 }
 0x483   :  { %v2248_v54 = vadd.f32 %v2247_v5, %v2159_v58 }
 0x484   :  { %v2407_v50 = vpop.f32.mrf.mxu2 }
 0x485   :  { %v2281_v14 = vmax.f32 %v2248_v54, 0.0  ;;  %v2408_v36 = vadd.f32 %v4822_v60, %v2407_v50 }
 0x487   :  { %v2297_v27 = vpack.c.bf16 %v2281_v14, %v2280_v40  ;;  %v2468_v6 = vmax.f32 %v2408_v36, 0.0 }
 0x489   :  { %v2493_v8 = vpack.c.bf16 %v2468_v6, %v2467_v3  ;;  %2449 = vmatmul.bf16.gmra.mxu2 %v2297_v27 }
 0x48b   :  { %2609 = vmatmul.bf16.gmra.mxu3 %v2493_v8 }
 0x48c   :  { %v2410_v11 = vpop.f32.mrf.mxu2 }
 0x48d   :  { %v2411_v12 = vadd.f32 %v4822_v60, %v2410_v11 }
 0x48f   :  { %v2469_v42 = vmax.f32 %v2411_v12, 0.0 }
 0x494   :  { %v2412_v46 = vpop.f32.mrf.mxu2 }
 0x495   :  { %v2413_v63 = vadd.f32 %v4822_v60, %v2412_v46 }
 0x497   :  { %v2470_v48 = vmax.f32 %v2413_v63, 0.0 }
 0x499   :  { %v2494_v17 = vpack.c.bf16 %v2470_v48, %v2469_v42 }
 0x49b   :  { %2614 = vmatmul.bf16.gmra.mxu3 %v2494_v17 }
 0x49c   :  { %v2415_v0 = vpop.f32.mrf.mxu2 }
 0x49d   :  { %v2416_v19 = vadd.f32 %v4822_v60, %v2415_v0 }
 0x49f   :  { %v2471_v35 = vmax.f32 %v2416_v19, 0.0 }
 0x4a4   :  { %v2417_v10 = vpop.f32.mrf.mxu2 }
 0x4a5   :  { %v2418_v29 = vadd.f32 %v4822_v60, %v2417_v10 }
 0x4a7   :  { %v2472_v4 = vmax.f32 %v2418_v29, 0.0 }
 0x4a9   :  { %v2495_v38 = vpack.c.bf16 %v2472_v4, %v2471_v35 }
 0x4ab   :  { %2619 = vmatmul.bf16.gmra.mxu3 %v2495_v38 }
 0x4ac   :  { %v2420_v56 = vpop.f32.mrf.mxu2 }
 0x4ad   :  { %v2421_v25 = vadd.f32 %v4822_v60, %v2420_v56 }
 0x4ae   :  { %v2580_v31 = vpop.f32.mrf.mxu3 }
 0x4af   :  { %v2581_v13 = vadd.f32 %v4858_v49, %v2580_v31  ;;  %v2473_v16 = vmax.f32 %v2421_v25, 0.0 }
 0x4b1   :  { %2660 = vst [vmem:[%s5013_s11] sm:$0xff] %v2581_v13 }
 0x4b4   :  { %v2422_v62 = vpop.f32.mrf.mxu2 }
 0x4b5   :  { %v2423_v23 = vadd.f32 %v4822_v60, %v2422_v62 }
 0x4b6   :  { %v2582_v2 = vpop.f32.mrf.mxu3 }
 0x4b7   :  { %v2474_v53 = vmax.f32 %v2423_v23, 0.0  ;;  %v2583_v45 = vadd.f32 %v4858_v49, %v2582_v2 }
 0x4b9   :  { %v2496_v55 = vpack.c.bf16 %v2474_v53, %v2473_v16  ;;  %2661 = vst [vmem:[%s5013_s11 + $0x8] sm:$0xff] %v2583_v45 }
 0x4bb   :  { %2624 = vmatmul.bf16.gmra.mxu3 %v2496_v55 }
 0x4bc   :  { %v2425_v33 = vpop.f32.mrf.mxu2 }
 0x4bd   :  { %v2426_v22 = vadd.f32 %v4822_v60, %v2425_v33 }
 0x4be   :  { %v2585_v37 = vpop.f32.mrf.mxu3 }
 0x4bf   :  { %v2586_v51 = vadd.f32 %v4858_v49, %v2585_v37  ;;  %v2475_v44 = vmax.f32 %v2426_v22, 0.0 }
 0x4c1   :  { %2662 = vst [vmem:[%s5013_s11 + $0x10] sm:$0xff] %v2586_v51 }
 0x4c4   :  { %v2427_v7 = vpop.f32.mrf.mxu2 }
 0x4c5   :  { %v2428_v1 = vadd.f32 %v4822_v60, %v2427_v7 }
 0x4c6   :  { %v2587_v32 = vpop.f32.mrf.mxu3 }
 0x4c7   :  { %v2476_v52 = vmax.f32 %v2428_v1, 0.0  ;;  %v2588_v9 = vadd.f32 %v4858_v49, %v2587_v32 }
 0x4c9   :  { %v2497_v26 = vpack.c.bf16 %v2476_v52, %v2475_v44  ;;  %2663 = vst [vmem:[%s5013_s11 + $0x18] sm:$0xff] %v2588_v9 }
 0x4cb   :  { %2629 = vmatmul.bf16.gmra.mxu3 %v2497_v26 }
 0x4cc   :  { %v2430_v41 = vpop.f32.mrf.mxu2 }
 0x4cd   :  { %v2431_v18 = vadd.f32 %v4822_v60, %v2430_v41 }
 0x4ce   :  { %v2590_v59 = vpop.f32.mrf.mxu3 }
 0x4cf   :  { %v2591_v15 = vadd.f32 %v4858_v49, %v2590_v59  ;;  %v2477_v30 = vmax.f32 %v2431_v18, 0.0 }
 0x4d1   :  { %2664 = vst [vmem:[%s5013_s11 + $0x20] sm:$0xff] %v2591_v15 }
 0x4d4   :  { %v2432_v28 = vpop.f32.mrf.mxu2 }
 0x4d5   :  { %v2433_v20 = vadd.f32 %v4822_v60, %v2432_v28 }
 0x4d6   :  { %v2592_v21 = vpop.f32.mrf.mxu3 }
 0x4d7   :  { %v2478_v43 = vmax.f32 %v2433_v20, 0.0  ;;  %v2593_v39 = vadd.f32 %v4858_v49, %v2592_v21 }
 0x4d9   :  { %v2498_v34 = vpack.c.bf16 %v2478_v43, %v2477_v30  ;;  %2665 = vst [vmem:[%s5013_s11 + $0x28] sm:$0xff] %v2593_v39 }
 0x4db   :  { %2634 = vmatmul.bf16.gmra.mxu3 %v2498_v34 }
 0x4dc   :  { %v2435_v47 = vpop.f32.mrf.mxu2 }
 0x4dd   :  { %v2436_v58 = vadd.f32 %v4822_v60, %v2435_v47 }
 0x4de   :  { %v2595_v24 = vpop.f32.mrf.mxu3 }
 0x4df   :  { %v2596_v61 = vadd.f32 %v4858_v49, %v2595_v24  ;;  %v2479_v50 = vmax.f32 %v2436_v58, 0.0 }
 0x4e1   :  { %2666 = vst [vmem:[%s5013_s11 + $0x30] sm:$0xff] %v2596_v61 }
 0x4e4   :  { %v2437_v5 = vpop.f32.mrf.mxu2 }
 0x4e5   :  { %v2438_v57 = vadd.f32 %v4822_v60, %v2437_v5 }
 0x4e6   :  { %v2597_v54 = vpop.f32.mrf.mxu3 }
 0x4e7   :  { %v2480_v40 = vmax.f32 %v2438_v57, 0.0  ;;  %v2598_v14 = vadd.f32 %v4858_v49, %v2597_v54 }
 0x4e9   :  { %v2499_v36 = vpack.c.bf16 %v2480_v40, %v2479_v50  ;;  %2667 = vst [vmem:[%s5013_s11 + $0x38] sm:$0xff] %v2598_v14 }
 0x4eb   :  { %2639 = vmatmul.bf16.gmra.mxu3 %v2499_v36 }
 0x4ec   :  { %v2440_v3 = vpop.f32.mrf.mxu2 }
 0x4ed   :  { %v2441_v8 = vadd.f32 %v4822_v60, %v2440_v3 }
 0x4ee   :  { %v2600_v27 = vpop.f32.mrf.mxu3 }
 0x4ef   :  { %v2601_v6 = vadd.f32 %v4858_v49, %v2600_v27  ;;  %v2481_v63 = vmax.f32 %v2441_v8, 0.0 }
 0x4f1   :  { %2668 = vst [vmem:[%s5013_s11 + $0x40] sm:$0xff] %v2601_v6 }
 0x4f4   :  { %v2442_v11 = vpop.f32.mrf.mxu2 }
 0x4f5   :  { %v2443_v12 = vadd.f32 %v4822_v60, %v2442_v11 }
 0x4f6   :  { %v2602_v46 = vpop.f32.mrf.mxu3 }
 0x4f7   :  { %v2482_v42 = vmax.f32 %v2443_v12, 0.0  ;;  %v2603_v48 = vadd.f32 %v4858_v49, %v2602_v46 }
 0x4f9   :  { %v2500_v17 = vpack.c.bf16 %v2482_v42, %v2481_v63  ;;  %2669 = vst [vmem:[%s5013_s11 + $0x48] sm:$0xff] %v2603_v48 }
 0x4fb   :  { %2644 = vmatmul.bf16.gmra.mxu3 %v2500_v17 }
 0x4fc   :  { %v2445_v0 = vpop.f32.mrf.mxu2 }
 0x4fd   :  { %v2446_v29 = vadd.f32 %v4822_v60, %v2445_v0 }
 0x4fe   :  { %v2605_v19 = vpop.f32.mrf.mxu3 }
 0x4ff   :  { %v2606_v10 = vadd.f32 %v4858_v49, %v2605_v19  ;;  %v2483_v56 = vmax.f32 %v2446_v29, 0.0 }
 0x501   :  { %2670 = vst [vmem:[%s5013_s11 + $0x50] sm:$0xff] %v2606_v10 }
 0x504   :  { %v2447_v35 = vpop.f32.mrf.mxu2 }
 0x505   :  { %v2448_v4 = vadd.f32 %v4822_v60, %v2447_v35 }
 0x506   :  { %v2607_v38 = vpop.f32.mrf.mxu3 }
 0x507   :  { %v2484_v31 = vmax.f32 %v2448_v4, 0.0  ;;  %v2608_v13 = vadd.f32 %v4858_v49, %v2607_v38 }
 0x509   :  { %v2501_v25 = vpack.c.bf16 %v2484_v31, %v2483_v56  ;;  %2671 = vst [vmem:[%s5013_s11 + $0x58] sm:$0xff] %v2608_v13 }
 0x50b   :  { %2649 = vmatmul.bf16.gmra.mxu3 %v2501_v25 }
 0x50c   :  { %v2450_v62 = vpop.f32.mrf.mxu2 }
 0x50d   :  { %v2451_v16 = vadd.f32 %v4822_v60, %v2450_v62 }
 0x50e   :  { %v2610_v23 = vpop.f32.mrf.mxu3 }
 0x50f   :  { %v2611_v2 = vadd.f32 %v4858_v49, %v2610_v23  ;;  %v2485_v33 = vmax.f32 %v2451_v16, 0.0 }
 0x511   :  { %2672 = vst [vmem:[%s5013_s11 + $0x60] sm:$0xff] %v2611_v2 }
 0x514   :  { %v2452_v53 = vpop.f32.mrf.mxu2 }
 0x515   :  { %v2453_v45 = vadd.f32 %v4822_v60, %v2452_v53 }
 0x516   :  { %v2612_v55 = vpop.f32.mrf.mxu3 }
 0x517   :  { %v2486_v37 = vmax.f32 %v2453_v45, 0.0  ;;  %v2613_v51 = vadd.f32 %v4858_v49, %v2612_v55 }
 0x519   :  { %v2502_v22 = vpack.c.bf16 %v2486_v37, %v2485_v33  ;;  %2673 = vst [vmem:[%s5013_s11 + $0x68] sm:$0xff] %v2613_v51 }
 0x51b   :  { %2654 = vmatmul.bf16.gmra.mxu3 %v2502_v22 }
 0x51e   :  { %v2615_v7 = vpop.f32.mrf.mxu3 }
 0x51f   :  { %v2616_v1 = vadd.f32 %v4858_v49, %v2615_v7 }
 0x521   :  { %2674 = vst [vmem:[%s5013_s11 + $0x70] sm:$0xff] %v2616_v1 }
 0x526   :  { %v2617_v32 = vpop.f32.mrf.mxu3 }
 0x527   :  { %v2618_v60 = vadd.f32 %v4858_v49, %v2617_v32 }
 0x529   :  { %2675 = vst [vmem:[%s5013_s11 + $0x78] sm:$0xff] %v2618_v60 }
 0x52e   :  { %v2620_v44 = vpop.f32.mrf.mxu3 }
 0x52f   :  { %v2621_v52 = vadd.f32 %v4858_v49, %v2620_v44 }
 0x531   :  { %2676 = vst [vmem:[%s5013_s11 + $0x80] sm:$0xff] %v2621_v52 }
 0x536   :  { %v2622_v9 = vpop.f32.mrf.mxu3 }
 0x537   :  { %v2623_v26 = vadd.f32 %v4858_v49, %v2622_v9 }
 0x539   :  { %2677 = vst [vmem:[%s5013_s11 + $0x88] sm:$0xff] %v2623_v26 }
 0x53e   :  { %v2625_v41 = vpop.f32.mrf.mxu3 }
 0x53f   :  { %v2626_v59 = vadd.f32 %v4858_v49, %v2625_v41 }
 0x541   :  { %2678 = vst [vmem:[%s5013_s11 + $0x90] sm:$0xff] %v2626_v59 }
 0x546   :  { %v2627_v15 = vpop.f32.mrf.mxu3 }
 0x547   :  { %v2628_v18 = vadd.f32 %v4858_v49, %v2627_v15 }
 0x549   :  { %2679 = vst [vmem:[%s5013_s11 + $0x98] sm:$0xff] %v2628_v18 }
 0x54e   :  { %v2630_v28 = vpop.f32.mrf.mxu3 }
 0x54f   :  { %v2631_v20 = vadd.f32 %v4858_v49, %v2630_v28 }
 0x551   :  { %2680 = vst [vmem:[%s5013_s11 + $0xa0] sm:$0xff] %v2631_v20 }
 0x556   :  { %v2632_v21 = vpop.f32.mrf.mxu3 }
 0x557   :  { %v2633_v30 = vadd.f32 %v4858_v49, %v2632_v21 }
 0x559   :  { %2681 = vst [vmem:[%s5013_s11 + $0xa8] sm:$0xff] %v2633_v30 }
 0x55e   :  { %v2635_v43 = vpop.f32.mrf.mxu3 }
 0x55f   :  { %v2636_v39 = vadd.f32 %v4858_v49, %v2635_v43 }
 0x561   :  { %2682 = vst [vmem:[%s5013_s11 + $0xb0] sm:$0xff] %v2636_v39 }
 0x566   :  { %v2637_v34 = vpop.f32.mrf.mxu3 }
 0x567   :  { %v2638_v47 = vadd.f32 %v4858_v49, %v2637_v34 }
 0x569   :  { %2683 = vst [vmem:[%s5013_s11 + $0xb8] sm:$0xff] %v2638_v47 }
 0x56e   :  { %v2640_v24 = vpop.f32.mrf.mxu3 }
 0x56f   :  { %v2641_v61 = vadd.f32 %v4858_v49, %v2640_v24 }
 0x571   :  { %2684 = vst [vmem:[%s5013_s11 + $0xc0] sm:$0xff] %v2641_v61 }
 0x576   :  { %v2642_v58 = vpop.f32.mrf.mxu3 }
 0x577   :  { %v2643_v5 = vadd.f32 %v4858_v49, %v2642_v58 }
 0x579   :  { %2685 = vst [vmem:[%s5013_s11 + $0xc8] sm:$0xff] %v2643_v5 }
 0x57e   :  { %v2645_v57 = vpop.f32.mrf.mxu3 }
 0x57f   :  { %v2646_v54 = vadd.f32 %v4858_v49, %v2645_v57 }
 0x581   :  { %2686 = vst [vmem:[%s5013_s11 + $0xd0] sm:$0xff] %v2646_v54 }
 0x586   :  { %v2647_v50 = vpop.f32.mrf.mxu3 }
 0x587   :  { %v2648_v40 = vadd.f32 %v4858_v49, %v2647_v50 }
 0x589   :  { %2687 = vst [vmem:[%s5013_s11 + $0xd8] sm:$0xff] %v2648_v40 }
 0x58e   :  { %v2650_v14 = vpop.f32.mrf.mxu3 }
 0x58f   :  { %v2651_v36 = vadd.f32 %v4858_v49, %v2650_v14 }
 0x591   :  { %2688 = vst [vmem:[%s5013_s11 + $0xe0] sm:$0xff] %v2651_v36 }
 0x596   :  { %v2652_v3 = vpop.f32.mrf.mxu3 }
 0x597   :  { %v2653_v27 = vadd.f32 %v4858_v49, %v2652_v3 }
 0x599   :  { %2689 = vst [vmem:[%s5013_s11 + $0xe8] sm:$0xff] %v2653_v27 }
 0x59e   :  { %v2655_v6 = vpop.f32.mrf.mxu3 }
 0x59f   :  { %v2656_v8 = vadd.f32 %v4858_v49, %v2655_v6 }
 0x5a1   :  { %2690 = vst [vmem:[%s5013_s11 + $0xf0] sm:$0xff] %v2656_v8 }
 0x5a6   :  { %v2657_v11 = vpop.f32.mrf.mxu3 }
 0x5a7   :  { %v2658_v12 = vadd.f32 %v4858_v49, %v2657_v11 }
 0x5a9   :  { %2691 = vst [vmem:[%s5013_s11 + $0xf8] sm:$0xff] %v2658_v12 }

</bundles_post_ra>
